<compile_context>
chip_gen: v7x
topology: tpu7x:2x2x1
jax: 0.10.0
libtpu: 0.0.40
codegen_flags: <defaults>
</compile_context>

<pallas_src>
import functools

import jax
import jax.numpy as jnp
import numpy as np
from jax.experimental import pallas as pl
from jax.experimental.pallas import tpu as pltpu


def _dncnn_layer_kernel(x_ref, w_ref, shift_ref, o_ref, act_ref, *, D, H, K):
    """One (batch element, layer) grid step.

    x_ref:     (1, D+2, H+2, K)   pre-padded input volume, K = (W+2)*C
    w_ref:     (1, 9, K, K)       this layer's 9 block-Toeplitz tap matrices
    shift_ref: (1, 1, K)          this layer's BN shift tiled over W (halo cols = 0)
    o_ref:     (1, D*H, K)        final-layer activations (lane-dense rows)
    act_ref:   (D+2, H+2, K)      VMEM-resident activations, persist across layers
    """
    l = pl.program_id(1)
    n_layers = pl.num_programs(1)
    is_last = l == n_layers - 1

    # Layer 0: pull the already zero-haloed, channel-padded input into the
    # resident activation buffer.  The halo is never written afterwards, so no
    # per-step zeroing is needed; done unconditionally per batch element.
    @pl.when(l == 0)
    def _():
        act_ref[...] = x_ref[0]

    # 9 accumulating MXU matmuls, one per (kd, kh) tap.  The kw taps and the
    # zero padding along W are folded into the block-Toeplitz weight, so each
    # LHS is a contiguous, lane-dense (D*H, K) window of the activations.
    acc = jnp.zeros((D * H, K), jnp.float32)
    for kd in range(3):
        for kh in range(3):
            a = act_ref[kd:kd + D, kh:kh + H, :].reshape(D * H, K)
            acc = acc + jnp.dot(a, w_ref[0, kd * 3 + kh],
                                preferred_element_type=jnp.float32)

    y = acc + shift_ref[0]                                   # (1, K) broadcast
    # ReLU on every layer except the last (scalar floor keeps codegen simple).
    floor = jnp.where(is_last, jnp.float32(-jnp.inf), jnp.float32(0.0))
    y = jnp.maximum(y, floor)

    @pl.when(l < n_layers - 1)
    def _():
        # Interior write-back.  The W-halo columns of y are exactly zero by
        # construction (zero Toeplitz columns + zero shift) and the D/H halo
        # rows are untouched, so "same" padding stays correct for the next layer.
        act_ref[1:1 + D, 1:1 + H, :] = y.reshape(D, H, K)

    @pl.when(is_last)
    def _():
        o_ref[...] = y.reshape(1, D * H, K)


def fused_dncnn(x_pad, w_toep, shift_toep):
    """x_pad: (N, D+2, H+2, (W+2)*C); w_toep: (L, 9, K, K); shift: (L, 1, K)."""
    N, DP, HP, K = x_pad.shape
    L = w_toep.shape[0]
    D, H = DP - 2, HP - 2

    kernel = functools.partial(_dncnn_layer_kernel, D=D, H=H, K=K)
    return pl.pallas_call(
        kernel,
        out_shape=jax.ShapeDtypeStruct((N, D * H, K), jnp.float32),
        grid_spec=pltpu.PrefetchScalarGridSpec(
            num_scalar_prefetch=0,
            grid=(N, L),                      # batch (parallel) x layer (sequential)
            in_specs=[
                pl.BlockSpec((1, DP, HP, K), lambda n, l: (n, 0, 0, 0)),
                pl.BlockSpec((1, 9, K, K), lambda n, l: (l, 0, 0, 0)),
                pl.BlockSpec((1, 1, K), lambda n, l: (l, 0, 0)),
            ],
            out_specs=pl.BlockSpec((1, D * H, K), lambda n, l: (n, 0, 0)),
            scratch_shapes=[pltpu.VMEM((DP, HP, K), jnp.float32)],
        ),
        compiler_params=pltpu.CompilerParams(
            dimension_semantics=("parallel", "arbitrary"),
            # Working set ~8 MiB (weights double-buffered per layer); explicit
            # limit keeps headroom on every generation incl. v7x's 64 MiB VMEM.
            vmem_limit_bytes=32 * 1024 * 1024,
        ),
    )(x_pad, w_toep, shift_toep)


def prepare_toeplitz_params(params, C, W):
    """Fold BN scale into the conv weights, zero-pad channels to a uniform width
    C, and build per-(kd,kh) block-Toeplitz matrices of shape ((W+2)*C, (W+2)*C)
    that realize the kw taps and the zero padding along W inside one matmul."""
    L = len(params)
    K = (W + 2) * C
    T = np.zeros((L, 9, K, K), np.float32)
    shift = np.zeros((L, 1, K), np.float32)
    for l, layer in enumerate(params):
        # ReLU follows every conv except the last one (module structure).
        assert bool(layer["relu"]) == (l < L - 1)
        w = np.asarray(layer["w"], np.float32) * np.asarray(layer["scale"],
                                                            np.float32)
        cin, cout = w.shape[3], w.shape[4]
        wpad = np.zeros((3, 3, 3, C, C), np.float32)
        wpad[..., :cin, :cout] = w                       # zero rows/cols elsewhere
        sh = np.zeros((C,), np.float32)
        sh[:cout] = np.asarray(layer["shift"], np.float32)
        for kd in range(3):
            for kh in range(3):
                t = kd * 3 + kh
                for wo in range(1, W + 1):               # output pos (padded coords)
                    for kw in range(3):
                        jp = wo - 1 + kw                 # input pos (padded coords)
                        T[l, t, jp * C:(jp + 1) * C,
                          wo * C:(wo + 1) * C] = wpad[kd, kh, kw]
        for wo in range(1, W + 1):                       # halo columns keep shift 0
            shift[l, 0, wo * C:(wo + 1) * C] = sh
    return jnp.asarray(T), jnp.asarray(shift)


def make_params(key, input_features=9, middle_features=32, num_conv_layers=4):
    """Deterministic synthetic parameters matching IntermediateDnCNN.__init__."""
    assert input_features in (9, 27)
    output_features = 8 if input_features == 9 else 24
    eps = 1e-5  # PyTorch BatchNorm3d default
    layers = []

    def conv_w(k, cin, cout):
        # stored like PyTorch (Cout, Cin, 3,3,3), transposed to (3,3,3,Cin,Cout)
        w = 0.05 * jax.random.normal(k, (cout, cin, 3, 3, 3), jnp.float32)
        return jnp.transpose(w, (2, 3, 4, 1, 0))

    keys = jax.random.split(key, num_conv_layers * 5)
    ki = 0

    # layer 0: conv(in->mid) + ReLU
    layers.append(dict(w=conv_w(keys[ki], input_features, middle_features),
                       scale=jnp.ones((middle_features,), jnp.float32),
                       shift=jnp.zeros((middle_features,), jnp.float32),
                       relu=True)); ki += 1

    # middle layers: conv(mid->mid) + BN (eval, folded) + ReLU
    for _ in range(num_conv_layers - 2):
        w = conv_w(keys[ki], middle_features, middle_features); ki += 1
        gamma = jax.random.uniform(keys[ki], (middle_features,),
                                   minval=0.5, maxval=1.5); ki += 1
        beta = 0.1 * jax.random.normal(keys[ki], (middle_features,)); ki += 1
        rmean = 0.1 * jax.random.normal(keys[ki], (middle_features,)); ki += 1
        rvar = jax.random.uniform(keys[ki], (middle_features,),
                                  minval=0.5, maxval=1.5); ki += 1
        s = gamma / jnp.sqrt(rvar + eps)
        layers.append(dict(w=w, scale=s, shift=beta - rmean * s, relu=True))

    # last layer: conv(mid->out), no BN, no ReLU
    layers.append(dict(w=conv_w(keys[ki], middle_features, output_features),
                       scale=jnp.ones((output_features,), jnp.float32),
                       shift=jnp.zeros((output_features,), jnp.float32),
                       relu=False))
    return layers


def intermediate_dncnn_forward(x_ncdhw, params):
    """PyTorch-semantics forward: x is NCDHW float32, returns NCDHW float32."""
    N, cin, D, H, W = x_ncdhw.shape
    C = max(max(l["w"].shape[3], l["w"].shape[4]) for l in params)   # unified width
    out_features = params[-1]["w"].shape[4]

    # Channels-last, halo of 1 + channel pad to C, then merge (W+2, C) into the
    # lane dimension.  The zero halo doubles as the conv "same" padding for
    # every layer, so the kernel never has to zero anything.
    x = jnp.transpose(x_ncdhw, (0, 2, 3, 4, 1))
    x = jnp.pad(x, ((0, 0), (1, 1), (1, 1), (1, 1), (0, C - cin)))
    x = x.reshape(N, D + 2, H + 2, (W + 2) * C)

    w_toep, shift_toep = prepare_toeplitz_params(params, C=C, W=W)
    y = fused_dncnn(x, w_toep, shift_toep)               # (N, D*H, (W+2)*C)
    y = y.reshape(N, D, H, W + 2, C)[:, :, :, 1:W + 1, :out_features]
    return jnp.transpose(y, (0, 4, 1, 2, 3))             # -> NCDHW


def _reference_forward(x_ncdhw, params):
    """Pure-JAX reference (lax conv) for a correctness check."""
    x = jnp.transpose(x_ncdhw, (0, 2, 3, 4, 1))
    for layer in params:
        y = jax.lax.conv_general_dilated(
            x, layer["w"], window_strides=(1, 1, 1),
            padding=((1, 1), (1, 1), (1, 1)),
            dimension_numbers=("NDHWC", "DHWIO", "NDHWC"))
        y = y * layer["scale"] + layer["shift"]
        if layer["relu"]:
            y = jnp.maximum(y, 0.0)
        x = y
    return jnp.transpose(x, (0, 4, 1, 2, 3))


if __name__ == "__main__":
    key = jax.random.PRNGKey(0)
    k_x, k_p = jax.random.split(key)

    # IntermediateDnCNN(input_features=9, middle_features=32, num_conv_layers=4)
    N, Cin, D, H, W = 2, 9, 4, 8, 8
    x = jax.random.normal(k_x, (N, Cin, D, H, W), jnp.float32)
    params = make_params(k_p, input_features=9, middle_features=32,
                         num_conv_layers=4)

    out = jax.block_until_ready(intermediate_dncnn_forward(x, params))
    ref = jax.block_until_ready(_reference_forward(x, params))

    assert out.shape == (N, 8, D, H, W), out.shape
    err = float(jnp.max(jnp.abs(out - ref)))
    assert err < 1e-3, err

    print("KERNEL_OK")
</pallas_src>

<mosaic_0001>
module attributes {stable_mosaic.version = 11 : i64} {
  func.func @_dncnn_layer_kernel(%arg0: i32, %arg1: i32, %arg2: memref<1x6x10x320xf32, #tpu.memory_space<vmem>>, %arg3: memref<1x9x320x320xf32, #tpu.memory_space<vmem>>, %arg4: memref<1x1x320xf32, #tpu.memory_space<vmem>>, %arg5: memref<1x32x320xf32, #tpu.memory_space<vmem>>, %arg6: memref<6x10x320xf32, #tpu.memory_space<vmem>>) attributes {dimension_semantics = [#tpu.dimension_semantics<parallel>, #tpu.dimension_semantics<arbitrary>], iteration_bounds = array<i64: 2, 4>, scalar_prefetch = 0 : i64, scratch_operands = 1 : i64, tpu.core_type = #tpu.core_type<tc>, window_params = [{transform_indices = @transform_0, window_bounds = array<i64: 1, 6, 10, 320>}, {transform_indices = @transform_1, window_bounds = array<i64: 1, 9, 320, 320>}, {transform_indices = @transform_2, window_bounds = array<i64: 1, 1, 320>}, {transform_indices = @transform_3, window_bounds = array<i64: 1, 32, 320>}]} {
    %c3_i32 = arith.constant 3 : i32
    %0 = arith.cmpi eq, %arg1, %c3_i32 : i32
    %c0_i32 = arith.constant 0 : i32
    %1 = arith.cmpi eq, %arg1, %c0_i32 : i32
    %2 = arith.extui %1 : i1 to i32
    %c0_i32_0 = arith.constant 0 : i32
    %3 = arith.cmpi ne, %2, %c0_i32_0 : i32
    scf.if %3 {
      %c0_72 = arith.constant 0 : index
      %c0_73 = arith.constant 0 : index
      %c0_74 = arith.constant 0 : index
      %c0_75 = arith.constant 0 : index
      %71 = vector.load %arg2[%c0_72, %c0_73, %c0_74, %c0_75] : memref<1x6x10x320xf32, #tpu.memory_space<vmem>>, vector<1x6x10x320xf32>
      %72 = vector.shape_cast %71 : vector<1x6x10x320xf32> to vector<6x10x320xf32>
      %c0_76 = arith.constant 0 : index
      %c0_77 = arith.constant 0 : index
      %c0_78 = arith.constant 0 : index
      %73 = vector.load %arg6[%c0_76, %c0_77, %c0_78] : memref<6x10x320xf32, #tpu.memory_space<vmem>>, vector<6x10x320xf32>
      tpu.vector_store %arg6[%c0_76, %c0_77, %c0_78], %72 {strides = array<i32>} : memref<6x10x320xf32, #tpu.memory_space<vmem>>, vector<6x10x320xf32>,
    } else {
    }
    %cst = arith.constant 0.000000e+00 : f32
    %4 = vector.broadcast %cst : f32 to vector<32x320xf32>
    %c0 = arith.constant 0 : index
    %c0_1 = arith.constant 0 : index
    %c0_2 = arith.constant 0 : index
    %5 = vector.load %arg6[%c0, %c0_1, %c0_2] : memref<6x10x320xf32, #tpu.memory_space<vmem>>, vector<4x8x320xf32>
    %6 = vector.shape_cast %5 : vector<4x8x320xf32> to vector<32x320xf32>
    %c0_3 = arith.constant 0 : index
    %c0_4 = arith.constant 0 : index
    %c0_5 = arith.constant 0 : index
    %c0_6 = arith.constant 0 : index
    %7 = vector.load %arg3[%c0_3, %c0_4, %c0_5, %c0_6] : memref<1x9x320x320xf32, #tpu.memory_space<vmem>>, vector<1x1x320x320xf32>
    %8 = vector.shape_cast %7 : vector<1x1x320x320xf32> to vector<320x320xf32>
    %cst_7 = arith.constant dense<0.000000e+00> : vector<32x320xf32>
    %9 = tpu.matmul %6, %8, %cst_7 {dimension_numbers = #tpu.dot_dimension_numbers<[1], [0], [0], [1], [0, 0, 1, 1], [], []>} : vector<32x320xf32>, vector<320x320xf32>, vector<32x320xf32> -> vector<32x320xf32>
    %10 = arith.addf %4, %9 : vector<32x320xf32>
    %c0_8 = arith.constant 0 : index
    %c1 = arith.constant 1 : index
    %c0_9 = arith.constant 0 : index
    %11 = vector.load %arg6[%c0_8, %c1, %c0_9] : memref<6x10x320xf32, #tpu.memory_space<vmem>>, vector<4x8x320xf32>
    %12 = vector.shape_cast %11 : vector<4x8x320xf32> to vector<32x320xf32>
    %c0_10 = arith.constant 0 : index
    %c1_11 = arith.constant 1 : index
    %c0_12 = arith.constant 0 : index
    %c0_13 = arith.constant 0 : index
    %13 = vector.load %arg3[%c0_10, %c1_11, %c0_12, %c0_13] : memref<1x9x320x320xf32, #tpu.memory_space<vmem>>, vector<1x1x320x320xf32>
    %14 = vector.shape_cast %13 : vector<1x1x320x320xf32> to vector<320x320xf32>
    %cst_14 = arith.constant dense<0.000000e+00> : vector<32x320xf32>
    %15 = tpu.matmul %12, %14, %cst_14 {dimension_numbers = #tpu.dot_dimension_numbers<[1], [0], [0], [1], [0, 0, 1, 1], [], []>} : vector<32x320xf32>, vector<320x320xf32>, vector<32x320xf32> -> vector<32x320xf32>
    %16 = arith.addf %10, %15 : vector<32x320xf32>
    %c0_15 = arith.constant 0 : index
    %c2 = arith.constant 2 : index
    %c0_16 = arith.constant 0 : index
    %17 = vector.load %arg6[%c0_15, %c2, %c0_16] : memref<6x10x320xf32, #tpu.memory_space<vmem>>, vector<4x8x320xf32>
    %18 = vector.shape_cast %17 : vector<4x8x320xf32> to vector<32x320xf32>
    %c0_17 = arith.constant 0 : index
    %c2_18 = arith.constant 2 : index
    %c0_19 = arith.constant 0 : index
    %c0_20 = arith.constant 0 : index
    %19 = vector.load %arg3[%c0_17, %c2_18, %c0_19, %c0_20] : memref<1x9x320x320xf32, #tpu.memory_space<vmem>>, vector<1x1x320x320xf32>
    %20 = vector.shape_cast %19 : vector<1x1x320x320xf32> to vector<320x320xf32>
    %cst_21 = arith.constant dense<0.000000e+00> : vector<32x320xf32>
    %21 = tpu.matmul %18, %20, %cst_21 {dimension_numbers = #tpu.dot_dimension_numbers<[1], [0], [0], [1], [0, 0, 1, 1], [], []>} : vector<32x320xf32>, vector<320x320xf32>, vector<32x320xf32> -> vector<32x320xf32>
    %22 = arith.addf %16, %21 : vector<32x320xf32>
    %c1_22 = arith.constant 1 : index
    %c0_23 = arith.constant 0 : index
    %c0_24 = arith.constant 0 : index
    %23 = vector.load %arg6[%c1_22, %c0_23, %c0_24] : memref<6x10x320xf32, #tpu.memory_space<vmem>>, vector<4x8x320xf32>
    %24 = vector.shape_cast %23 : vector<4x8x320xf32> to vector<32x320xf32>
    %c0_25 = arith.constant 0 : index
    %c3 = arith.constant 3 : index
    %c0_26 = arith.constant 0 : index
    %c0_27 = arith.constant 0 : index
    %25 = vector.load %arg3[%c0_25, %c3, %c0_26, %c0_27] : memref<1x9x320x320xf32, #tpu.memory_space<vmem>>, vector<1x1x320x320xf32>
    %26 = vector.shape_cast %25 : vector<1x1x320x320xf32> to vector<320x320xf32>
    %cst_28 = arith.constant dense<0.000000e+00> : vector<32x320xf32>
    %27 = tpu.matmul %24, %26, %cst_28 {dimension_numbers = #tpu.dot_dimension_numbers<[1], [0], [0], [1], [0, 0, 1, 1], [], []>} : vector<32x320xf32>, vector<320x320xf32>, vector<32x320xf32> -> vector<32x320xf32>
    %28 = arith.addf %22, %27 : vector<32x320xf32>
    %c1_29 = arith.constant 1 : index
    %c1_30 = arith.constant 1 : index
    %c0_31 = arith.constant 0 : index
    %29 = vector.load %arg6[%c1_29, %c1_30, %c0_31] : memref<6x10x320xf32, #tpu.memory_space<vmem>>, vector<4x8x320xf32>
    %30 = vector.shape_cast %29 : vector<4x8x320xf32> to vector<32x320xf32>
    %c0_32 = arith.constant 0 : index
    %c4 = arith.constant 4 : index
    %c0_33 = arith.constant 0 : index
    %c0_34 = arith.constant 0 : index
    %31 = vector.load %arg3[%c0_32, %c4, %c0_33, %c0_34] : memref<1x9x320x320xf32, #tpu.memory_space<vmem>>, vector<1x1x320x320xf32>
    %32 = vector.shape_cast %31 : vector<1x1x320x320xf32> to vector<320x320xf32>
    %cst_35 = arith.constant dense<0.000000e+00> : vector<32x320xf32>
    %33 = tpu.matmul %30, %32, %cst_35 {dimension_numbers = #tpu.dot_dimension_numbers<[1], [0], [0], [1], [0, 0, 1, 1], [], []>} : vector<32x320xf32>, vector<320x320xf32>, vector<32x320xf32> -> vector<32x320xf32>
    %34 = arith.addf %28, %33 : vector<32x320xf32>
    %c1_36 = arith.constant 1 : index
    %c2_37 = arith.constant 2 : index
    %c0_38 = arith.constant 0 : index
    %35 = vector.load %arg6[%c1_36, %c2_37, %c0_38] : memref<6x10x320xf32, #tpu.memory_space<vmem>>, vector<4x8x320xf32>
    %36 = vector.shape_cast %35 : vector<4x8x320xf32> to vector<32x320xf32>
    %c0_39 = arith.constant 0 : index
    %c5 = arith.constant 5 : index
    %c0_40 = arith.constant 0 : index
    %c0_41 = arith.constant 0 : index
    %37 = vector.load %arg3[%c0_39, %c5, %c0_40, %c0_41] : memref<1x9x320x320xf32, #tpu.memory_space<vmem>>, vector<1x1x320x320xf32>
    %38 = vector.shape_cast %37 : vector<1x1x320x320xf32> to vector<320x320xf32>
    %cst_42 = arith.constant dense<0.000000e+00> : vector<32x320xf32>
    %39 = tpu.matmul %36, %38, %cst_42 {dimension_numbers = #tpu.dot_dimension_numbers<[1], [0], [0], [1], [0, 0, 1, 1], [], []>} : vector<32x320xf32>, vector<320x320xf32>, vector<32x320xf32> -> vector<32x320xf32>
    %40 = arith.addf %34, %39 : vector<32x320xf32>
    %c2_43 = arith.constant 2 : index
    %c0_44 = arith.constant 0 : index
    %c0_45 = arith.constant 0 : index
    %41 = vector.load %arg6[%c2_43, %c0_44, %c0_45] : memref<6x10x320xf32, #tpu.memory_space<vmem>>, vector<4x8x320xf32>
    %42 = vector.shape_cast %41 : vector<4x8x320xf32> to vector<32x320xf32>
    %c0_46 = arith.constant 0 : index
    %c6 = arith.constant 6 : index
    %c0_47 = arith.constant 0 : index
    %c0_48 = arith.constant 0 : index
    %43 = vector.load %arg3[%c0_46, %c6, %c0_47, %c0_48] : memref<1x9x320x320xf32, #tpu.memory_space<vmem>>, vector<1x1x320x320xf32>
    %44 = vector.shape_cast %43 : vector<1x1x320x320xf32> to vector<320x320xf32>
    %cst_49 = arith.constant dense<0.000000e+00> : vector<32x320xf32>
    %45 = tpu.matmul %42, %44, %cst_49 {dimension_numbers = #tpu.dot_dimension_numbers<[1], [0], [0], [1], [0, 0, 1, 1], [], []>} : vector<32x320xf32>, vector<320x320xf32>, vector<32x320xf32> -> vector<32x320xf32>
    %46 = arith.addf %40, %45 : vector<32x320xf32>
    %c2_50 = arith.constant 2 : index
    %c1_51 = arith.constant 1 : index
    %c0_52 = arith.constant 0 : index
    %47 = vector.load %arg6[%c2_50, %c1_51, %c0_52] : memref<6x10x320xf32, #tpu.memory_space<vmem>>, vector<4x8x320xf32>
    %48 = vector.shape_cast %47 : vector<4x8x320xf32> to vector<32x320xf32>
    %c0_53 = arith.constant 0 : index
    %c7 = arith.constant 7 : index
    %c0_54 = arith.constant 0 : index
    %c0_55 = arith.constant 0 : index
    %49 = vector.load %arg3[%c0_53, %c7, %c0_54, %c0_55] : memref<1x9x320x320xf32, #tpu.memory_space<vmem>>, vector<1x1x320x320xf32>
    %50 = vector.shape_cast %49 : vector<1x1x320x320xf32> to vector<320x320xf32>
    %cst_56 = arith.constant dense<0.000000e+00> : vector<32x320xf32>
    %51 = tpu.matmul %48, %50, %cst_56 {dimension_numbers = #tpu.dot_dimension_numbers<[1], [0], [0], [1], [0, 0, 1, 1], [], []>} : vector<32x320xf32>, vector<320x320xf32>, vector<32x320xf32> -> vector<32x320xf32>
    %52 = arith.addf %46, %51 : vector<32x320xf32>
    %c2_57 = arith.constant 2 : index
    %c2_58 = arith.constant 2 : index
    %c0_59 = arith.constant 0 : index
    %53 = vector.load %arg6[%c2_57, %c2_58, %c0_59] : memref<6x10x320xf32, #tpu.memory_space<vmem>>, vector<4x8x320xf32>
    %54 = vector.shape_cast %53 : vector<4x8x320xf32> to vector<32x320xf32>
    %c0_60 = arith.constant 0 : index
    %c8 = arith.constant 8 : index
    %c0_61 = arith.constant 0 : index
    %c0_62 = arith.constant 0 : index
    %55 = vector.load %arg3[%c0_60, %c8, %c0_61, %c0_62] : memref<1x9x320x320xf32, #tpu.memory_space<vmem>>, vector<1x1x320x320xf32>
    %56 = vector.shape_cast %55 : vector<1x1x320x320xf32> to vector<320x320xf32>
    %cst_63 = arith.constant dense<0.000000e+00> : vector<32x320xf32>
    %57 = tpu.matmul %54, %56, %cst_63 {dimension_numbers = #tpu.dot_dimension_numbers<[1], [0], [0], [1], [0, 0, 1, 1], [], []>} : vector<32x320xf32>, vector<320x320xf32>, vector<32x320xf32> -> vector<32x320xf32>
    %58 = arith.addf %52, %57 : vector<32x320xf32>
    %c0_64 = arith.constant 0 : index
    %c0_65 = arith.constant 0 : index
    %c0_66 = arith.constant 0 : index
    %59 = vector.load %arg4[%c0_64, %c0_65, %c0_66] : memref<1x1x320xf32, #tpu.memory_space<vmem>>, vector<1x1x320xf32>
    %60 = vector.shape_cast %59 : vector<1x1x320xf32> to vector<1x320xf32>
    %61 = vector.broadcast %60 : vector<1x320xf32> to vector<32x320xf32>
    %62 = arith.addf %58, %61 : vector<32x320xf32>
    %cst_67 = arith.constant 0xFF800000 : f32
    %cst_68 = arith.constant 0.000000e+00 : f32
    %63 = arith.select %0, %cst_67, %cst_68 : f32
    %64 = vector.broadcast %63 : f32 to vector<32x320xf32>
    %65 = arith.maximumf %62, %64 : vector<32x320xf32>
    %c3_i32_69 = arith.constant 3 : i32
    %66 = arith.cmpi slt, %arg1, %c3_i32_69 : i32
    %67 = arith.extui %66 : i1 to i32
    %c0_i32_70 = arith.constant 0 : i32
    %68 = arith.cmpi ne, %67, %c0_i32_70 : i32
    scf.if %68 {
      %71 = vector.shape_cast %65 : vector<32x320xf32> to vector<4x8x320xf32>
      %c1_72 = arith.constant 1 : index
      %c1_73 = arith.constant 1 : index
      %c0_74 = arith.constant 0 : index
      %72 = vector.load %arg6[%c1_72, %c1_73, %c0_74] : memref<6x10x320xf32, #tpu.memory_space<vmem>>, vector<4x8x320xf32>
      tpu.vector_store %arg6[%c1_72, %c1_73, %c0_74], %71 {strides = array<i32>} : memref<6x10x320xf32, #tpu.memory_space<vmem>>, vector<4x8x320xf32>,
    } else {
    }
    %69 = arith.extui %0 : i1 to i32
    %c0_i32_71 = arith.constant 0 : i32
    %70 = arith.cmpi ne, %69, %c0_i32_71 : i32
    scf.if %70 {
      %71 = vector.shape_cast %65 : vector<32x320xf32> to vector<1x32x320xf32>
      %c0_72 = arith.constant 0 : index
      %c0_73 = arith.constant 0 : index
      %c0_74 = arith.constant 0 : index
      %72 = vector.load %arg5[%c0_72, %c0_73, %c0_74] : memref<1x32x320xf32, #tpu.memory_space<vmem>>, vector<1x32x320xf32>
      tpu.vector_store %arg5[%c0_72, %c0_73, %c0_74], %71 {strides = array<i32>} : memref<1x32x320xf32, #tpu.memory_space<vmem>>, vector<1x32x320xf32>,
    } else {
    }
    return
  }
  func.func @transform_0(%arg0: i32, %arg1: i32) -> (i32, i32, i32, i32) {
    %c0_i32 = arith.constant 0 : i32
    %c0_i32_0 = arith.constant 0 : i32
    %c0_i32_1 = arith.constant 0 : i32
    %c0_i32_2 = arith.constant 0 : i32
    return %arg0, %c0_i32, %c0_i32_0, %c0_i32_1 : i32, i32, i32, i32
  }
  func.func @transform_1(%arg0: i32, %arg1: i32) -> (i32, i32, i32, i32) {
    %c0_i32 = arith.constant 0 : i32
    %c0_i32_0 = arith.constant 0 : i32
    %c0_i32_1 = arith.constant 0 : i32
    %c0_i32_2 = arith.constant 0 : i32
    return %arg1, %c0_i32, %c0_i32_0, %c0_i32_1 : i32, i32, i32, i32
  }
  func.func @transform_2(%arg0: i32, %arg1: i32) -> (i32, i32, i32) {
    %c0_i32 = arith.constant 0 : i32
    %c0_i32_0 = arith.constant 0 : i32
    %c0_i32_1 = arith.constant 0 : i32
    return %arg1, %c0_i32, %c0_i32_0 : i32, i32, i32
  }
  func.func @transform_3(%arg0: i32, %arg1: i32) -> (i32, i32, i32) {
    %c0_i32 = arith.constant 0 : i32
    %c0_i32_0 = arith.constant 0 : i32
    %c0_i32_1 = arith.constant 0 : i32
    return %arg0, %c0_i32, %c0_i32_0 : i32, i32, i32
  }
}

</mosaic_0001>

<bundles_post_ra>
// kernel: tpu_custom_call.1
= control target key start
LH: loop header
LB: loop body
LE: loop exit
PB: predicated region body
PF: predicated region fallthrough
CT: control target
= control target key end

     0   :  { %s11094_s0 = inlined_call_operand.vmem [shape: f32[2,6,10,320], index: 0, kind: input, shape index: {}]   ;;  %s11095_s1 = inlined_call_operand.hbm [shape: f32[4,9,320,320], index: 1, kind: input, shape index: {}]   ;;  %s11096_s2 = inlined_call_operand.hbm [shape: f32[4,1,320], index: 2, kind: input, shape index: {}]   ;;  %s11097_s3 = inlined_call_operand.hbm [shape: f32[2,32,320], index: 3, kind: output, shape index: {}]  }
   0x1   :  { %11103 = sst [smem:[#allocation16_spill]] %s11095_s1 }
   0x2   :  { %8 = vsyncpa [#allocation4], 0 }
   0x3   :  { %10 = vsyncpa [#allocation4 + $0x1], 0 }
   0x4   :  { %11 = vsyncpa [#allocation7], 0 }
   0x5   :  { %13 = vsyncpa [#allocation7 + $0x1], 0 }
   0x6   :  { %14 = vsyncpa [#allocation5], 0 }
   0x7   :  { %16 = vsyncpa [#allocation5 + $0x1], 0  ;;  %s9033_s12 = smov 0   ;;  %s9035_s13 = smov 0  }
   0x8   :  { %s9037_s14 = smov 0   ;;  %s9039_s15 = smov 0  }
   0x9   :  { %s9041_s16 = smov 0   ;;  %s9043_s17 = smov 0  }
   0xa   :  { %s9045_s18 = smov 0   ;;  %s9047_s19 = smov 0  }
   0xb   :  { %s9049_s20 = smov 0   ;;  %s9051_s21 = smov 0  }
   0xc   :  { %s9053_s22 = smov 0  }
   0xd LB: > { %11104 = sst [smem:[#allocation12_spill]] %s8999_s21  ;;  %s5576_s23 = sadd.s32 4294967295, %s9003_s22   ;;  %s9003_s22 = sphi %s9053_s22, %s22_s22   ;;  %s8999_s21 = sphi %s9051_s21, %s11122_s21   ;;  %s8995_s20 = sphi %s9049_s20, %s11130_s20   ;;  %s8991_s19 = sphi %s9047_s19, %s11120_s19   ;;  %s8987_s18 = sphi %s9045_s18, %s11129_s18   ;;  %s8983_s17 = sphi %s9043_s17, %s11128_s17   ;;  %s8979_s16 = sphi %s9041_s16, %s11127_s16   ;;  %s8975_s15 = sphi %s9039_s15, %s11126_s15   ;;  %s8971_s14 = sphi %s9037_s14, %s11125_s14   ;;  %s8967_s13 = sphi %s9035_s13, %s11124_s13   ;;  %s8963_s12 = sphi %s9033_s12, %s11123_s12  }
   0xe   : > { %s5577_s24 = sadd.s32 4294967294, %s9003_s22   ;;  %s31_s25 = sadd.s32 1, %s8995_s20 }
   0xf   : > { %s34_s26 = sadd.s32 1, %s8999_s21  ;;  %p32_p0 = scmp.ge.s32.totalorder %s31_s25, 4 }
  0x10   : > { %s67_s27 = sadd.s32 1, %s8983_s17  ;;  %p74_p1 = scmp.ne.s32.totalorder %s8983_s17, %s8979_s16 }
  0x11   : > { %p75_p2 = scmp.eq.s32.totalorder %s9003_s22, 0  ;;  %s11132_s25 = smov (%p32_p0, %s31_s25), 0 }
  0x12   : > { %11105 = sst [smem:[#allocation13_spill]] %s11132_s25  ;;  %s11134_s26 = smov (!%p32_p0, %s34_s26), %s8999_s21 }
  0x13   : > { %s64_s28 = ssub.s32 %s8995_s20, %s11132_s25  ;;  %p9099_p3 = por %p75_p2, %p74_p1 }
  0x14   : > { %p36_p4 = scmp.ge.s32.totalorder %s11134_s26, 2  ;;  %p65_p5 = scmp.eq.s32.totalorder %s64_s28, 0 }
  0x15   : > { %p80_p6 = scmp.ne.s32.totalorder %s8979_s16, %s8975_s15  ;;  %p81_p7 = scmp.eq.s32.totalorder %s5576_s23, 0 }
  0x16   : > { %s11136_s26 = smov (%p36_p4, %s11134_s26), 0  ;;  %s119_s6 = sadd.s32 1, %s8971_s14 }
  0x17   : > { %11107 = sst [smem:[#allocation14_spill]] %s11136_s26  ;;  %p9109_p8 = por %p81_p7, %p80_p6 }
  0x18   : > { %s9107_s30 = scalar_select %p65_p5, %s8983_s17, %s67_s27  }
  0x19   : > { %s11109_s4 = scalar_select %p9109_p8, 1, 0 }
  0x1a   : > { %11108 = sst [smem:[#allocation15_spill]] %s9107_s30  ;;  %s116_s5 = ssub.s32 %s8999_s21, %s11136_s26 }
  0x1b   : > { %p117_p9 = scmp.eq.s32.totalorder %s116_s5, 0  ;;  %p129_p10 = scmp.ne.s32.totalorder %s8971_s14, %s8967_s13 }
  0x1c   : > { %p130_p11 = scmp.eq.s32.totalorder %s5576_s23, 7  ;;  %p135_p13 = scmp.ne.s32.totalorder %s8967_s13, %s8963_s12 }
  0x1d   : > { %s9119_s7 = scalar_select %p117_p9, %s8971_s14, %s119_s6  }
  0x1e   : > { %p9121_p12 = por %p130_p11, %p129_p10  ;;  %p136_p0 = scmp.eq.s32.totalorder %s5577_s24, 7 }
  0x1f   : > { %p8706_p1 = scmp.lt.s32.totalorder %s9003_s22, 8  ;;  %s9129_s9 = sand.u32 1, %s8983_s17  }
  0x20   : > { %s11110_s8 = scalar_select %p9121_p12, 1, 0 }
  0x21   : > { %p9131_p2 = por %p136_p0, %p135_p13  ;;  %s8680_s11 = smul.u32 8640, %s9129_s9 }
  0x22   : > { %p9138_p4 = pnand %p8706_p1, %p9099_p3  ;;  %s8681_s23 = smul.u32 138240, %s8995_s20 }
  0x23   : > { %s11111_s10 = scalar_select %p9131_p2, 1, 0 }
  0x24   : > { %s11113_s1 = sld [smem:[#allocation16_spill]]  ;;  %s168_s5 = scalar_lea.vmem [#allocation3], %s8680_s11 }
  0x25   : > { %s175_s6 = sshll.u32 %s168_s5, 4  ;;  %s165_s29 = scalar_lea.sflag [#allocation4], %s9129_s9  ;;  %s9148_s6 = int_to_ptr.vmem [resolvable:$true] %s175_s6 }
  0x26   : > { %p8819_p5 = pneg %p9138_p4 }
  0x2a   : > { %s9146_s28 = scalar_lea.hbm %s11113_s1, %s8681_s23  ;;  %s8822_s24 = scalar_lea.hbm %s11113_s1, 552960 }
  0x2b   : > { %s8817_s26 = scalar_lea.hbm %s9146_s28, 138240  ;;  %p8823_p9 = scmp.lt.u32.totalorder %s9146_s28, %s11113_s1 }
  0x2c   : > { %p8818_p3 = scmp.ne.s32.totalorder %s9146_s28, %s8817_s26  ;;  %p8824_p10 = scmp.lt.u32.totalorder %s8822_s24, %s8817_s26 }
  0x2d   : > { %p8826_p13 = scmp.lt.u32.totalorder %s8817_s26, %s9146_s28 }
  0x2e   : > { %p8820_p6 = pnand %p8819_p5, %p8818_p3  ;;  %p8825_p11 = por %p8824_p10, %p8823_p9 }
  0x30   : > { %p8821_p7 = pneg %p8820_p6  ;;  %p8827_p0 = por %p8826_p13, %p8825_p11 }
  0x32   : > { %p8828_p1 = pnand %p8827_p0, %p8821_p7 }
  0x34   : > { %8831 = shalt.err (!%p8828_p1)
}
  0x35   : > { %s8832_s11 = scalar_lea.vmem %s9148_s6, 138240  ;;  %s9005_s5 = smov [#allocation3]  }
  0x36   : > { %p8833_p3 = scmp.ne.s32.totalorder %s9148_s6, %s8832_s11  ;;  %s8837_s27 = sshll.u32 %s9005_s5, 4  ;;  %s8838_s27 = int_to_ptr.vmem [resolvable:$false] %s8837_s27 }
  0x37   : > { %s8839_s21 = scalar_lea.vmem %s8838_s27, 276480  ;;  %p8840_p12 = scmp.lt.s32.totalorder %s9148_s6, %s8838_s27 }
  0x38   : > { %p8835_p6 = pnand %p8833_p3, %p8819_p5  ;;  %p8841_p9 = scmp.lt.s32.totalorder %s8839_s21, %s8832_s11 }
  0x3a   : > { %p8836_p2 = pneg %p8835_p6  ;;  %p8842_p10 = por %p8841_p9, %p8840_p12 }
  0x3c   : > { %p8843_p11 = pnand %p8842_p10, %p8836_p2 }
  0x3e   : > { %8846 = shalt.err (!%p8843_p11)
}
  0x3f   : > { %s9006_s25 = smov 384   ;;  %s9007_s26 = smov 24  }
  0x40   : > { %8698 = dma.hbm_to_vmem [thread:$0]  (!%p9138_p4), %s9146_s28, 138240, %s9148_s6, %s165_s29, %s9006_s25, %s9006_s25, %s9007_s26  }
  0x41   : > { %p5582_p7 = scmp.ge.s32.totalorder %s9003_s22, 1  ;;  %p202_p13 = scmp.lt.s32.totalorder %s9003_s22, 9 }
  0x42   : > { %s8682_s23 = smul.u32 3, %s9129_s9  ;;  %s186_s28 = scalar_lea.sflag [#allocation7], %s9129_s9 }
  0x43   : > { %p9181_p12 = pnand %p5582_p7, %p202_p13  ;;  %s8683_s11 = smul.u32 48, %s8995_s20 }
  0x44   : > { %s189_s1 = scalar_lea.vmem [#allocation6], %s8682_s23  ;;  %s8852_s26 = scalar_lea.hbm %s11096_s2, 192 }
  0x45   : > { %s11114_s24 = scalar_select %p9181_p12, 1, 0 }
  0x46   : > { %s9189_s21 = scalar_lea.hbm %s11096_s2, %s8683_s11  ;;  %s197_s30 = sshll.u32 %s189_s1, 4  ;;  %s198_s30 = int_to_ptr.vmem [resolvable:$true] %s197_s30 }
  0x47   : > { %s8847_s6 = scalar_lea.hbm %s9189_s21, 48  ;;  %p8853_p3 = scmp.lt.u32.totalorder %s9189_s21, %s11096_s2 }
  0x48   : > { %p8848_p2 = scmp.ne.s32.totalorder %s9189_s21, %s8847_s6  ;;  %p8854_p6 = scmp.lt.u32.totalorder %s8852_s26, %s8847_s6 }
  0x49   : > { %p8856_p10 = scmp.lt.u32.totalorder %s8847_s6, %s9189_s21 }
  0x4a   : > { %p8850_p0 = pnand %p8848_p2, %p8819_p5  ;;  %p8855_p9 = por %p8854_p6, %p8853_p3 }
  0x4c   : > { %p8851_p1 = pneg %p8850_p0  ;;  %p8857_p11 = por %p8856_p10, %p8855_p9 }
  0x4e   : > { %p8858_p7 = pnand %p8857_p11, %p8851_p1 }
  0x50   : > { %8861 = shalt.err (!%p8858_p7)
}
  0x51   : > { %s8862_s1 = scalar_lea.vmem %s198_s30, 48  ;;  %s9008_s9 = smov [#allocation6]  }
  0x52   : > { %p8863_p13 = scmp.ne.s32.totalorder %s198_s30, %s8862_s1  ;;  %s8867_s23 = sshll.u32 %s9008_s9, 4  ;;  %s8868_s23 = int_to_ptr.vmem [resolvable:$false] %s8867_s23 }
  0x53   : > { %s8869_s27 = scalar_lea.vmem %s8868_s23, 96  ;;  %p8870_p8 = scmp.lt.s32.totalorder %s198_s30, %s8868_s23 }
  0x54   : > { %p8865_p2 = pnand %p8863_p13, %p8819_p5  ;;  %p8871_p12 = scmp.lt.s32.totalorder %s8869_s27, %s8862_s1 }
  0x56   : > { %p8866_p0 = pneg %p8865_p2  ;;  %p8872_p3 = por %p8871_p12, %p8870_p8 }
  0x58   : > { %p8873_p6 = pnand %p8872_p3, %p8866_p0 }
  0x5a   : > { %8876 = shalt.err (!%p8873_p6)
}
  0x5b   : > { %8701 = dma.hbm_to_vmem [thread:$0]  (!%p9138_p4), %s9189_s21, 48, %s198_s30, %s186_s28  }
  0x5c   : > { %p11115_p1 = scmp.ne.s32.totalorder %s11114_s24, 0 }
  0x5d   : > { %s208_s6 = sand.u32 (!%p11115_p1), 1, %s8979_s16   ;;  %p11116_p5 = scmp.ne.s32.totalorder (!%p11115_p1), %s11109_s4, 0 }
  0x5e   : > { %206 = sbr.rel (%p11115_p1) target bundleno = 982 (0x3d6), region = 32  ;;  %s209_s25 = scalar_lea.sflag (!%p11115_p1), [#allocation4], %s208_s6 }
  0x5f   : > { %s8684_s29 = smul.u32 (!%p11115_p1), 8640, %s208_s6 }
  0x61   : > { %s9214_s26 = scalar_lea.vmem (!%p11115_p1), [#allocation3], %s8684_s29 }
  0x65   : > { %8950 = dma.done.wait (%p11116_p5), %s209_s25, 138240  }
  0x66   : > { %8952 = vsyncadd (%p11116_p5), %s209_s25, 4294829056  ;;  %s8685_s11 = smul.u32 3, %s208_s6  ;;  %s218_s15 = scalar_lea.sflag [#allocation7], %s208_s6 }
  0x68   : > { %s9220_s5 = scalar_lea.vmem [#allocation6], %s8685_s11 }
  0x69   : > { %8954 = dma.done.wait (%p11116_p5), %s218_s15, 48  }
  0x6a   : > { %8956 = vsyncadd (%p11116_p5), %s218_s15, 4294967248  ;;  %s251_s30 = sand.u32 1, %s8967_s13   ;;  %p254_p8 = scmp.lt.s32.totalorder %s8991_s19, 1 }
  0x6b   : > { %s8686_s24 = smul.u32 96, %s251_s30  ;;  %p259_p4 = scmp.eq.s32.totalorder %s8987_s18, 3 }
  0x6c   : > { %s255_s21 = scalar_select %p254_p8, %s8991_s19, 1 }
  0x6d   : > { %s9237_s27 = scalar_lea.vmem [#allocation8], %s8686_s24  ;;  %p5584_p12 = scmp.ne.s32.totalorder %s8987_s18, 0 }
  0x6e   : > { %s8687_s28 = smul.u32 288, %s255_s21  ;;  %vm302_vm0 = vcmask (!%p5584_p12), 523264   ;;  %vm306_vm1 = vcmask (!%p5584_p12), 517120  }
  0x6f   : > { %263 = sbr.rel (%p5584_p12) target bundleno = 132 (0x84), region = 44 }
  0x70   : > { %s9235_s23 = scalar_lea.vmem %s11094_s0, %s8687_s28 }
  0x71   : > { %v264_v0 = vld [vmem:[%s9235_s23] sm:$0xff] (!%p5584_p12)  ;;  %v265_v1 = vld [vmem:[%s9235_s23 + $0x8] sm:$0xff] (!%p5584_p12)  ;;  %v266_v2 = vld [vmem:[%s9235_s23 + $0x10] sm:$0xff] (!%p5584_p12) }
  0x72   : > { %300 = vst [vmem:[#allocation2] sm:$0xff] (!%p5584_p12), %v264_v0  ;;  %301 = vst [vmem:[#allocation2 + $0x8] sm:$0xff] (!%p5584_p12), %v265_v1  ;;  %v267_v3 = vld [vmem:[%s9235_s23 + $0x18] sm:$0x3] (!%p5584_p12)  ;;  %v268_v4 = vld [vmem:[%s9235_s23 + $0x20] sm:$0x3] (!%p5584_p12) }
  0x73   : > { %303 = vst.msk [vmem:[#allocation2 + $0x10] sm:$0xff] (!%p5584_p12), %vm302_vm0, %v266_v2  ;;  %v269_v5 = vld [vmem:[%s9235_s23 + $0x28] sm:$0x3] (!%p5584_p12)  ;;  %304 = vst [vmem:[#allocation2 + $0x18] sm:$0x3] (!%p5584_p12), %v267_v3  ;;  %v270_v6 = vld [vmem:[%s9235_s23 + $0x30] sm:$0xff] (!%p5584_p12) }
  0x74   : > { %305 = vst [vmem:[#allocation2 + $0x20] sm:$0x3] (!%p5584_p12), %v268_v4  ;;  %307 = vst.msk [vmem:[#allocation2 + $0x28] sm:$0x3] (!%p5584_p12), %vm306_vm1, %v269_v5  ;;  %v271_v7 = vld [vmem:[%s9235_s23 + $0x38] sm:$0xff] (!%p5584_p12)  ;;  %v272_v8 = vld [vmem:[%s9235_s23 + $0x40] sm:$0xff] (!%p5584_p12) }
  0x75   : > { %308 = vst [vmem:[#allocation2 + $0x30] sm:$0xff] (!%p5584_p12), %v270_v6  ;;  %309 = vst [vmem:[#allocation2 + $0x38] sm:$0xff] (!%p5584_p12), %v271_v7  ;;  %v273_v9 = vld [vmem:[%s9235_s23 + $0x48] sm:$0x3] (!%p5584_p12)  ;;  %v274_v10 = vld [vmem:[%s9235_s23 + $0x50] sm:$0x3] (!%p5584_p12) }
  0x76   : > { %310 = vst.msk [vmem:[#allocation2 + $0x40] sm:$0xff] %vm302_vm0, %v272_v8  ;;  %v275_v11 = vld [vmem:[%s9235_s23 + $0x58] sm:$0x3]  ;;  %311 = vst [vmem:[#allocation2 + $0x48] sm:$0x3] %v273_v9  ;;  %v276_v12 = vld [vmem:[%s9235_s23 + $0x60] sm:$0xff] }
  0x77   : > { %312 = vst [vmem:[#allocation2 + $0x50] sm:$0x3] %v274_v10  ;;  %313 = vst.msk [vmem:[#allocation2 + $0x58] sm:$0x3] %vm306_vm1, %v275_v11  ;;  %v277_v13 = vld [vmem:[%s9235_s23 + $0x68] sm:$0xff]  ;;  %v278_v14 = vld [vmem:[%s9235_s23 + $0x70] sm:$0xff] }
  0x78   : > { %314 = vst [vmem:[#allocation2 + $0x60] sm:$0xff] %v276_v12  ;;  %315 = vst [vmem:[#allocation2 + $0x68] sm:$0xff] %v277_v13  ;;  %v279_v15 = vld [vmem:[%s9235_s23 + $0x78] sm:$0x3]  ;;  %v280_v16 = vld [vmem:[%s9235_s23 + $0x80] sm:$0x3] }
  0x79   : > { %316 = vst.msk [vmem:[#allocation2 + $0x70] sm:$0xff] %vm302_vm0, %v278_v14  ;;  %v281_v17 = vld [vmem:[%s9235_s23 + $0x88] sm:$0x3]  ;;  %317 = vst [vmem:[#allocation2 + $0x78] sm:$0x3] %v279_v15  ;;  %v282_v18 = vld [vmem:[%s9235_s23 + $0x90] sm:$0xff] }
  0x7a   : > { %318 = vst [vmem:[#allocation2 + $0x80] sm:$0x3] %v280_v16  ;;  %319 = vst.msk [vmem:[#allocation2 + $0x88] sm:$0x3] %vm306_vm1, %v281_v17  ;;  %v283_v19 = vld [vmem:[%s9235_s23 + $0x98] sm:$0xff]  ;;  %v284_v20 = vld [vmem:[%s9235_s23 + $0xa0] sm:$0xff] }
  0x7b   : > { %320 = vst [vmem:[#allocation2 + $0x90] sm:$0xff] %v282_v18  ;;  %321 = vst [vmem:[#allocation2 + $0x98] sm:$0xff] %v283_v19  ;;  %v285_v21 = vld [vmem:[%s9235_s23 + $0xa8] sm:$0x3]  ;;  %v286_v22 = vld [vmem:[%s9235_s23 + $0xb0] sm:$0x3] }
  0x7c   : > { %322 = vst.msk [vmem:[#allocation2 + $0xa0] sm:$0xff] %vm302_vm0, %v284_v20  ;;  %v287_v23 = vld [vmem:[%s9235_s23 + $0xb8] sm:$0x3]  ;;  %323 = vst [vmem:[#allocation2 + $0xa8] sm:$0x3] %v285_v21  ;;  %v288_v24 = vld [vmem:[%s9235_s23 + $0xc0] sm:$0xff] }
  0x7d   : > { %324 = vst [vmem:[#allocation2 + $0xb0] sm:$0x3] %v286_v22  ;;  %325 = vst.msk [vmem:[#allocation2 + $0xb8] sm:$0x3] %vm306_vm1, %v287_v23  ;;  %v289_v25 = vld [vmem:[%s9235_s23 + $0xc8] sm:$0xff]  ;;  %v290_v26 = vld [vmem:[%s9235_s23 + $0xd0] sm:$0xff] }
  0x7e   : > { %326 = vst [vmem:[#allocation2 + $0xc0] sm:$0xff] %v288_v24  ;;  %327 = vst [vmem:[#allocation2 + $0xc8] sm:$0xff] %v289_v25  ;;  %v291_v27 = vld [vmem:[%s9235_s23 + $0xd8] sm:$0x3]  ;;  %v292_v28 = vld [vmem:[%s9235_s23 + $0xe0] sm:$0x3] }
  0x7f   : > { %328 = vst.msk [vmem:[#allocation2 + $0xd0] sm:$0xff] %vm302_vm0, %v290_v26  ;;  %v293_v29 = vld [vmem:[%s9235_s23 + $0xe8] sm:$0x3]  ;;  %329 = vst [vmem:[#allocation2 + $0xd8] sm:$0x3] %v291_v27  ;;  %v294_v30 = vld [vmem:[%s9235_s23 + $0xf0] sm:$0xff] }
  0x80   : > { %330 = vst [vmem:[#allocation2 + $0xe0] sm:$0x3] %v292_v28  ;;  %331 = vst.msk [vmem:[#allocation2 + $0xe8] sm:$0x3] %vm306_vm1, %v293_v29  ;;  %v295_v31 = vld [vmem:[%s9235_s23 + $0xf8] sm:$0xff]  ;;  %v296_v32 = vld [vmem:[%s9235_s23 + $0x100] sm:$0xff] }
  0x81   : > { %332 = vst [vmem:[#allocation2 + $0xf0] sm:$0xff] %v294_v30  ;;  %333 = vst [vmem:[#allocation2 + $0xf8] sm:$0xff] %v295_v31  ;;  %v297_v33 = vld [vmem:[%s9235_s23 + $0x108] sm:$0x3]  ;;  %v298_v34 = vld [vmem:[%s9235_s23 + $0x110] sm:$0x3] }
  0x82   : > { %334 = vst.msk [vmem:[#allocation2 + $0x100] sm:$0xff] %vm302_vm0, %v296_v32  ;;  %v299_v35 = vld [vmem:[%s9235_s23 + $0x118] sm:$0x3]  ;;  %335 = vst [vmem:[#allocation2 + $0x108] sm:$0x3] %v297_v33 }
  0x83   : > { %336 = vst [vmem:[#allocation2 + $0x110] sm:$0x3] %v298_v34  ;;  %337 = vst.msk [vmem:[#allocation2 + $0x118] sm:$0x3] %vm306_vm1, %v299_v35 }
  0x84 PF: > { %v5586_v36 = vld [vmem:[%s9214_s26 + $0x3c8] sm:$0xff]  ;;  %v5589_v37 = vld [vmem:[%s9214_s26 + $0x3e0] sm:$0xff]  ;;  %v5588_v42 = vld [vmem:[%s9214_s26 + $0x3d8] sm:$0xff]  ;;  %v9009_v43 = vmov 0.0   ;;  %vm684_vm2 = vcmask 523264   ;;  %vm518_vm3 = vcmask 1046528  }
  0x85   : > { %v447_v38 = vld [vmem:[%s9214_s26 + $0x308] sm:$0xff]  ;;  %v7324_v39 = vpack.c.bf16 %v5589_v37, %v5586_v36  ;;  %v450_v40 = vld [vmem:[%s9214_s26 + $0x320] sm:$0xff]  ;;  %1206 = vmatprep.mubr.f32.mxu0 %v9009_v43  ;;  %v449_v47 = vld [vmem:[%s9214_s26 + $0x318] sm:$0xff]  ;;  %vm1449_vm4 = vcmask 1045504   ;;  %s5348_s4 = scalar_select %p259_p4, -inf, 0.0 }
  0x86   : > { %v5585_v41 = vld [vmem:[%s9214_s26 + $0x3c0] sm:$0xff]  ;;  %v7516_v44 = vpack.c.bf16 %v450_v40, %v447_v38  ;;  %v5592_v48 = vld [vmem:[%s9214_s26 + $0x3f8] sm:$0xff]  ;;  %v5595_v50 = vld [vmem:[%s9214_s26 + $0x410] sm:$0xff]  ;;  %p6617_p9 = scmp.ge.s32.totalorder %s8987_s18, 3 }
  0x87   : > { %v7326_v45 = vpack.c.bf16 %v5588_v42, %v5585_v41  ;;  %v446_v46 = vld [vmem:[%s9214_s26 + $0x300] sm:$0xff]  ;;  %7325 = vmatprep.subr.bf16.mxu1 %v7324_v39  ;;  %v453_v51 = vld [vmem:[%s9214_s26 + $0x338] sm:$0xff]  ;;  %v456_v52 = vld [vmem:[%s9214_s26 + $0x350] sm:$0xff]  ;;  %v7328_v53 = vpack.c.bf16 %v5595_v50, %v5592_v48  ;;  %vm5404_vm5 = vcmask (!%p6617_p9), 523265   ;;  %vm5408_vm6 = vcmask (!%p6617_p9), 516096  }
  0x88   : > { %v7518_v49 = vpack.c.bf16 %v449_v47, %v446_v46  ;;  %7517 = vmatprep.subr.bf16.mxu0 %v7516_v44  ;;  %v7520_v54 = vpack.c.bf16 %v456_v52, %v453_v51  ;;  %v5591_v55 = vld [vmem:[%s9214_s26 + $0x3f0] sm:$0xff]  ;;  %v5594_v56 = vld [vmem:[%s9214_s26 + $0x408] sm:$0xff]  ;;  %v5601_v61 = vld [vmem:[%s9214_s26 + $0x440] sm:$0xff] }
  0x89   : > { %7327 = vmatpush1.bf16.msra.mxu1 %v7326_v45  ;;  %v452_v57 = vld [vmem:[%s9214_s26 + $0x330] sm:$0xff]  ;;  %v7330_v58 = vpack.c.bf16 %v5594_v56, %v5591_v55  ;;  %v455_v59 = vld [vmem:[%s9214_s26 + $0x348] sm:$0xff]  ;;  %v462_v1 = vld [vmem:[%s9214_s26 + $0x380] sm:$0xff] }
  0x8a   : > { %7519 = vmatpush1.bf16.msra.mxu0 %v7518_v49  ;;  %v5598_v60 = vld [vmem:[%s9214_s26 + $0x428] sm:$0xff]  ;;  %7329 = vmatprep.subr.bf16.mxu1 %v7328_v53  ;;  %v7522_v62 = vpack.c.bf16 %v455_v59, %v452_v57  ;;  %v5597_v2 = vld [vmem:[%s9214_s26 + $0x420] sm:$0xff]  ;;  %v5600_v4 = vld [vmem:[%s9214_s26 + $0x438] sm:$0xff] }
  0x8b   : > { %7521 = vmatprep.subr.bf16.mxu0 %v7520_v54  ;;  %v7332_v63 = vpack.c.bf16 %v5601_v61, %v5598_v60  ;;  %v459_v0 = vld [vmem:[%s9214_s26 + $0x368] sm:$0xff]  ;;  %v458_v5 = vld [vmem:[%s9214_s26 + $0x360] sm:$0xff]  ;;  %v461_v6 = vld [vmem:[%s9214_s26 + $0x378] sm:$0xff]  ;;  %v7334_v7 = vpack.c.bf16 %v5600_v4, %v5597_v2 }
  0x8c   : > { %v7524_v3 = vpack.c.bf16 %v462_v1, %v459_v0  ;;  %v5604_v8 = vld [vmem:[%s9214_s26 + $0x458] sm:$0xff]  ;;  %v5607_v9 = vld [vmem:[%s9214_s26 + $0x470] sm:$0xff]  ;;  %v7526_v11 = vpack.c.bf16 %v461_v6, %v458_v5  ;;  %v5606_v15 = vld [vmem:[%s9214_s26 + $0x468] sm:$0xff] }
  0x8d   : > { %7331 = vmatpush1.bf16.msra.mxu1 %v7330_v58  ;;  %v465_v10 = vld [vmem:[%s9214_s26 + $0x398] sm:$0xff]  ;;  %v7336_v12 = vpack.c.bf16 %v5607_v9, %v5604_v8  ;;  %v468_v13 = vld [vmem:[%s9214_s26 + $0x3b0] sm:$0xff]  ;;  %v467_v18 = vld [vmem:[%s9214_s26 + $0x3a8] sm:$0xff] }
  0x8e   : > { %7523 = vmatpush1.bf16.msra.mxu0 %v7522_v62  ;;  %7333 = vmatprep.subr.bf16.mxu1 %v7332_v63  ;;  %v5603_v14 = vld [vmem:[%s9214_s26 + $0x450] sm:$0xff]  ;;  %v7528_v16 = vpack.c.bf16 %v468_v13, %v465_v10  ;;  %v5610_v19 = vld [vmem:[%s9214_s26 + $0x488] sm:$0xff]  ;;  %v5613_v20 = vld [vmem:[%s9214_s26 + $0x4a0] sm:$0xff] }
  0x8f   : > { %7525 = vmatprep.subr.bf16.mxu0 %v7524_v3  ;;  %v464_v17 = vld [vmem:[%s9214_s26 + $0x390] sm:$0xff]  ;;  %v5722_v21 = vld [vmem:[%s9214_s26 + $0x788] sm:$0xff]  ;;  %v5725_v22 = vld [vmem:[%s9214_s26 + $0x7a0] sm:$0xff]  ;;  %v7338_v23 = vpack.c.bf16 %v5606_v15, %v5603_v14  ;;  %v7340_v25 = vpack.c.bf16 %v5613_v20, %v5610_v19 }
  0x90   : > { %v7530_v24 = vpack.c.bf16 %v467_v18, %v464_v17  ;;  %v5609_v26 = vld [vmem:[%s9214_s26 + $0x480] sm:$0xff]  ;;  %v5612_v27 = vld [vmem:[%s9214_s26 + $0x498] sm:$0xff]  ;;  %v7580_v29 = vpack.c.bf16 %v5725_v22, %v5722_v21  ;;  %v5619_v32 = vld [vmem:[%s9214_s26 + $0x4d0] sm:$0xff] }
  0x91   : > { %7335 = vmatpush1.bf16.msra.mxu1 %v7334_v7  ;;  %v5721_v28 = vld [vmem:[%s9214_s26 + $0x780] sm:$0xff]  ;;  %v5724_v30 = vld [vmem:[%s9214_s26 + $0x798] sm:$0xff]  ;;  %v5731_v34 = vld [vmem:[%s9214_s26 + $0x7d0] sm:$0xff]  ;;  %v7342_v35 = vpack.c.bf16 %v5612_v27, %v5609_v26 }
  0x92   : > { %7527 = vmatpush1.bf16.msra.mxu0 %v7526_v11  ;;  %7337 = vmatprep.subr.bf16.mxu1 %v7336_v12  ;;  %v5616_v31 = vld [vmem:[%s9214_s26 + $0x4b8] sm:$0xff]  ;;  %v340_v36 = vld [vmem:[#allocation2 + $0x10] sm:$0xff]  ;;  %v7582_v37 = vpack.c.bf16 %v5724_v30, %v5721_v28  ;;  %v5618_v40 = vld [vmem:[%s9214_s26 + $0x4c8] sm:$0xff] }
  0x93   : > { %7529 = vmatprep.subr.bf16.mxu0 %v7528_v16  ;;  %v5728_v33 = vld [vmem:[%s9214_s26 + $0x7b8] sm:$0xff]  ;;  %v7344_v38 = vpack.c.bf16 %v5619_v32, %v5616_v31  ;;  %v5615_v39 = vld [vmem:[%s9214_s26 + $0x4b0] sm:$0xff]  ;;  %v5730_v44 = vld [vmem:[%s9214_s26 + $0x7c8] sm:$0xff] }
  0x94   : > { %v5727_v41 = vld [vmem:[%s9214_s26 + $0x7b0] sm:$0xff]  ;;  %v7584_v42 = vpack.c.bf16 %v5731_v34, %v5728_v33  ;;  %v5622_v45 = vld [vmem:[%s9214_s26 + $0x4e8] sm:$0xff]  ;;  %v5625_v46 = vld [vmem:[%s9214_s26 + $0x500] sm:$0xff]  ;;  %v7346_v49 = vpack.c.bf16 %v5618_v40, %v5615_v39 }
  0x95   : > { %7339 = vmatpush1.bf16.msra.mxu1 %v7338_v23  ;;  %v5734_v47 = vld [vmem:[%s9214_s26 + $0x7e8] sm:$0xff]  ;;  %v5737_v48 = vld [vmem:[%s9214_s26 + $0x800] sm:$0xff]  ;;  %v7586_v50 = vpack.c.bf16 %v5730_v44, %v5727_v41  ;;  %v7348_v51 = vpack.c.bf16 %v5625_v46, %v5622_v45  ;;  %v5624_v53 = vld [vmem:[%s9214_s26 + $0x4f8] sm:$0xff] }
  0x96   : > { %7531 = vmatpush1.bf16.msra.mxu0 %v7530_v24  ;;  %7341 = vmatprep.subr.bf16.mxu1 %v7340_v25  ;;  %v5621_v52 = vld [vmem:[%s9214_s26 + $0x4e0] sm:$0xff]  ;;  %v7588_v55 = vpack.c.bf16 %v5737_v48, %v5734_v47  ;;  %v5736_v56 = vld [vmem:[%s9214_s26 + $0x7f8] sm:$0xff]  ;;  %v5631_v58 = vld [vmem:[%s9214_s26 + $0x530] sm:$0xff] }
  0x97   : > { %7581 = vmatprep.subr.bf16.mxu0 %v7580_v29  ;;  %v5733_v54 = vld [vmem:[%s9214_s26 + $0x7e0] sm:$0xff]  ;;  %v5628_v57 = vld [vmem:[%s9214_s26 + $0x518] sm:$0xff]  ;;  %v5743_v60 = vld [vmem:[%s9214_s26 + $0x830] sm:$0xff]  ;;  %v7350_v61 = vpack.c.bf16 %v5624_v53, %v5621_v52 }
  0x98   : > { %v5740_v59 = vld [vmem:[%s9214_s26 + $0x818] sm:$0xff]  ;;  %v7590_v62 = vpack.c.bf16 %v5736_v56, %v5733_v54  ;;  %v7352_v63 = vpack.c.bf16 %v5631_v58, %v5628_v57  ;;  %v5627_v0 = vld [vmem:[%s9214_s26 + $0x510] sm:$0xff]  ;;  %v5630_v1 = vld [vmem:[%s9214_s26 + $0x528] sm:$0xff] }
  0x99   : > { %7343 = vmatpush1.bf16.msra.mxu1 %v7342_v35  ;;  %5713 = vmatmul.mubr.msk.f32.vlgmr.msra.gmra.mrb[0].mxu0 %vm684_vm2, %v340_v36  ;;  %v5739_v2 = vld [vmem:[%s9214_s26 + $0x810] sm:$0xff]  ;;  %v7592_v3 = vpack.c.bf16 %v5743_v60, %v5740_v59  ;;  %v5742_v4 = vld [vmem:[%s9214_s26 + $0x828] sm:$0xff]  ;;  %v5637_v6 = vld [vmem:[%s9214_s26 + $0x560] sm:$0xff]  ;;  %v7354_v9 = vpack.c.bf16 %v5630_v1, %v5627_v0 }
  0x9a   : > { %7583 = vmatpush1.bf16.msra.mxu0 %v7582_v37  ;;  %7345 = vmatprep.subr.bf16.mxu1 %v7344_v38  ;;  %v5634_v5 = vld [vmem:[%s9214_s26 + $0x548] sm:$0xff]  ;;  %v5749_v8 = vld [vmem:[%s9214_s26 + $0x860] sm:$0xff]  ;;  %v7594_v10 = vpack.c.bf16 %v5742_v4, %v5739_v2  ;;  %v5636_v13 = vld [vmem:[%s9214_s26 + $0x558] sm:$0xff] }
  0x9b   : > { %7585 = vmatprep.subr.bf16.mxu0 %v7584_v42  ;;  %1212 = vmatprep.mubr.f32.mxu0 %v9009_v43  ;;  %v5746_v7 = vld [vmem:[%s9214_s26 + $0x848] sm:$0xff]  ;;  %v7356_v11 = vpack.c.bf16 %v5637_v6, %v5634_v5  ;;  %v5633_v12 = vld [vmem:[%s9214_s26 + $0x540] sm:$0xff]  ;;  %v5748_v16 = vld [vmem:[%s9214_s26 + $0x858] sm:$0xff] }
  0x9c   : > { %v5745_v14 = vld [vmem:[%s9214_s26 + $0x840] sm:$0xff]  ;;  %v7596_v15 = vpack.c.bf16 %v5749_v8, %v5746_v7  ;;  %v5640_v17 = vld [vmem:[%s9214_s26 + $0x578] sm:$0xff]  ;;  %v5643_v18 = vld [vmem:[%s9214_s26 + $0x590] sm:$0xff]  ;;  %v7358_v21 = vpack.c.bf16 %v5636_v13, %v5633_v12 }
  0x9d   : > { %7347 = vmatpush1.bf16.msra.mxu1 %v7346_v49  ;;  %v5752_v19 = vld [vmem:[%s9214_s26 + $0x878] sm:$0xff]  ;;  %v5755_v20 = vld [vmem:[%s9214_s26 + $0x890] sm:$0xff]  ;;  %v7598_v22 = vpack.c.bf16 %v5748_v16, %v5745_v14  ;;  %v7360_v23 = vpack.c.bf16 %v5643_v18, %v5640_v17  ;;  %v5642_v25 = vld [vmem:[%s9214_s26 + $0x588] sm:$0xff] }
  0x9e   : > { %7587 = vmatpush1.bf16.msra.mxu0 %v7586_v50  ;;  %7349 = vmatprep.subr.bf16.mxu1 %v7348_v51  ;;  %v5639_v24 = vld [vmem:[%s9214_s26 + $0x570] sm:$0xff]  ;;  %v7600_v27 = vpack.c.bf16 %v5755_v20, %v5752_v19  ;;  %v5754_v28 = vld [vmem:[%s9214_s26 + $0x888] sm:$0xff]  ;;  %v5649_v30 = vld [vmem:[%s9214_s26 + $0x5c0] sm:$0xff] }
  0x9f   : > { %7589 = vmatprep.subr.bf16.mxu0 %v7588_v55  ;;  %v5751_v26 = vld [vmem:[%s9214_s26 + $0x870] sm:$0xff]  ;;  %v5646_v29 = vld [vmem:[%s9214_s26 + $0x5a8] sm:$0xff]  ;;  %v5761_v32 = vld [vmem:[%s9214_s26 + $0x8c0] sm:$0xff]  ;;  %v7362_v33 = vpack.c.bf16 %v5642_v25, %v5639_v24 }
  0xa0   : > { %v5758_v31 = vld [vmem:[%s9214_s26 + $0x8a8] sm:$0xff]  ;;  %v7602_v34 = vpack.c.bf16 %v5754_v28, %v5751_v26  ;;  %v7364_v35 = vpack.c.bf16 %v5649_v30, %v5646_v29  ;;  %v5645_v36 = vld [vmem:[%s9214_s26 + $0x5a0] sm:$0xff]  ;;  %v5648_v37 = vld [vmem:[%s9214_s26 + $0x5b8] sm:$0xff] }
  0xa1   : > { %7351 = vmatpush1.bf16.msra.mxu1 %v7350_v61  ;;  %v5757_v38 = vld [vmem:[%s9214_s26 + $0x8a0] sm:$0xff]  ;;  %v7604_v39 = vpack.c.bf16 %v5761_v32, %v5758_v31  ;;  %v5760_v40 = vld [vmem:[%s9214_s26 + $0x8b8] sm:$0xff]  ;;  %v5655_v42 = vld [vmem:[%s9214_s26 + $0x5f0] sm:$0xff]  ;;  %v7366_v46 = vpack.c.bf16 %v5648_v37, %v5645_v36 }
  0xa2   : > { %7591 = vmatpush1.bf16.msra.mxu0 %v7590_v62  ;;  %7353 = vmatprep.subr.bf16.mxu1 %v7352_v63  ;;  %v5652_v41 = vld [vmem:[%s9214_s26 + $0x5d8] sm:$0xff]  ;;  %v5767_v45 = vld [vmem:[%s9214_s26 + $0x8f0] sm:$0xff]  ;;  %v7606_v48 = vpack.c.bf16 %v5760_v40, %v5757_v38  ;;  %v5654_v50 = vld [vmem:[%s9214_s26 + $0x5e8] sm:$0xff] }
  0xa3   : > { %7593 = vmatprep.subr.bf16.mxu0 %v7592_v3  ;;  %v5764_v44 = vld [vmem:[%s9214_s26 + $0x8d8] sm:$0xff]  ;;  %v5651_v47 = vld [vmem:[%s9214_s26 + $0x5d0] sm:$0xff]  ;;  %v7368_v49 = vpack.c.bf16 %v5655_v42, %v5652_v41  ;;  %v5766_v52 = vld [vmem:[%s9214_s26 + $0x8e8] sm:$0xff] }
  0xa4   : > { %v5763_v51 = vld [vmem:[%s9214_s26 + $0x8d0] sm:$0xff]  ;;  %v7608_v53 = vpack.c.bf16 %v5767_v45, %v5764_v44  ;;  %v5658_v54 = vld [vmem:[%s9214_s26 + $0x608] sm:$0xff]  ;;  %v5661_v55 = vld [vmem:[%s9214_s26 + $0x620] sm:$0xff]  ;;  %v7370_v60 = vpack.c.bf16 %v5654_v50, %v5651_v47 }
  0xa5   : > { %7355 = vmatpush1.bf16.msra.mxu1 %v7354_v9  ;;  %v5770_v56 = vld [vmem:[%s9214_s26 + $0x908] sm:$0xff]  ;;  %v5773_v57 = vld [vmem:[%s9214_s26 + $0x920] sm:$0xff]  ;;  %v7610_v63 = vpack.c.bf16 %v5766_v52, %v5763_v51  ;;  %v7372_v0 = vpack.c.bf16 %v5661_v55, %v5658_v54  ;;  %v5660_v2 = vld [vmem:[%s9214_s26 + $0x618] sm:$0xff] }
  0xa6   : > { %7595 = vmatpush1.bf16.msra.mxu0 %v7594_v10  ;;  %7357 = vmatprep.subr.bf16.mxu1 %v7356_v11  ;;  %v471_v58 = vld [vmem:[#allocation2 + $0x8] sm:$0xfe]  ;;  %v474_v59 = vld [vmem:[#allocation2 + $0x20] sm:$0x1]  ;;  %v7612_v4 = vpack.c.bf16 %v5773_v57, %v5770_v56  ;;  %v5772_v5 = vld [vmem:[%s9214_s26 + $0x918] sm:$0xff] }
  0xa7   : > { %7597 = vmatprep.subr.bf16.mxu0 %v7596_v15  ;;  %v522_v61 = vrot.slane %v471_v58, 1  ;;  %v523_v62 = vrot.slane %v474_v59, 1  ;;  %v5657_v1 = vld [vmem:[%s9214_s26 + $0x600] sm:$0xff]  ;;  %v5664_v6 = vld [vmem:[%s9214_s26 + $0x638] sm:$0xff]  ;;  %v5667_v7 = vld [vmem:[%s9214_s26 + $0x650] sm:$0xff] }
  0xa8   : > { %v5769_v3 = vld [vmem:[%s9214_s26 + $0x900] sm:$0xff]  ;;  %v5776_v9 = vld [vmem:[%s9214_s26 + $0x938] sm:$0xff]  ;;  %v5779_v10 = vld [vmem:[%s9214_s26 + $0x950] sm:$0xff]  ;;  %v7374_v11 = vpack.c.bf16 %v5660_v2, %v5657_v1  ;;  %v7376_v14 = vpack.c.bf16 %v5667_v7, %v5664_v6 }
  0xa9   : > { %7359 = vmatpush1.bf16.msra.mxu1 %v7358_v21  ;;  %v9398_v8 = vsel %vm518_vm3, %v522_v61, %v523_v62  ;;  %v5663_v12 = vld [vmem:[%s9214_s26 + $0x630] sm:$0xff]  ;;  %v7614_v13 = vpack.c.bf16 %v5772_v5, %v5769_v3  ;;  %v5666_v15 = vld [vmem:[%s9214_s26 + $0x648] sm:$0xff]  ;;  %v7616_v18 = vpack.c.bf16 %v5779_v10, %v5776_v9  ;;  %v5673_v20 = vld [vmem:[%s9214_s26 + $0x680] sm:$0xff] }
  0xaa   : > { %7599 = vmatpush1.bf16.msra.mxu0 %v7598_v22  ;;  %7361 = vmatprep.subr.bf16.mxu1 %v7360_v23  ;;  %v5775_v16 = vld [vmem:[%s9214_s26 + $0x930] sm:$0xff]  ;;  %v5778_v17 = vld [vmem:[%s9214_s26 + $0x948] sm:$0xff]  ;;  %v343_v21 = vld [vmem:[#allocation2 + $0x40] sm:$0xff]  ;;  %v7378_v24 = vpack.c.bf16 %v5666_v15, %v5663_v12 }
  0xab   : > { %7601 = vmatprep.subr.bf16.mxu0 %v7600_v27  ;;  %757 = vmatprep.mubr.f32.mxu1 %v9398_v8  ;;  %v5670_v19 = vld [vmem:[%s9214_s26 + $0x668] sm:$0xff]  ;;  %v5785_v23 = vld [vmem:[%s9214_s26 + $0x980] sm:$0xff]  ;;  %v5672_v26 = vld [vmem:[%s9214_s26 + $0x678] sm:$0xff]  ;;  %v7618_v27 = vpack.c.bf16 %v5778_v17, %v5775_v16 }
  0xac   : > { %v5782_v22 = vld [vmem:[%s9214_s26 + $0x968] sm:$0xff]  ;;  %5714 = vmatmul.mubr.msk.f32.gmra.mrb[2].mxu0 %vm684_vm2, %v343_v21  ;;  %v5669_v25 = vld [vmem:[%s9214_s26 + $0x660] sm:$0xff]  ;;  %v7380_v28 = vpack.c.bf16 %v5673_v20, %v5670_v19  ;;  %v5784_v30 = vld [vmem:[%s9214_s26 + $0x978] sm:$0xff] }
  0xad   : > { %7363 = vmatpush1.bf16.msra.mxu1 %v7362_v33  ;;  %1218 = vmatprep.mubr.f32.mxu0 %v9009_v43  ;;  %v5781_v29 = vld [vmem:[%s9214_s26 + $0x960] sm:$0xff]  ;;  %v5676_v31 = vld [vmem:[%s9214_s26 + $0x698] sm:$0xff]  ;;  %v7620_v32 = vpack.c.bf16 %v5785_v23, %v5782_v22  ;;  %v5679_v33 = vld [vmem:[%s9214_s26 + $0x6b0] sm:$0xff] }
  0xae   : > { %7603 = vmatpush1.bf16.msra.mxu0 %v7602_v34  ;;  %7365 = vmatprep.subr.bf16.mxu1 %v7364_v35  ;;  %v5788_v34 = vld [vmem:[%s9214_s26 + $0x998] sm:$0xff]  ;;  %v346_v35 = vld [vmem:[#allocation2 + $0x70] sm:$0xff]  ;;  %v5678_v38 = vld [vmem:[%s9214_s26 + $0x6a8] sm:$0xff]  ;;  %v7622_v45 = vpack.c.bf16 %v5784_v30, %v5781_v29 }
  0xaf   : > { %7605 = vmatprep.subr.bf16.mxu0 %v7604_v39  ;;  %v5791_v36 = vld [vmem:[%s9214_s26 + $0x9b0] sm:$0xff]  ;;  %v7382_v39 = vpack.c.bf16 %v5672_v26, %v5669_v25  ;;  %v470_v41 = vld [vmem:[#allocation2] sm:$0xfe]  ;;  %v473_v42 = vld [vmem:[#allocation2 + $0x18] sm:$0x1] }
  0xb0   : > { %v5675_v37 = vld [vmem:[%s9214_s26 + $0x690] sm:$0xff]  ;;  %5715 = vmatmul.mubr.msk.f32.gmra.mrb[4].mxu0 %vm684_vm2, %v346_v35  ;;  %v477_v44 = vld [vmem:[#allocation2 + $0x38] sm:$0xfe]  ;;  %v5790_v47 = vld [vmem:[%s9214_s26 + $0x9a8] sm:$0xff]  ;;  %v7624_v50 = vpack.c.bf16 %v5791_v36, %v5788_v34  ;;  %v519_v54 = vrot.slane %v470_v41, 1  ;;  %v520_v55 = vrot.slane %v473_v42, 1 }
  0xb1   : > { %7367 = vmatpush1.bf16.msra.mxu1 %v7366_v46  ;;  %v5787_v40 = vld [vmem:[%s9214_s26 + $0x990] sm:$0xff]  ;;  %1224 = vmatprep.mubr.f32.mxu0 %v9009_v43  ;;  %v7384_v46 = vpack.c.bf16 %v5679_v33, %v5676_v31  ;;  %v5794_v51 = vld [vmem:[%s9214_s26 + $0x9c8] sm:$0xff]  ;;  %v5797_v52 = vld [vmem:[%s9214_s26 + $0x9e0] sm:$0xff]  ;;  %v531_v58 = vrot.slane %v477_v44, 1 }
  0xb2   : > { %7607 = vmatpush1.bf16.msra.mxu0 %v7606_v48  ;;  %7369 = vmatprep.subr.bf16.mxu1 %v7368_v49  ;;  %v5682_v48 = vld [vmem:[%s9214_s26 + $0x6c8] sm:$0xff]  ;;  %v5685_v49 = vld [vmem:[%s9214_s26 + $0x6e0] sm:$0xff]  ;;  %v5684_v57 = vld [vmem:[%s9214_s26 + $0x6d8] sm:$0xff]  ;;  %v7626_v2 = vpack.c.bf16 %v5790_v47, %v5787_v40  ;;  %v7628_v9 = vpack.c.bf16 %v5797_v52, %v5794_v51 }
  0xb3   : > { %7609 = vmatprep.subr.bf16.mxu0 %v7608_v53  ;;  %v480_v53 = vld [vmem:[#allocation2 + $0x50] sm:$0x1]  ;;  %v5681_v56 = vld [vmem:[%s9214_s26 + $0x6c0] sm:$0xff]  ;;  %v5796_v62 = vld [vmem:[%s9214_s26 + $0x9d8] sm:$0xff]  ;;  %v7388_v3 = vpack.c.bf16 %v5685_v49, %v5682_v48 }
  0xb4   : > { %v349_v59 = vld [vmem:[#allocation2 + $0xa0] sm:$0xff]  ;;  %v1402_v1 = vld [vmem:[#allocation2 + $0x8] sm:$0xfc]  ;;  %v5688_v10 = vld [vmem:[%s9214_s26 + $0x6f8] sm:$0xff]  ;;  %v7390_v15 = vpack.c.bf16 %v5684_v57, %v5681_v56 }
  0xb5   : > { %7371 = vmatpush1.bf16.msra.mxu1 %v7370_v60  ;;  %v7386_v60 = vpack.c.bf16 %v5678_v38, %v5675_v37  ;;  %v5793_v61 = vld [vmem:[%s9214_s26 + $0x9c0] sm:$0xff]  ;;  %5716 = vmatmul.mubr.msk.f32.gmra.mrb[6].mxu0 %vm684_vm2, %v349_v59  ;;  %v483_v5 = vld [vmem:[#allocation2 + $0x68] sm:$0xfe]  ;;  %v1453_v7 = vrot.slane %v1402_v1, 2  ;;  %v5800_v16 = vld [vmem:[%s9214_s26 + $0x9f8] sm:$0xff] }
  0xb6   : > { %7611 = vmatpush1.bf16.msra.mxu0 %v7610_v63  ;;  %7373 = vmatprep.subr.bf16.mxu1 %v7372_v0  ;;  %v476_v63 = vld [vmem:[#allocation2 + $0x30] sm:$0xfe]  ;;  %v479_v0 = vld [vmem:[#allocation2 + $0x48] sm:$0x1]  ;;  %v1405_v6 = vld [vmem:[#allocation2 + $0x20] sm:$0x3]  ;;  %v7630_v26 = vpack.c.bf16 %v5796_v62, %v5793_v61 }
  0xb7   : > { %7613 = vmatprep.subr.bf16.mxu0 %v7612_v4  ;;  %v532_v4 = vrot.slane %v480_v53, 1  ;;  %v486_v12 = vld [vmem:[#allocation2 + $0x80] sm:$0x1]  ;;  %v5803_v17 = vld [vmem:[%s9214_s26 + $0xa10] sm:$0xff]  ;;  %v528_v19 = vrot.slane %v476_v63, 1  ;;  %v529_v20 = vrot.slane %v479_v0, 1 }
  0xb8   : > { %v5690_v21 = vld [vmem:[%s9214_s26 + $0x708] sm:$0xff]  ;;  %v5799_v22 = vld [vmem:[%s9214_s26 + $0x9f0] sm:$0xff]  ;;  %v541_v29 = vrot.slane %v486_v12, 1  ;;  %v482_v31 = vld [vmem:[#allocation2 + $0x60] sm:$0xfe]  ;;  %v7632_v33 = vpack.c.bf16 %v5803_v17, %v5800_v16 }
  0xb9   : > { %7375 = vmatpush1.bf16.msra.mxu1 %v7374_v11  ;;  %v5691_v11 = vld [vmem:[%s9214_s26 + $0x710] sm:$0xff]  ;;  %v5802_v23 = vld [vmem:[%s9214_s26 + $0xa08] sm:$0xff]  ;;  %v5697_v34 = vld [vmem:[%s9214_s26 + $0x740] sm:$0xff]  ;;  %v9461_v40 = vsel %vm518_vm3, %v528_v19, %v529_v20  ;;  %v537_v42 = vrot.slane %v482_v31, 1 }
  0xba   : > { %7615 = vmatpush1.bf16.msra.mxu0 %v7614_v13  ;;  %7377 = vmatprep.subr.bf16.mxu1 %v7376_v14  ;;  %v1454_v13 = vrot.slane %v1405_v6, 2  ;;  %v9439_v14 = vsel %vm518_vm3, %v519_v54, %v520_v55  ;;  %v5694_v30 = vld [vmem:[%s9214_s26 + $0x728] sm:$0xff]  ;;  %v489_v35 = vld [vmem:[#allocation2 + $0x98] sm:$0xfe]  ;;  %v492_v36 = vld [vmem:[#allocation2 + $0xb0] sm:$0x1]  ;;  %v7634_v41 = vpack.c.bf16 %v5802_v23, %v5799_v22 }
  0xbb   : > { %7617 = vmatprep.subr.bf16.mxu0 %v7616_v18  ;;  %v5687_v18 = vld [vmem:[%s9214_s26 + $0x6f0] sm:$0xff]  ;;  %v5806_v38 = vld [vmem:[%s9214_s26 + $0xa28] sm:$0xff]  ;;  %v7396_v49 = vpack.c.bf16 %v5697_v34, %v5694_v30  ;;  %v5808_v51 = vld [vmem:[%s9214_s26 + $0xa38] sm:$0xff]  ;;  %v549_v52 = vrot.slane %v489_v35, 1  ;;  %v550_v53 = vrot.slane %v492_v36, 1 }
  0xbc   : > { %v9448_v25 = vsel %vm1449_vm4, %v1453_v7, %v1454_v13  ;;  %v7394_v37 = vpack.c.bf16 %v5690_v21, %v5687_v18  ;;  %v488_v47 = vld [vmem:[#allocation2 + $0x90] sm:$0xfe]  ;;  %v491_v54 = vld [vmem:[#allocation2 + $0xa8] sm:$0x1]  ;;  %v5700_v56 = vld [vmem:[%s9214_s26 + $0x758] sm:$0xff] }
  0xbd   : > { %7379 = vmatpush1.bf16.msra.mxu1 %v7378_v24  ;;  %v540_v24 = vrot.slane %v483_v5, 1  ;;  %1687 = vmatprep.mubr.f32.mxu0 %v9448_v25  ;;  %v5703_v57 = vld [vmem:[%s9214_s26 + $0x770] sm:$0xff]  ;;  %v5702_v62 = vld [vmem:[%s9214_s26 + $0x768] sm:$0xff]  ;;  %v547_v1 = vrot.slane %v491_v54, 1  ;;  %v9483_v6 = vsel %vm518_vm3, %v549_v52, %v550_v53  ;;  %v1404_v16 = vld [vmem:[#allocation2 + $0x18] sm:$0x3] }
  0xbe   : > { %7619 = vmatpush1.bf16.msra.mxu0 %v7618_v27  ;;  %7381 = vmatprep.subr.bf16.mxu1 %v7380_v28  ;;  %v9451_v27 = vsel %vm518_vm3, %v531_v58, %v532_v4  ;;  %v7392_v28 = vpack.c.bf16 %v5691_v11, %v5688_v10  ;;  %v5812_v58 = vld [vmem:[%s9214_s26 + $0xa58] sm:$0xff]  ;;  %v5815_v59 = vld [vmem:[%s9214_s26 + $0xa70] sm:$0xff]  ;;  %v475_v4 = vld [vmem:[#allocation2 + $0x28] sm:$0x1]  ;;  %v7400_v7 = vpack.c.bf16 %v5703_v57, %v5700_v56 }
  0xbf   : > { %7621 = vmatprep.subr.bf16.mxu0 %v7620_v32  ;;  %v485_v32 = vld [vmem:[#allocation2 + $0x78] sm:$0x1]  ;;  %v9466_v48 = vsel %vm518_vm3, %v540_v24, %v541_v29  ;;  %v5699_v61 = vld [vmem:[%s9214_s26 + $0x750] sm:$0xff]  ;;  %v5638_v11 = vld [vmem:[%s9214_s26 + $0x568] sm:$0xff]  ;;  %v7640_v12 = vpack.c.bf16 %v5815_v59, %v5812_v58  ;;  %v526_v19 = vrot.slane %v475_v4, 1 }
  0xc0   : > { %v538_v44 = vrot.slane %v485_v32, 1  ;;  %v5635_v10 = vld [vmem:[%s9214_s26 + $0x550] sm:$0xff]  ;;  %v5818_v13 = vld [vmem:[%s9214_s26 + $0xa88] sm:$0xff]  ;;  %v5821_v17 = vld [vmem:[%s9214_s26 + $0xaa0] sm:$0xff]  ;;  %v7402_v23 = vpack.c.bf16 %v5702_v62, %v5699_v61  ;;  %v1451_v32 = vrot.slane %v1404_v16, 2 }
  0xc1   : > { %7383 = vmatpush1.bf16.msra.mxu1 %v7382_v39  ;;  %v5809_v39 = vld [vmem:[%s9214_s26 + $0xa40] sm:$0xff]  ;;  %v5587_v20 = vld [vmem:[%s9214_s26 + $0x3d0] sm:$0xff]  ;;  %v5590_v21 = vld [vmem:[%s9214_s26 + $0x3e8] sm:$0xff]  ;;  %v7404_v30 = vpack.c.bf16 %v5638_v11, %v5635_v10  ;;  %v7644_v36 = vpack.c.bf16 %v5821_v17, %v5818_v13 }
  0xc2   : > { %7623 = vmatpush1.bf16.msra.mxu0 %v7622_v45  ;;  %7385 = vmatprep.subr.bf16.mxu1 %v7384_v46  ;;  %v5693_v45 = vld [vmem:[%s9214_s26 + $0x720] sm:$0xff]  ;;  %v5696_v46 = vld [vmem:[%s9214_s26 + $0x738] sm:$0xff]  ;;  %v7636_v55 = vpack.c.bf16 %v5809_v39, %v5806_v38  ;;  %v9479_v63 = vsel %vm518_vm3, %v537_v42, %v538_v44  ;;  %v1410_v39 = vld [vmem:[#allocation2 + $0x48] sm:$0x3] }
  0xc3   : > { %7625 = vmatprep.subr.bf16.mxu0 %v7624_v50  ;;  %v5805_v50 = vld [vmem:[%s9214_s26 + $0xa20] sm:$0xff]  ;;  %v7398_v0 = vpack.c.bf16 %v5696_v46, %v5693_v45  ;;  %v1408_v24 = vld [vmem:[#allocation2 + $0x38] sm:$0xfc]  ;;  %v5827_v44 = vld [vmem:[%s9214_s26 + $0xad0] sm:$0xff]  ;;  %v1460_v59 = vrot.slane %v1410_v39, 2 }
  0xc4   : > { %v7638_v5 = vpack.c.bf16 %v5808_v51, %v5805_v50  ;;  %v5820_v34 = vld [vmem:[%s9214_s26 + $0xa98] sm:$0xff]  ;;  %v5641_v35 = vld [vmem:[%s9214_s26 + $0x580] sm:$0xff]  ;;  %v7406_v50 = vpack.c.bf16 %v5590_v21, %v5587_v20  ;;  %v9516_v51 = vld [vmem:[%s9214_s26 + $0xab0] sm:$0xff] }
  0xc5   : > { %7387 = vmatpush1.bf16.msra.mxu1 %v7386_v60  ;;  %v546_v60 = vrot.slane %v488_v47, 1  ;;  %v5824_v38 = vld [vmem:[%s9214_s26 + $0xab8] sm:$0xff]  ;;  %v9507_v45 = vld [vmem:[%s9214_s26 + $0x400] sm:$0xff]  ;;  %v9519_v52 = vld [vmem:[%s9214_s26 + $0xac8] sm:$0xff] }
  0xc6   : > { %7627 = vmatpush1.bf16.msra.mxu0 %v7626_v2  ;;  %7389 = vmatprep.subr.bf16.mxu1 %v7388_v3  ;;  %v5811_v2 = vld [vmem:[%s9214_s26 + $0xa50] sm:$0xff]  ;;  %v5596_v46 = vld [vmem:[%s9214_s26 + $0x418] sm:$0xff]  ;;  %v1414_v53 = vld [vmem:[#allocation2 + $0x68] sm:$0xfc]  ;;  %v7650_v20 = vpack.c.bf16 %v9519_v52, %v9516_v51 }
  0xc7   : > { %7629 = vmatprep.subr.bf16.mxu0 %v7628_v9  ;;  %v472_v3 = vld [vmem:[#allocation2 + $0x10] sm:$0xfe]  ;;  %v5814_v9 = vld [vmem:[%s9214_s26 + $0xa68] sm:$0xff]  ;;  %v9495_v22 = vsel %vm518_vm3, %v546_v60, %v547_v1  ;;  %v1417_v54 = vld [vmem:[#allocation2 + $0x80] sm:$0x3]  ;;  %v7410_v13 = vpack.c.bf16 %v5596_v46, %v9507_v45 }
  0xc8   : > { %758 = vmatmul.mubr.f32.vlgmr.msra.gmra.mrb[0].mxu1 %v9439_v14  ;;  %v525_v18 = vrot.slane %v472_v3, 1  ;;  %v7642_v29 = vpack.c.bf16 %v5814_v9, %v5811_v2  ;;  %v5647_v60 = vld [vmem:[%s9214_s26 + $0x5b0] sm:$0xff]  ;;  %v478_v61 = vld [vmem:[#allocation2 + $0x40] sm:$0xfe]  ;;  %v481_v62 = vld [vmem:[#allocation2 + $0x58] sm:$0x1] }
  0xc9   : > { %7391 = vmatpush1.bf16.msra.mxu1 %v7390_v15  ;;  %763 = vmatprep.mubr.f32.mxu1 %v9451_v27  ;;  %v1401_v15 = vld [vmem:[#allocation2] sm:$0xfc]  ;;  %v5650_v1 = vld [vmem:[%s9214_s26 + $0x5c8] sm:$0xff]  ;;  %v1416_v3 = vld [vmem:[#allocation2 + $0x78] sm:$0x3]  ;;  %v534_v17 = vrot.slane %v478_v61, 1 }
  0xca   : > { %7631 = vmatpush1.bf16.msra.mxu0 %v7630_v26  ;;  %7393 = vmatprep.subr.bf16.mxu1 %v7392_v28  ;;  %v1411_v26 = vld [vmem:[#allocation2 + $0x50] sm:$0x3]  ;;  %v9497_v28 = vld [vmem:[#allocation2 + $0x30] sm:$0xfc]  ;;  %v1450_v31 = vrot.slane %v1401_v15, 2  ;;  %v5830_v2 = vld [vmem:[%s9214_s26 + $0xae8] sm:$0xff]  ;;  %v7412_v21 = vpack.c.bf16 %v5650_v1, %v5647_v60 }
  0xcb   : > { %7633 = vmatprep.subr.bf16.mxu0 %v7632_v33  ;;  %v5817_v33 = vld [vmem:[%s9214_s26 + $0xa80] sm:$0xff]  ;;  %v1463_v42 = vrot.slane %v1411_v26, 2  ;;  %v1459_v47 = vrot.slane %v9497_v28, 2  ;;  %v5599_v10 = vld [vmem:[%s9214_s26 + $0x430] sm:$0xff]  ;;  %v5602_v11 = vld [vmem:[%s9214_s26 + $0x448] sm:$0xff] }
  0xcc   : > { %764 = vmatmul.mubr.f32.gmra.mrb[2].mxu1 %v9461_v40  ;;  %v9524_v56 = vsel %vm1449_vm4, %v1450_v31, %v1451_v32  ;;  %v7646_v57 = vpack.c.bf16 %v5820_v34, %v5817_v33  ;;  %v5833_v9 = vld [vmem:[%s9214_s26 + $0xb00] sm:$0xff]  ;;  %v1420_v15 = vld [vmem:[#allocation2 + $0x98] sm:$0xfc]  ;;  %v1423_v16 = vld [vmem:[#allocation2 + $0xb0] sm:$0x3]  ;;  %v7414_v39 = vpack.c.bf16 %v5602_v11, %v5599_v10 }
  0xcd   : > { %7395 = vmatpush1.bf16.msra.mxu1 %v7394_v37  ;;  %769 = vmatprep.mubr.f32.mxu1 %v9466_v48  ;;  %v5644_v37 = vld [vmem:[%s9214_s26 + $0x598] sm:$0xff]  ;;  %v1419_v26 = vld [vmem:[#allocation2 + $0x90] sm:$0xfc]  ;;  %v1422_v28 = vld [vmem:[#allocation2 + $0xa8] sm:$0x3]  ;;  %v1480_v34 = vrot.slane %v1420_v15, 2 }
  0xce   : > { %7635 = vmatpush1.bf16.msra.mxu0 %v7634_v41  ;;  %7397 = vmatprep.subr.bf16.mxu1 %v7396_v49  ;;  %v1462_v41 = vrot.slane %v1408_v24, 2  ;;  %v9513_v49 = vsel %vm518_vm3, %v525_v18, %v526_v19  ;;  %v7408_v58 = vpack.c.bf16 %v5644_v37, %v5641_v35  ;;  %v535_v18 = vrot.slane %v481_v62, 1  ;;  %v5829_v24 = vld [vmem:[%s9214_s26 + $0xae0] sm:$0xff]  ;;  %v5656_v32 = vld [vmem:[%s9214_s26 + $0x5f8] sm:$0xff]  ;;  %v5839_v37 = vld [vmem:[%s9214_s26 + $0xb30] sm:$0xff] }
  0xcf   : > { %7637 = vmatprep.subr.bf16.mxu0 %v7636_v55  ;;  %v9521_v55 = vld [vmem:[#allocation2 + $0x60] sm:$0xfc]  ;;  %v9541_v19 = vsel %vm1449_vm4, %v1459_v47, %v1460_v59  ;;  %v1481_v35 = vrot.slane %v1423_v16, 2  ;;  %v5835_v45 = vld [vmem:[%s9214_s26 + $0xb10] sm:$0xff]  ;;  %v5838_v46 = vld [vmem:[%s9214_s26 + $0xb28] sm:$0xff] }
  0xd0   : > { %770 = vmatmul.mubr.f32.gmra.mrb[4].mxu1 %v9479_v63  ;;  %v9532_v4 = vsel %vm1449_vm4, %v1462_v41, %v1463_v42  ;;  %v5653_v31 = vld [vmem:[%s9214_s26 + $0x5e0] sm:$0xff]  ;;  %v5608_v41 = vld [vmem:[%s9214_s26 + $0x478] sm:$0xff]  ;;  %v1477_v42 = vrot.slane %v1419_v26, 2  ;;  %v9562_v47 = vsel %vm518_vm3, %v534_v17, %v535_v18  ;;  %v5662_v59 = vld [vmem:[%s9214_s26 + $0x628] sm:$0xff]  ;;  %v7658_v11 = vpack.c.bf16 %v5838_v46, %v5835_v45 }
  0xd1   : > { %7399 = vmatpush1.bf16.msra.mxu1 %v7398_v0  ;;  %775 = vmatprep.mubr.f32.mxu1 %v9483_v6  ;;  %v7648_v0 = vpack.c.bf16 %v5827_v44, %v5824_v38  ;;  %v5605_v38 = vld [vmem:[%s9214_s26 + $0x460] sm:$0xff]  ;;  %v1478_v44 = vrot.slane %v1422_v28, 2  ;;  %v7416_v52 = vpack.c.bf16 %v5656_v32, %v5653_v31  ;;  %v1406_v60 = vld [vmem:[#allocation2 + $0x28] sm:$0x3]  ;;  %v9571_v61 = vsel %vm1449_vm4, %v1480_v34, %v1481_v35  ;;  %v493_v17 = vld [vmem:[#allocation2 + $0xb8] sm:$0x1] }
  0xd2   : > { %7639 = vmatpush1.bf16.msra.mxu0 %v7638_v5  ;;  %7401 = vmatprep.subr.bf16.mxu1 %v7400_v7  ;;  %v1471_v5 = vrot.slane %v1414_v53, 2  ;;  %v1472_v7 = vrot.slane %v1417_v54, 2  ;;  %v1403_v53 = vld [vmem:[#allocation2 + $0x10] sm:$0xfc]  ;;  %v5850_v62 = vld [vmem:[%s9214_s26 + $0xb48] sm:$0xff]  ;;  %v7418_v1 = vpack.c.bf16 %v5608_v41, %v5605_v38  ;;  %v5849_v15 = vld [vmem:[%s9214_s26 + $0xb40] sm:$0xff] }
  0xd3   : > { %7641 = vmatprep.subr.bf16.mxu0 %v7640_v12  ;;  %v1468_v12 = vrot.slane %v9521_v55, 2  ;;  %v484_v54 = vld [vmem:[#allocation2 + $0x70] sm:$0xfe]  ;;  %v487_v55 = vld [vmem:[#allocation2 + $0x88] sm:$0x1]  ;;  %v9581_v10 = vsel %vm1449_vm4, %v1477_v42, %v1478_v44  ;;  %v553_v31 = vrot.slane %v493_v17, 1 }
  0xd4   : > { %776 = vmatmul.mubr.f32.gmra.mrb[6].mxu1 %v9495_v22  ;;  %v9551_v33 = vsel %vm1449_vm4, %v1471_v5, %v1472_v7  ;;  %v1456_v5 = vrot.slane %v1403_v53, 2  ;;  %v543_v7 = vrot.slane %v484_v54, 1  ;;  %v490_v16 = vld [vmem:[#allocation2 + $0xa0] sm:$0xfe]  ;;  %v5859_v26 = vld [vmem:[%s9214_s26 + $0xb90] sm:$0xff]  ;;  %v5858_v41 = vld [vmem:[%s9214_s26 + $0xb88] sm:$0xff] }
  0xd5   : > { %7403 = vmatpush1.bf16.msra.mxu1 %v7402_v23  ;;  %846 = vmatprep.mubr.f32.mxu1 %v9009_v43  ;;  %v1469_v23 = vrot.slane %v1416_v3, 2  ;;  %v5614_v3 = vld [vmem:[%s9214_s26 + $0x4a8] sm:$0xff]  ;;  %v5855_v38 = vld [vmem:[%s9214_s26 + $0xb70] sm:$0xff]  ;;  %v5865_v46 = vld [vmem:[%s9214_s26 + $0xbc0] sm:$0xff] }
  0xd6   : > { %7643 = vmatpush1.bf16.msra.mxu0 %v7642_v29  ;;  %7405 = vmatprep.subr.bf16.mxu1 %v7404_v30  ;;  %v7652_v29 = vpack.c.bf16 %v5833_v9, %v5830_v2  ;;  %v5832_v30 = vld [vmem:[%s9214_s26 + $0xaf8] sm:$0xff]  ;;  %v5611_v2 = vld [vmem:[%s9214_s26 + $0x490] sm:$0xff]  ;;  %v544_v9 = vrot.slane %v487_v55, 1  ;;  %v5674_v44 = vld [vmem:[%s9214_s26 + $0x688] sm:$0xff]  ;;  %v7714_v53 = vpack.c.bf16 %v5858_v41, %v5855_v38 }
  0xd7   : > { %7645 = vmatprep.subr.bf16.mxu0 %v7644_v36  ;;  %v5836_v36 = vld [vmem:[%s9214_s26 + $0xb18] sm:$0xff]  ;;  %v7654_v51 = vpack.c.bf16 %v5832_v30, %v5829_v24  ;;  %v7422_v28 = vpack.c.bf16 %v5614_v3, %v5611_v2  ;;  %v552_v30 = vrot.slane %v490_v16, 1  ;;  %v5671_v42 = vld [vmem:[%s9214_s26 + $0x670] sm:$0xff]  ;;  %v5862_v45 = vld [vmem:[%s9214_s26 + $0xba8] sm:$0xff] }
  0xd8   : > { %5705 = vmatmul.mubr.msk.f32.vlgmr.msra.gmra.mrb[0].mxu1 %vm684_vm2, %v9513_v49  ;;  %v5856_v24 = vld [vmem:[%s9214_s26 + $0xb78] sm:$0xff]  ;;  %v7428_v54 = vpack.c.bf16 %v5674_v44, %v5671_v42  ;;  %v5623_v55 = vld [vmem:[%s9214_s26 + $0x4f0] sm:$0xff]  ;;  %v5686_v17 = vld [vmem:[%s9214_s26 + $0x6e8] sm:$0xff] }
  0xd9   : > { %7407 = vmatpush3.bf16.msra.mxu1 %v7406_v50  ;;  %1688 = vmatmul.mubr.f32.vlgmr.msra.gmra.mrb[0].mxu0 %v9524_v56  ;;  %v9565_v50 = vsel %vm1449_vm4, %v1468_v12, %v1469_v23  ;;  %v5668_v23 = vld [vmem:[%s9214_s26 + $0x658] sm:$0xff]  ;;  %v5871_v2 = vld [vmem:[%s9214_s26 + $0xbf0] sm:$0xff]  ;;  %v5882_v44 = vld [vmem:[%s9214_s26 + $0xc48] sm:$0xff] }
  0xda   : > { %7647 = vmatpush1.bf16.msra.mxu0 %v7646_v57  ;;  %7409 = vmatprep.subr.bf16.mxu1 %v7408_v58  ;;  %v7656_v57 = vpack.c.bf16 %v5839_v37, %v5836_v36  ;;  %v5659_v58 = vld [vmem:[%s9214_s26 + $0x610] sm:$0xff]  ;;  %v5617_v36 = vld [vmem:[%s9214_s26 + $0x4c0] sm:$0xff]  ;;  %v5620_v37 = vld [vmem:[%s9214_s26 + $0x4d8] sm:$0xff] }
  0xdb   : > { %1693 = vmatprep.mubr.f32.mxu0 %v9532_v4  ;;  %7649 = vmatprep.subr.bf16.mxu0 %v7648_v0  ;;  %v5853_v0 = vld [vmem:[%s9214_s26 + $0xb60] sm:$0xff]  ;;  %v7420_v12 = vpack.c.bf16 %v5662_v59, %v5659_v58  ;;  %v7716_v59 = vpack.c.bf16 %v5865_v46, %v5862_v45  ;;  %v5683_v16 = vld [vmem:[%s9214_s26 + $0x6d0] sm:$0xff]  ;;  %v1412_v41 = vld [vmem:[#allocation2 + $0x58] sm:$0x3] }
  0xdc   : > { %852 = vmatprep.mubr.f32.mxu1 %v9009_v43  ;;  %v7708_v18 = vpack.c.bf16 %v5853_v0, %v5850_v62  ;;  %v5861_v58 = vld [vmem:[%s9214_s26 + $0xba0] sm:$0xff]  ;;  %v5680_v0 = vld [vmem:[%s9214_s26 + $0x6b8] sm:$0xff]  ;;  %v5879_v38 = vld [vmem:[%s9214_s26 + $0xc30] sm:$0xff] }
  0xdd   : > { %7411 = vmatpush3.bf16.msra.mxu1 %v7410_v13  ;;  %1694 = vmatmul.mubr.f32.gmra.mrb[2].mxu0 %v9541_v19  ;;  %v1457_v13 = vrot.slane %v1406_v60, 2  ;;  %v5864_v60 = vld [vmem:[%s9214_s26 + $0xbb8] sm:$0xff]  ;;  %v5677_v62 = vld [vmem:[%s9214_s26 + $0x6a0] sm:$0xff]  ;;  %v5695_v45 = vld [vmem:[%s9214_s26 + $0x730] sm:$0xff] }
  0xde   : > { %7651 = vmatpush1.bf16.msra.mxu0 %v7650_v20  ;;  %7413 = vmatprep.subr.bf16.mxu1 %v7412_v21  ;;  %v5852_v20 = vld [vmem:[%s9214_s26 + $0xb58] sm:$0xff]  ;;  %v5665_v21 = vld [vmem:[%s9214_s26 + $0x640] sm:$0xff]  ;;  %v5698_v46 = vld [vmem:[%s9214_s26 + $0x748] sm:$0xff] }
  0xdf   : > { %1699 = vmatprep.mubr.f32.mxu0 %v9551_v33  ;;  %7653 = vmatprep.subr.bf16.mxu0 %v7652_v29  ;;  %v9593_v29 = vsel %vm518_vm3, %v543_v7, %v544_v9  ;;  %v9596_v32 = vsel %vm1449_vm4, %v1456_v5, %v1457_v13  ;;  %v7710_v34 = vpack.c.bf16 %v5852_v20, %v5849_v15  ;;  %v5629_v9 = vld [vmem:[%s9214_s26 + $0x520] sm:$0xff]  ;;  %v5870_v15 = vld [vmem:[%s9214_s26 + $0xbe8] sm:$0xff] }
  0xe0   : > { %5706 = vmatmul.mubr.msk.f32.gmra.mrb[2].mxu1 %vm684_vm2, %v9562_v47  ;;  %v7424_v35 = vpack.c.bf16 %v5668_v23, %v5665_v21  ;;  %v7718_v5 = vpack.c.bf16 %v5864_v60, %v5861_v58  ;;  %v7432_v7 = vpack.c.bf16 %v5680_v0, %v5677_v62  ;;  %v7436_v23 = vpack.c.bf16 %v5686_v17, %v5683_v16  ;;  %v1415_v58 = vld [vmem:[#allocation2 + $0x70] sm:$0xfc]  ;;  %v5885_v62 = vld [vmem:[%s9214_s26 + $0xc60] sm:$0xff] }
  0xe1   : > { %7415 = vmatpush3.bf16.msra.mxu1 %v7414_v39  ;;  %1700 = vmatmul.mubr.f32.gmra.mrb[4].mxu0 %v9565_v50  ;;  %v7712_v39 = vpack.c.bf16 %v5859_v26, %v5856_v24  ;;  %v5873_v24 = vld [vmem:[%s9214_s26 + $0xc00] sm:$0xff]  ;;  %v7444_v60 = vpack.c.bf16 %v5698_v46, %v5695_v45  ;;  %v1474_v0 = vrot.slane %v1415_v58, 2  ;;  %v5891_v16 = vld [vmem:[%s9214_s26 + $0xc90] sm:$0xff] }
  0xe2   : > { %7655 = vmatpush1.bf16.msra.mxu0 %v7654_v51  ;;  %7417 = vmatprep.subr.bf16.mxu1 %v7416_v52  ;;  %v7426_v51 = vpack.c.bf16 %v5620_v37, %v5617_v36  ;;  %v9612_v52 = vsel %vm518_vm3, %v552_v30, %v553_v31  ;;  %v5689_v30 = vld [vmem:[%s9214_s26 + $0x700] sm:$0xff]  ;;  %v5692_v31 = vld [vmem:[%s9214_s26 + $0x718] sm:$0xff]  ;;  %v356_v46 = vld [vmem:[%s9214_s26 + $0x30] sm:$0xff] }
  0xe3   : > { %1705 = vmatprep.mubr.f32.mxu0 %v9571_v61  ;;  %7657 = vmatprep.subr.bf16.mxu0 %v7656_v57  ;;  %v5626_v57 = vld [vmem:[%s9214_s26 + $0x508] sm:$0xff]  ;;  %v7440_v37 = vpack.c.bf16 %v5692_v31, %v5689_v30  ;;  %v350_v31 = vld [vmem:[%s9214_s26] sm:$0xff] }
  0xe4   : > { %858 = vmatprep.mubr.f32.mxu1 %v9009_v43  ;;  %v7430_v3 = vpack.c.bf16 %v5626_v57, %v5623_v55  ;;  %v5889_v55 = vld [vmem:[%s9214_s26 + $0xc80] sm:$0xff] }
  0xe5   : > { %7419 = vmatpush3.bf16.msra.mxu1 %v7418_v1  ;;  %1706 = vmatmul.mubr.f32.gmra.mrb[6].mxu0 %v9581_v10  ;;  %v5868_v1 = vld [vmem:[%s9214_s26 + $0xbd8] sm:$0xff]  ;;  %v366_v58 = vld [vmem:[%s9214_s26 + $0x80] sm:$0xff] }
  0xe6   : > { %7659 = vmatpush1.bf16.msra.mxu0 %v7658_v11  ;;  %7421 = vmatprep.subr.bf16.mxu1 %v7420_v12  ;;  %v5632_v11 = vld [vmem:[%s9214_s26 + $0x538] sm:$0xff]  ;;  %v5867_v12 = vld [vmem:[%s9214_s26 + $0xbd0] sm:$0xff]  ;;  %v7720_v13 = vpack.c.bf16 %v5871_v2, %v5868_v1 }
  0xe7   : > { %1776 = vmatprep.mubr.f32.mxu0 %v9009_v43  ;;  %7709 = vmatprep.subr.bf16.mxu0 %v7708_v18  ;;  %v5874_v18 = vld [vmem:[%s9214_s26 + $0xc08] sm:$0xff]  ;;  %v7434_v20 = vpack.c.bf16 %v5632_v11, %v5629_v9  ;;  %v7722_v21 = vpack.c.bf16 %v5870_v15, %v5867_v12  ;;  %v5888_v2 = vld [vmem:[%s9214_s26 + $0xc78] sm:$0xff]  ;;  %v5895_v9 = vld [vmem:[%s9214_s26 + $0xcb0] sm:$0xff] }
  0xe8   : > { %5707 = vmatmul.mubr.msk.f32.gmra.mrb[4].mxu1 %vm684_vm2, %v9593_v29  ;;  %v1421_v12 = vld [vmem:[#allocation2 + $0xa0] sm:$0xfc] }
  0xe9   : > { %7423 = vmatpush3.bf16.msra.mxu1 %v7422_v28  ;;  %5841 = vmatmul.mubr.msk.f32.vlgmr.msra.gmra.mrb[0].mxu0 %vm684_vm2, %v9596_v32  ;;  %v5876_v28 = vld [vmem:[%s9214_s26 + $0xc18] sm:$0xff]  ;;  %v1483_v17 = vrot.slane %v1421_v12, 2 }
  0xea   : > { %7711 = vmatpush1.bf16.msra.mxu0 %v7710_v34  ;;  %7425 = vmatprep.subr.bf16.mxu1 %v7424_v35  ;;  %v5880_v34 = vld [vmem:[%s9214_s26 + $0xc38] sm:$0xff]  ;;  %v5883_v35 = vld [vmem:[%s9214_s26 + $0xc50] sm:$0xff]  ;;  %v7726_v36 = vpack.c.bf16 %v5876_v28, %v5873_v24  ;;  %v5901_v24 = vld [vmem:[%s9214_s26 + $0xce0] sm:$0xff] }
  0xeb   : > { %7713 = vmatprep.subr.bf16.mxu0 %v7712_v39  ;;  %864 = vmatprep.mubr.f32.mxu1 %v9009_v43  ;;  %v1409_v39 = vld [vmem:[#allocation2 + $0x40] sm:$0xfc]  ;;  %v7728_v42 = vpack.c.bf16 %v5883_v35, %v5880_v34  ;;  %v9680_v28 = vld [vmem:[#allocation2 + $0x38] sm:$0xff] }
  0xec   : > { %5708 = vmatmul.mubr.msk.f32.gmra.mrb[6].mxu1 %vm684_vm2, %v9612_v52  ;;  %1782 = vmatprep.mubr.f32.mxu0 %v9009_v43  ;;  %v353_v34 = vld [vmem:[%s9214_s26 + $0x18] sm:$0xff]  ;;  %v5897_v35 = vld [vmem:[%s9214_s26 + $0xcc0] sm:$0xff] }
  0xed   : > { %7427 = vmatpush3.bf16.msra.mxu1 %v7426_v51  ;;  %935 = vmatprep.mubr.f32.mxu1 %v9398_v8  ;;  %v5877_v8 = vld [vmem:[%s9214_s26 + $0xc20] sm:$0xff]  ;;  %v1465_v51 = vrot.slane %v1409_v39, 2  ;;  %v360_v39 = vld [vmem:[%s9214_s26 + $0x50] sm:$0xff] }
  0xee   : > { %7715 = vmatpush1.bf16.msra.mxu0 %v7714_v53  ;;  %7429 = vmatprep.subr.bf16.mxu1 %v7428_v54  ;;  %v7724_v26 = vpack.c.bf16 %v5877_v8, %v5874_v18  ;;  %v1466_v53 = vrot.slane %v1412_v41, 2  ;;  %v5886_v54 = vld [vmem:[%s9214_s26 + $0xc68] sm:$0xff]  ;;  %v5907_v41 = vld [vmem:[%s9214_s26 + $0xd10] sm:$0xff] }
  0xef   : > { %7717 = vmatprep.subr.bf16.mxu0 %v7716_v59  ;;  %v7730_v59 = vpack.c.bf16 %v5882_v44, %v5879_v38  ;;  %v7732_v1 = vpack.c.bf16 %v5889_v55, %v5886_v54  ;;  %v357_v38 = vld [vmem:[%s9214_s26 + $0x38] sm:$0xff]  ;;  %v5906_v54 = vld [vmem:[%s9214_s26 + $0xd08] sm:$0xff] }
  0xf0   : > { %v9650_v57 = vsel %vm1449_vm4, %v1465_v51, %v1466_v53  ;;  %v7456_v45 = vpack.c.bf16 %v360_v39, %v357_v38  ;;  %v5903_v51 = vld [vmem:[%s9214_s26 + $0xcf0] sm:$0xff]  ;;  %v363_v55 = vld [vmem:[%s9214_s26 + $0x68] sm:$0xff]  ;;  %v5928_v38 = vld [vmem:[%s9214_s26 + $0xdb8] sm:$0xff] }
  0xf1   : > { %7431 = vmatpush3.bf16.msra.mxu1 %v7430_v3  ;;  %v5701_v3 = vld [vmem:[%s9214_s26 + $0x760] sm:$0xff]  ;;  %5842 = vmatmul.mubr.msk.f32.gmra.mrb[2].mxu0 %vm684_vm2, %v9650_v57  ;;  %v5931_v39 = vld [vmem:[%s9214_s26 + $0xdd0] sm:$0xff] }
  0xf2   : > { %7719 = vmatpush1.bf16.msra.mxu0 %v7718_v5  ;;  %7433 = vmatprep.subr.bf16.mxu1 %v7432_v7  ;;  %v5704_v5 = vld [vmem:[%s9214_s26 + $0x778] sm:$0xff] }
  0xf3   : > { %7721 = vmatprep.subr.bf16.mxu0 %v7720_v13  ;;  %v5892_v7 = vld [vmem:[%s9214_s26 + $0xc98] sm:$0xff]  ;;  %1788 = vmatprep.mubr.f32.mxu0 %v9009_v43  ;;  %v7448_v15 = vpack.c.bf16 %v5704_v5, %v5701_v3 }
  0xf4   : > { %v1424_v13 = vld [vmem:[#allocation2 + $0xb8] sm:$0x3]  ;;  %v7736_v8 = vpack.c.bf16 %v5895_v9, %v5892_v7 }
  0xf5   : > { %7435 = vmatpush3.bf16.msra.mxu1 %v7434_v20  ;;  %v1484_v18 = vrot.slane %v1424_v13, 2  ;;  %v5894_v20 = vld [vmem:[%s9214_s26 + $0xca8] sm:$0xff]  ;;  %v5912_v3 = vld [vmem:[%s9214_s26 + $0xd38] sm:$0xff] }
  0xf6   : > { %7723 = vmatpush1.bf16.msra.mxu0 %v7722_v21  ;;  %7437 = vmatprep.subr.bf16.mxu1 %v7436_v23  ;;  %v351_v21 = vld [vmem:[%s9214_s26 + $0x8] sm:$0xff]  ;;  %v369_v5 = vld [vmem:[%s9214_s26 + $0x98] sm:$0xff] }
  0xf7   : > { %7725 = vmatprep.subr.bf16.mxu0 %v7724_v26  ;;  %v9677_v26 = vsel %vm1449_vm4, %v1483_v17, %v1484_v18  ;;  %v5916_v7 = vld [vmem:[%s9214_s26 + $0xd58] sm:$0xff]  ;;  %v5918_v18 = vld [vmem:[%s9214_s26 + $0xd68] sm:$0xff] }
  0xf8   : > { %936 = vmatmul.mubr.f32.vlgmr.msra.gmra.mrb[8].mxu1 %v9439_v14  ;;  %v1418_v14 = vld [vmem:[#allocation2 + $0x88] sm:$0x3] }
  0xf9   : > { %7439 = vmatpush3.bf16.msra.mxu1 %v7436_v23  ;;  %940 = vmatprep.mubr.f32.mxu1 %v9451_v27  ;;  %v1475_v27 = vrot.slane %v1418_v14, 2  ;;  %v5898_v23 = vld [vmem:[%s9214_s26 + $0xcc8] sm:$0xff]  ;;  %v7460_v14 = vpack.c.bf16 %v366_v58, %v363_v55  ;;  %v390_v55 = vld [vmem:[%s9214_s26 + $0x140] sm:$0xff] }
  0xfa   : > { %7727 = vmatpush1.bf16.msra.mxu0 %v7726_v36  ;;  %7441 = vmatprep.subr.bf16.mxu1 %v7440_v37  ;;  %v7740_v36 = vpack.c.bf16 %v5901_v24, %v5898_v23  ;;  %v5934_v58 = vld [vmem:[%s9214_s26 + $0xde8] sm:$0xff] }
  0xfb   : > { %7729 = vmatprep.subr.bf16.mxu0 %v7728_v42  ;;  %v9664_v11 = vsel %vm1449_vm4, %v1474_v0, %v1475_v27  ;;  %v7454_v42 = vpack.c.bf16 %v353_v34, %v350_v31  ;;  %v362_v0 = vld [vmem:[%s9214_s26 + $0x60] sm:$0xff]  ;;  %v372_v27 = vld [vmem:[%s9214_s26 + $0xb0] sm:$0xff] }
  0xfc   : > { %941 = vmatmul.mubr.f32.gmra.mrb[10].mxu1 %v9461_v40  ;;  %v7734_v40 = vpack.c.bf16 %v5888_v2, %v5885_v62  ;;  %5843 = vmatmul.mubr.msk.f32.gmra.mrb[4].mxu0 %vm684_vm2, %v9664_v11  ;;  %v7746_v62 = vpack.c.bf16 %v5906_v54, %v5903_v51  ;;  %v5909_v2 = vld [vmem:[%s9214_s26 + $0xd20] sm:$0xff]  ;;  %v7464_v13 = vpack.c.bf16 %v372_v27, %v369_v5  ;;  %v387_v54 = vld [vmem:[%s9214_s26 + $0x128] sm:$0xff]  ;;  %v396_v5 = vld [vmem:[%s9214_s26 + $0x170] sm:$0xff] }
  0xfd   : > { %7443 = vmatpush3.bf16.msra.mxu1 %v7440_v37  ;;  %945 = vmatprep.mubr.f32.mxu1 %v9466_v48  ;;  %v354_v48 = vld [vmem:[%s9214_s26 + $0x20] sm:$0xff]  ;;  %v5900_v37 = vld [vmem:[%s9214_s26 + $0xcd8] sm:$0xff]  ;;  %v7750_v12 = vpack.c.bf16 %v5912_v3, %v5909_v2  ;;  %v7760_v51 = vpack.c.bf16 %v5931_v39, %v5928_v38  ;;  %v5955_v38 = vld [vmem:[%s9214_s26 + $0xe90] sm:$0xff] }
  0xfe   : > { %7731 = vmatpush1.bf16.msra.mxu0 %v7730_v59  ;;  %7445 = vmatprep.subr.bf16.mxu1 %v7444_v60  ;;  %v7452_v30 = vpack.c.bf16 %v354_v48, %v351_v21  ;;  %v7742_v44 = vpack.c.bf16 %v5900_v37, %v5897_v35  ;;  %v5913_v59 = vld [vmem:[%s9214_s26 + $0xd40] sm:$0xff]  ;;  %v5924_v35 = vld [vmem:[%s9214_s26 + $0xd98] sm:$0xff]  ;;  %v384_v37 = vld [vmem:[%s9214_s26 + $0x110] sm:$0xff] }
  0xff   : > { %7733 = vmatprep.subr.bf16.mxu0 %v7732_v1  ;;  %1794 = vmatprep.mubr.f32.mxu0 %v9009_v43  ;;  %v365_v1 = vld [vmem:[%s9214_s26 + $0x78] sm:$0xff]  ;;  %v5925_v21 = vld [vmem:[%s9214_s26 + $0xda0] sm:$0xff] }
 0x100   : > { %946 = vmatmul.mubr.f32.gmra.mrb[12].mxu1 %v9479_v63  ;;  %v7738_v63 = vpack.c.bf16 %v5894_v20, %v5891_v16  ;;  %5844 = vmatmul.mubr.msk.f32.gmra.mrb[6].mxu0 %vm684_vm2, %v9677_v26  ;;  %v7462_v9 = vpack.c.bf16 %v365_v1, %v362_v0  ;;  %v5915_v16 = vld [vmem:[%s9214_s26 + $0xd50] sm:$0xff]  ;;  %v5922_v20 = vld [vmem:[%s9214_s26 + $0xd88] sm:$0xff]  ;;  %v5921_v31 = vld [vmem:[%s9214_s26 + $0xd80] sm:$0xff] }
 0x101   : > { %7447 = vmatpush3.bf16.msra.mxu1 %v7444_v60  ;;  %950 = vmatprep.mubr.f32.mxu1 %v9483_v6  ;;  %v5904_v6 = vld [vmem:[%s9214_s26 + $0xcf8] sm:$0xff]  ;;  %v7754_v23 = vpack.c.bf16 %v5918_v18, %v5915_v16  ;;  %v7756_v34 = vpack.c.bf16 %v5925_v21, %v5922_v20  ;;  %v5933_v1 = vld [vmem:[%s9214_s26 + $0xde0] sm:$0xff]  ;;  %v399_v18 = vld [vmem:[%s9214_s26 + $0x188] sm:$0xff] }
 0x102   : > { %7735 = vmatpush1.bf16.msra.mxu0 %v7734_v40  ;;  %7449 = vmatprep.subr.bf16.mxu1 %v7448_v15  ;;  %v7744_v53 = vpack.c.bf16 %v5907_v41, %v5904_v6  ;;  %v368_v40 = vld [vmem:[%s9214_s26 + $0x90] sm:$0xff]  ;;  %v389_v0 = vld [vmem:[%s9214_s26 + $0x138] sm:$0xff]  ;;  %v5949_v20 = vld [vmem:[%s9214_s26 + $0xe60] sm:$0xff] }
 0x103   : > { %7737 = vmatprep.subr.bf16.mxu0 %v7736_v8  ;;  %2193 = vmatprep.mubr.f32.mxu0 %v9680_v28  ;;  %v375_v8 = vld [vmem:[%s9214_s26 + $0xc8] sm:$0xff]  ;;  %v380_v41 = vld [vmem:[%s9214_s26 + $0xf0] sm:$0xff]  ;;  %v393_v3 = vld [vmem:[%s9214_s26 + $0x158] sm:$0xff] }
 0x104   : > { %951 = vmatmul.mubr.f32.gmra.mrb[14].mxu1 %v9495_v22  ;;  %v359_v22 = vld [vmem:[%s9214_s26 + $0x48] sm:$0xff]  ;;  %v5940_v27 = vld [vmem:[%s9214_s26 + $0xe18] sm:$0xff] }
 0x105   : > { %7451 = vmatpush3.bf16.msra.mxu1 %v7448_v15  ;;  %7142 = vmatprep.mubr.msk.f32.mxu1 %vm684_vm2, %v9513_v49  ;;  %v5910_v49 = vld [vmem:[%s9214_s26 + $0xd28] sm:$0xff]  ;;  %v7458_v60 = vpack.c.bf16 %v359_v22, %v356_v46  ;;  %v5927_v46 = vld [vmem:[%s9214_s26 + $0xdb0] sm:$0xff] }
 0x106   : > { %7739 = vmatpush1.bf16.msra.mxu0 %v7738_v63  ;;  %7453 = vmatprep.subr.bf16.mxu1 %v7452_v30  ;;  %v371_v15 = vld [vmem:[%s9214_s26 + $0xa8] sm:$0xff]  ;;  %v374_v63 = vld [vmem:[%s9214_s26 + $0xc0] sm:$0xff]  ;;  %v377_v30 = vld [vmem:[%s9214_s26 + $0xd8] sm:$0xff] }
 0x107   : > { %7741 = vmatprep.subr.bf16.mxu0 %v7740_v36  ;;  %v7466_v48 = vpack.c.bf16 %v371_v15, %v368_v40  ;;  %v381_v36 = vld [vmem:[%s9214_s26 + $0xf8] sm:$0xff]  ;;  %v7470_v6 = vpack.c.bf16 %v377_v30, %v374_v63  ;;  %v9737_v22 = vld [vmem:[#allocation2 + $0x8] sm:$0xff]  ;;  %v5939_v15 = vld [vmem:[%s9214_s26 + $0xe10] sm:$0xff] }
 0x108   : > { %7143 = vmatmul.mubr.msk.f32.vlgmr.msra.gmra.mrb[16].mxu1 %vm684_vm2, %v9562_v47  ;;  %v7748_v47 = vpack.c.bf16 %v5913_v59, %v5910_v49  ;;  %v5937_v49 = vld [vmem:[%s9214_s26 + $0xe00] sm:$0xff]  ;;  %v395_v40 = vld [vmem:[%s9214_s26 + $0x168] sm:$0xff]  ;;  %v401_v63 = vld [vmem:[%s9214_s26 + $0x198] sm:$0xff] }
 0x109   : > { %7455 = vmatpush1.bf16.msra.mxu1 %v7454_v42  ;;  %7145 = vmatprep.mubr.msk.f32.mxu1 %vm684_vm2, %v9593_v29  ;;  %v5919_v29 = vld [vmem:[%s9214_s26 + $0xd70] sm:$0xff]  ;;  %v7758_v42 = vpack.c.bf16 %v5924_v35, %v5921_v31  ;;  %v7764_v2 = vpack.c.bf16 %v5937_v49, %v5934_v58  ;;  %v5945_v30 = vld [vmem:[%s9214_s26 + $0xe40] sm:$0xff]  ;;  %v405_v35 = vld [vmem:[%s9214_s26 + $0x1b8] sm:$0xff] }
 0x10a   : > { %7743 = vmatpush1.bf16.msra.mxu0 %v7742_v44  ;;  %7457 = vmatprep.subr.bf16.mxu1 %v7456_v45  ;;  %v7752_v17 = vpack.c.bf16 %v5919_v29, %v5916_v7  ;;  %v7472_v44 = vpack.c.bf16 %v384_v37, %v381_v36  ;;  %v383_v45 = vld [vmem:[%s9214_s26 + $0x108] sm:$0xff]  ;;  %v5943_v7 = vld [vmem:[%s9214_s26 + $0xe30] sm:$0xff]  ;;  %v5952_v37 = vld [vmem:[%s9214_s26 + $0xe78] sm:$0xff] }
 0x10b   : > { %7745 = vmatprep.subr.bf16.mxu0 %v7744_v53  ;;  %v5930_v53 = vld [vmem:[%s9214_s26 + $0xdc8] sm:$0xff]  ;;  %v7474_v59 = vpack.c.bf16 %v383_v45, %v380_v41  ;;  %v7768_v16 = vpack.c.bf16 %v5943_v7, %v5940_v27  ;;  %v408_v36 = vld [vmem:[%s9214_s26 + $0x1d0] sm:$0xff]  ;;  %v417_v27 = vld [vmem:[%s9214_s26 + $0x218] sm:$0xff] }
 0x10c   : > { %7146 = vmatmul.mubr.msk.f32.gmra.mrb[18].mxu1 %vm684_vm2, %v9612_v52  ;;  %v378_v52 = vld [vmem:[%s9214_s26 + $0xe0] sm:$0xff]  ;;  %v407_v45 = vld [vmem:[%s9214_s26 + $0x1c8] sm:$0xff]  ;;  %v420_v7 = vld [vmem:[%s9214_s26 + $0x230] sm:$0xff] }
 0x10d   : > { %7459 = vmatpush1.bf16.msra.mxu1 %v7458_v60  ;;  %v7468_v24 = vpack.c.bf16 %v378_v52, %v375_v8  ;;  %1117 = vmatprep.mubr.f32.mxu1 %v9737_v22  ;;  %v7762_v60 = vpack.c.bf16 %v5930_v53, %v5927_v46  ;;  %v402_v8 = vld [vmem:[%s9214_s26 + $0x1a0] sm:$0xff]  ;;  %v5946_v52 = vld [vmem:[%s9214_s26 + $0xe48] sm:$0xff]  ;;  %v5951_v46 = vld [vmem:[%s9214_s26 + $0xe70] sm:$0xff] }
 0x10e   : > { %7747 = vmatpush1.bf16.msra.mxu0 %v7746_v62  ;;  %7461 = vmatprep.subr.bf16.mxu1 %v7460_v14  ;;  %v7476_v62 = vpack.c.bf16 %v390_v55, %v387_v54  ;;  %v386_v14 = vld [vmem:[%s9214_s26 + $0x120] sm:$0xff]  ;;  %v7772_v31 = vpack.c.bf16 %v5949_v20, %v5946_v52  ;;  %v5954_v53 = vld [vmem:[%s9214_s26 + $0xe88] sm:$0xff] }
 0x10f   : > { %7749 = vmatprep.subr.bf16.mxu0 %v7748_v47  ;;  %v5936_v47 = vld [vmem:[%s9214_s26 + $0xdf8] sm:$0xff]  ;;  %v7478_v29 = vpack.c.bf16 %v389_v0, %v386_v14  ;;  %v411_v54 = vld [vmem:[%s9214_s26 + $0x1e8] sm:$0xff]  ;;  %v414_v55 = vld [vmem:[%s9214_s26 + $0x200] sm:$0xff]  ;;  %v7778_v14 = vpack.c.bf16 %v5954_v53, %v5951_v46 }
 0x110   : > { %v9777_v58 = vld [vmem:[#allocation2 + $0x68] sm:$0xff]  ;;  %v7492_v0 = vpack.c.bf16 %v414_v55, %v411_v54  ;;  %v5987_v46 = vld [vmem:[%s9214_s26 + $0xf50] sm:$0xff]  ;;  %v1986_v53 = vld [vmem:[#allocation2 + $0x40] sm:$0xff] }
 0x111   : > { %7463 = vmatpush1.bf16.msra.mxu1 %v7462_v9  ;;  %v7766_v9 = vpack.c.bf16 %v5936_v47, %v5933_v1  ;;  %v5958_v49 = vld [vmem:[%s9214_s26 + $0xea8] sm:$0xff]  ;;  %v410_v1 = vld [vmem:[%s9214_s26 + $0x1e0] sm:$0xff] }
 0x112   : > { %7751 = vmatpush1.bf16.msra.mxu0 %v7750_v12  ;;  %7465 = vmatprep.subr.bf16.mxu1 %v7464_v13  ;;  %v7480_v12 = vpack.c.bf16 %v396_v5, %v393_v3  ;;  %v392_v13 = vld [vmem:[%s9214_s26 + $0x150] sm:$0xff]  ;;  %v5957_v47 = vld [vmem:[%s9214_s26 + $0xea0] sm:$0xff]  ;;  %v5960_v5 = vld [vmem:[%s9214_s26 + $0xeb8] sm:$0xff] }
 0x113   : > { %7753 = vmatprep.subr.bf16.mxu0 %v7752_v17  ;;  %v5942_v17 = vld [vmem:[%s9214_s26 + $0xe28] sm:$0xff]  ;;  %v7482_v21 = vpack.c.bf16 %v395_v40, %v392_v13  ;;  %v9796_v40 = vld [vmem:[#allocation2 + $0x90] sm:$0xff] }
 0x114   : > { %v5966_v20 = vld [vmem:[%s9214_s26 + $0xee8] sm:$0xff] }
 0x115   : > { %7467 = vmatpush1.bf16.msra.mxu1 %v7466_v48  ;;  %v7770_v48 = vpack.c.bf16 %v5942_v17, %v5939_v15  ;;  %v7782_v15 = vpack.c.bf16 %v5960_v5, %v5957_v47  ;;  %v416_v17 = vld [vmem:[%s9214_s26 + $0x210] sm:$0xff]  ;;  %v5990_v47 = vld [vmem:[%s9214_s26 + $0xf68] sm:$0xff] }
 0x116   : > { %7755 = vmatpush1.bf16.msra.mxu0 %v7754_v23  ;;  %7469 = vmatprep.subr.bf16.mxu1 %v7468_v24  ;;  %v7484_v23 = vpack.c.bf16 %v402_v8, %v399_v18  ;;  %v398_v24 = vld [vmem:[%s9214_s26 + $0x180] sm:$0xff]  ;;  %v419_v18 = vld [vmem:[%s9214_s26 + $0x228] sm:$0xff]  ;;  %v5963_v8 = vld [vmem:[%s9214_s26 + $0xed0] sm:$0xff] }
 0x117   : > { %7757 = vmatprep.subr.bf16.mxu0 %v7756_v34  ;;  %v5948_v34 = vld [vmem:[%s9214_s26 + $0xe58] sm:$0xff]  ;;  %v7486_v39 = vpack.c.bf16 %v401_v63, %v398_v24  ;;  %v5978_v24 = vld [vmem:[%s9214_s26 + $0xf08] sm:$0xff]  ;;  %v5981_v63 = vld [vmem:[%s9214_s26 + $0xf20] sm:$0xff] }
 0x118   : > { %v7774_v41 = vpack.c.bf16 %v5948_v34, %v5945_v30  ;;  %v7498_v30 = vpack.c.bf16 %v419_v18, %v416_v17  ;;  %v7786_v34 = vpack.c.bf16 %v5966_v20, %v5963_v8  ;;  %v5992_v17 = vld [vmem:[%s9214_s26 + $0xf78] sm:$0xff]  ;;  %v444_v8 = vld [vmem:[%s9214_s26 + $0x2f0] sm:$0xff] }
 0x119   : > { %7471 = vmatpush1.bf16.msra.mxu1 %v7470_v6  ;;  %v9769_v6 = vld [vmem:[#allocation2 + $0x30] sm:$0xff]  ;;  %v441_v18 = vld [vmem:[%s9214_s26 + $0x2d8] sm:$0xff] }
 0x11a   : > { %7759 = vmatpush1.bf16.msra.mxu0 %v7758_v42  ;;  %7473 = vmatprep.subr.bf16.mxu1 %v7472_v44  ;;  %v7488_v42 = vpack.c.bf16 %v408_v36, %v405_v35  ;;  %v404_v44 = vld [vmem:[%s9214_s26 + $0x1b0] sm:$0xff]  ;;  %v422_v36 = vld [vmem:[%s9214_s26 + $0x240] sm:$0xff] }
 0x11b   : > { %7761 = vmatprep.subr.bf16.mxu0 %v7760_v51  ;;  %v7776_v51 = vpack.c.bf16 %v5955_v38, %v5952_v37  ;;  %v425_v37 = vld [vmem:[%s9214_s26 + $0x258] sm:$0xff]  ;;  %v5977_v38 = vld [vmem:[%s9214_s26 + $0xf00] sm:$0xff]  ;;  %v5999_v20 = vld [vmem:[%s9214_s26 + $0xfb0] sm:$0xff] }
 0x11d   : > { %7475 = vmatpush1.bf16.msra.mxu1 %v7474_v59  ;;  %v5961_v59 = vld [vmem:[%s9214_s26 + $0xec0] sm:$0xff] }
 0x11e   : > { %7763 = vmatpush1.bf16.msra.mxu0 %v7762_v60  ;;  %7477 = vmatprep.subr.bf16.mxu1 %v7476_v62  ;;  %v7490_v60 = vpack.c.bf16 %v407_v45, %v404_v44  ;;  %v9782_v62 = vld [vmem:[#allocation2 + $0x60] sm:$0xff]  ;;  %v7780_v3 = vpack.c.bf16 %v5961_v59, %v5958_v49  ;;  %v432_v44 = vld [vmem:[%s9214_s26 + $0x290] sm:$0xff]  ;;  %v5984_v45 = vld [vmem:[%s9214_s26 + $0xf38] sm:$0xff] }
 0x11f   : > { %7765 = vmatprep.subr.bf16.mxu0 %v7764_v2  ;;  %v413_v2 = vld [vmem:[%s9214_s26 + $0x1f8] sm:$0xff]  ;;  %v428_v49 = vld [vmem:[%s9214_s26 + $0x270] sm:$0xff]  ;;  %v431_v59 = vld [vmem:[%s9214_s26 + $0x288] sm:$0xff] }
 0x120   : > { %v7494_v13 = vpack.c.bf16 %v413_v2, %v410_v1  ;;  %v435_v1 = vld [vmem:[%s9214_s26 + $0x2a8] sm:$0xff]  ;;  %v438_v2 = vld [vmem:[%s9214_s26 + $0x2c0] sm:$0xff]  ;;  %v7506_v5 = vpack.c.bf16 %v431_v59, %v428_v49  ;;  %v1995_v59 = vld [vmem:[#allocation2 + $0xd0] sm:$0xff] }
 0x121   : > { %7479 = vmatpush1.bf16.msra.mxu1 %v7478_v29  ;;  %v9791_v29 = vld [vmem:[#allocation2 + $0x98] sm:$0xff]  ;;  %v6001_v49 = vld [vmem:[%s9214_s26 + $0xfc0] sm:$0xff] }
 0x122   : > { %7767 = vmatpush1.bf16.msra.mxu0 %v7766_v9  ;;  %7481 = vmatprep.subr.bf16.mxu1 %v7480_v12  ;;  %v5964_v9 = vld [vmem:[%s9214_s26 + $0xed8] sm:$0xff]  ;;  %v5967_v12 = vld [vmem:[%s9214_s26 + $0xef0] sm:$0xff] }
 0x123   : > { %7769 = vmatprep.subr.bf16.mxu0 %v7768_v16  ;;  %v7496_v16 = vpack.c.bf16 %v420_v7, %v417_v27  ;;  %v7784_v52 = vpack.c.bf16 %v5967_v12, %v5964_v9  ;;  %v434_v27 = vld [vmem:[%s9214_s26 + $0x2a0] sm:$0xff]  ;;  %v7508_v9 = vpack.c.bf16 %v438_v2, %v435_v1  ;;  %v437_v12 = vld [vmem:[%s9214_s26 + $0x2b8] sm:$0xff] }
 0x124   : > { %v409_v1 = vld [vmem:[%s9214_s26 + $0x1d8] sm:$0xff] }
 0x125   : > { %7483 = vmatpush1.bf16.msra.mxu1 %v7482_v21  ;;  %v423_v21 = vld [vmem:[%s9214_s26 + $0x248] sm:$0xff]  ;;  %v6008_v2 = vld [vmem:[%s9214_s26 + $0xff8] sm:$0xff] }
 0x126   : > { %7771 = vmatpush1.bf16.msra.mxu0 %v7770_v48  ;;  %7485 = vmatprep.subr.bf16.mxu1 %v7484_v23  ;;  %v426_v48 = vld [vmem:[%s9214_s26 + $0x260] sm:$0xff]  ;;  %v1994_v23 = vld [vmem:[#allocation2 + $0xc8] sm:$0xff] }
 0x127   : > { %7773 = vmatprep.subr.bf16.mxu0 %v7772_v31  ;;  %v1993_v31 = vld [vmem:[#allocation2 + $0xc0] sm:$0xff]  ;;  %v7500_v35 = vpack.c.bf16 %v426_v48, %v423_v21  ;;  %v7510_v21 = vpack.c.bf16 %v437_v12, %v434_v27  ;;  %v440_v48 = vld [vmem:[%s9214_s26 + $0x2d0] sm:$0xff] }
 0x128   : > { %v358_v12 = vld [vmem:[%s9214_s26 + $0x40] sm:$0xff] }
 0x129   : > { %7487 = vmatpush1.bf16.msra.mxu1 %v7486_v39  ;;  %2194 = vmatmul.mubr.f32.vlgmr.msra.gmra.mrb[0].mxu0 %v9769_v6  ;;  %v7836_v39 = vpack.c.bf16 %v5981_v63, %v5978_v24  ;;  %v2493_v24 = vld [vmem:[#allocation2 + $0x50] sm:$0x1] }
 0x12a   : > { %7775 = vmatpush1.bf16.msra.mxu0 %v7774_v41  ;;  %7489 = vmatprep.subr.bf16.mxu1 %v7488_v42  ;;  %v5980_v41 = vld [vmem:[%s9214_s26 + $0xf18] sm:$0xff] }
 0x12b   : > { %2199 = vmatprep.mubr.f32.mxu0 %v9777_v58  ;;  %7777 = vmatprep.subr.bf16.mxu0 %v7776_v51  ;;  %v429_v42 = vld [vmem:[%s9214_s26 + $0x278] sm:$0xff]  ;;  %v7502_v51 = vpack.c.bf16 %v425_v37, %v422_v36  ;;  %v7838_v54 = vpack.c.bf16 %v5980_v41, %v5977_v38  ;;  %v5998_v37 = vld [vmem:[%s9214_s26 + $0xfa8] sm:$0xff]  ;;  %v400_v38 = vld [vmem:[%s9214_s26 + $0x190] sm:$0xff] }
 0x12c   : > { %v7504_v55 = vpack.c.bf16 %v432_v44, %v429_v42  ;;  %v6002_v41 = vld [vmem:[%s9214_s26 + $0xfc8] sm:$0xff]  ;;  %v6005_v42 = vld [vmem:[%s9214_s26 + $0xfe0] sm:$0xff] }
 0x12d   : > { %7491 = vmatpush1.bf16.msra.mxu1 %v7490_v60  ;;  %2200 = vmatmul.mubr.f32.gmra.mrb[2].mxu0 %v9782_v62  ;;  %v5983_v60 = vld [vmem:[%s9214_s26 + $0xf30] sm:$0xff] }
 0x12e   : > { %7779 = vmatpush1.bf16.msra.mxu0 %v7778_v14  ;;  %7493 = vmatprep.subr.bf16.mxu1 %v7492_v0  ;;  %v7840_v14 = vpack.c.bf16 %v5987_v46, %v5984_v45  ;;  %v5986_v0 = vld [vmem:[%s9214_s26 + $0xf48] sm:$0xff]  ;;  %v2541_v45 = vrot.slane %v2493_v24, 1  ;;  %v364_v24 = vld [vmem:[%s9214_s26 + $0x70] sm:$0xff] }
 0x12f   : > { %2205 = vmatprep.mubr.f32.mxu0 %v9791_v29  ;;  %7781 = vmatprep.subr.bf16.mxu0 %v7780_v3  ;;  %v5993_v3 = vld [vmem:[%s9214_s26 + $0xf80] sm:$0xff]  ;;  %v7842_v7 = vpack.c.bf16 %v5986_v0, %v5983_v60  ;;  %v7852_v60 = vpack.c.bf16 %v6005_v42, %v6002_v41 }
 0x130   : > { %v406_v0 = vld [vmem:[%s9214_s26 + $0x1c0] sm:$0xff] }
 0x131   : > { %7495 = vmatpush1.bf16.msra.mxu1 %v7494_v13  ;;  %2206 = vmatmul.mubr.f32.gmra.mrb[4].mxu0 %v9796_v40  ;;  %v5989_v13 = vld [vmem:[%s9214_s26 + $0xf60] sm:$0xff] }
 0x132   : > { %7783 = vmatpush1.bf16.msra.mxu0 %v7782_v15  ;;  %7497 = vmatprep.subr.bf16.mxu1 %v7496_v16  ;;  %v1989_v15 = vld [vmem:[#allocation2 + $0x70] sm:$0xff]  ;;  %v7844_v16 = vpack.c.bf16 %v5993_v3, %v5990_v47  ;;  %v7846_v63 = vpack.c.bf16 %v5992_v17, %v5989_v13  ;;  %v361_v13 = vld [vmem:[%s9214_s26 + $0x58] sm:$0xff]  ;;  %v6010_v17 = vld [vmem:[%s9214_s26 + $0x1008] sm:$0xff] }
 0x133   : > { %2211 = vmatprep.mubr.f32.mxu0 %v1994_v23  ;;  %7785 = vmatprep.subr.bf16.mxu0 %v7784_v52  ;;  %v5996_v52 = vld [vmem:[%s9214_s26 + $0xf98] sm:$0xff]  ;;  %v6011_v47 = vld [vmem:[%s9214_s26 + $0x1010] sm:$0xff] }
 0x134   : > { %v2490_v23 = vld [vmem:[#allocation2 + $0x38] sm:$0xfe]  ;;  %v7848_v36 = vpack.c.bf16 %v5999_v20, %v5996_v52  ;;  %v6014_v52 = vld [vmem:[%s9214_s26 + $0x1028] sm:$0xff]  ;;  %v6017_v20 = vld [vmem:[%s9214_s26 + $0x1040] sm:$0xff] }
 0x135   : > { %7499 = vmatpush1.bf16.msra.mxu1 %v7498_v30  ;;  %2212 = vmatmul.mubr.f32.gmra.mrb[6].mxu0 %v1993_v31  ;;  %v7512_v30 = vpack.c.bf16 %v444_v8, %v441_v18  ;;  %v443_v31 = vld [vmem:[%s9214_s26 + $0x2e8] sm:$0xff]  ;;  %v2540_v44 = vrot.slane %v2490_v23, 1  ;;  %v412_v18 = vld [vmem:[%s9214_s26 + $0x1f0] sm:$0xff] }
 0x136   : > { %7787 = vmatpush1.bf16.msra.mxu0 %v7786_v34  ;;  %7501 = vmatprep.subr.bf16.mxu1 %v7500_v35  ;;  %v5995_v34 = vld [vmem:[%s9214_s26 + $0xf90] sm:$0xff]  ;;  %v1992_v35 = vld [vmem:[#allocation2 + $0xa0] sm:$0xff]  ;;  %v7514_v46 = vpack.c.bf16 %v443_v31, %v440_v48  ;;  %v415_v8 = vld [vmem:[%s9214_s26 + $0x208] sm:$0xff]  ;;  %v7860_v31 = vpack.c.bf16 %v6017_v20, %v6014_v52 }
 0x137   : > { %2282 = vmatprep.mubr.f32.mxu0 %v9009_v43  ;;  %7837 = vmatprep.subr.bf16.mxu0 %v7836_v39  ;;  %v403_v39 = vld [vmem:[%s9214_s26 + $0x1a8] sm:$0xff]  ;;  %v9856_v3 = vsel %vm518_vm3, %v2540_v44, %v2541_v45  ;;  %v7540_v23 = vpack.c.bf16 %v415_v8, %v412_v18  ;;  %v370_v44 = vld [vmem:[%s9214_s26 + $0xa0] sm:$0xff]  ;;  %v373_v45 = vld [vmem:[%s9214_s26 + $0xb8] sm:$0xff] }
 0x138   : > { %v382_v8 = vld [vmem:[%s9214_s26 + $0x100] sm:$0xff]  ;;  %v385_v52 = vld [vmem:[%s9214_s26 + $0x118] sm:$0xff]  ;;  %v6031_v20 = vld [vmem:[%s9214_s26 + $0x10b0] sm:$0xff] }
 0x139   : > { %7503 = vmatpush1.bf16.msra.mxu1 %v7502_v51  ;;  %5969 = vmatmul.mubr.msk.f32.vlgmr.msra.gmra.mrb[0].mxu0 %vm684_vm2, %v1986_v53  ;;  %v352_v51 = vld [vmem:[%s9214_s26 + $0x10] sm:$0xff]  ;;  %v7850_v53 = vpack.c.bf16 %v5998_v37, %v5995_v34  ;;  %v6016_v34 = vld [vmem:[%s9214_s26 + $0x1038] sm:$0xff] }
 0x13a   : > { %7839 = vmatpush1.bf16.msra.mxu0 %v7838_v54  ;;  %7505 = vmatprep.subr.bf16.mxu1 %v7504_v55  ;;  %v7532_v54 = vpack.c.bf16 %v403_v39, %v400_v38  ;;  %v355_v55 = vld [vmem:[%s9214_s26 + $0x28] sm:$0xff]  ;;  %v6020_v37 = vld [vmem:[%s9214_s26 + $0x1058] sm:$0xff]  ;;  %v6023_v38 = vld [vmem:[%s9214_s26 + $0x1070] sm:$0xff] }
 0x13b   : > { %7841 = vmatprep.subr.bf16.mxu0 %v7840_v14  ;;  %2288 = vmatprep.mubr.f32.mxu0 %v9009_v43  ;;  %v6004_v14 = vld [vmem:[%s9214_s26 + $0xfd8] sm:$0xff]  ;;  %v7534_v27 = vpack.c.bf16 %v355_v55, %v352_v51  ;;  %v7864_v51 = vpack.c.bf16 %v6023_v38, %v6020_v37  ;;  %v427_v55 = vld [vmem:[%s9214_s26 + $0x268] sm:$0xff]  ;;  %v6037_v37 = vld [vmem:[%s9214_s26 + $0x10e0] sm:$0xff] }
 0x13d   : > { %7507 = vmatpush1.bf16.msra.mxu1 %v7506_v5  ;;  %5970 = vmatmul.mubr.msk.f32.gmra.mrb[2].mxu0 %vm684_vm2, %v1989_v15  ;;  %v9858_v5 = vld [vmem:[#allocation2] sm:$0xff]  ;;  %v6007_v15 = vld [vmem:[%s9214_s26 + $0xff0] sm:$0xff] }
 0x13e   : > { %7843 = vmatpush1.bf16.msra.mxu0 %v7842_v7  ;;  %7509 = vmatprep.subr.bf16.mxu1 %v7508_v9  ;;  %v7854_v7 = vpack.c.bf16 %v6004_v14, %v6001_v49  ;;  %v7536_v9 = vpack.c.bf16 %v409_v1, %v406_v0  ;;  %v7858_v48 = vpack.c.bf16 %v6010_v17, %v6007_v15  ;;  %v6026_v49 = vld [vmem:[%s9214_s26 + $0x1088] sm:$0xff]  ;;  %v376_v1 = vld [vmem:[%s9214_s26 + $0xd0] sm:$0xff] }
 0x13f   : > { %7845 = vmatprep.subr.bf16.mxu0 %v7844_v16  ;;  %2294 = vmatprep.mubr.f32.mxu0 %v9009_v43  ;;  %v7856_v16 = vpack.c.bf16 %v6011_v47, %v6008_v2  ;;  %v379_v2 = vld [vmem:[%s9214_s26 + $0xe8] sm:$0xff]  ;;  %v6025_v47 = vld [vmem:[%s9214_s26 + $0x1080] sm:$0xff]  ;;  %v6035_v15 = vld [vmem:[%s9214_s26 + $0x10d0] sm:$0xff] }
 0x141   : > { %7511 = vmatpush1.bf16.msra.mxu1 %v7510_v21  ;;  %5971 = vmatmul.mubr.msk.f32.gmra.mrb[4].mxu0 %vm684_vm2, %v1992_v35  ;;  %v7538_v21 = vpack.c.bf16 %v361_v13, %v358_v12  ;;  %v418_v35 = vld [vmem:[%s9214_s26 + $0x220] sm:$0xff]  ;;  %v433_v12 = vld [vmem:[%s9214_s26 + $0x298] sm:$0xff] }
 0x142   : > { %7847 = vmatpush1.bf16.msra.mxu0 %v7846_v63  ;;  %7513 = vmatprep.subr.bf16.mxu1 %v7512_v30  ;;  %v367_v63 = vld [vmem:[%s9214_s26 + $0x88] sm:$0xff]  ;;  %v6013_v30 = vld [vmem:[%s9214_s26 + $0x1020] sm:$0xff]  ;;  %v6032_v13 = vld [vmem:[%s9214_s26 + $0x10b8] sm:$0xff] }
 0x143   : > { %7849 = vmatprep.subr.bf16.mxu0 %v7848_v36  ;;  %2300 = vmatprep.mubr.f32.mxu0 %v9009_v43  ;;  %v421_v36 = vld [vmem:[%s9214_s26 + $0x238] sm:$0xff]  ;;  %v7542_v39 = vpack.c.bf16 %v367_v63, %v364_v24  ;;  %v7862_v41 = vpack.c.bf16 %v6016_v34, %v6013_v30  ;;  %v439_v24 = vld [vmem:[%s9214_s26 + $0x2c8] sm:$0xff]  ;;  %v7554_v30 = vpack.c.bf16 %v385_v52, %v382_v8 }
 0x144   : > { %v7544_v42 = vpack.c.bf16 %v421_v36, %v418_v35  ;;  %v6038_v63 = vld [vmem:[%s9214_s26 + $0x10e8] sm:$0xff]  ;;  %v388_v35 = vld [vmem:[%s9214_s26 + $0x130] sm:$0xff] }
 0x145   : > { %7515 = vmatpush1.bf16.msra.mxu1 %v7514_v46  ;;  %5972 = vmatmul.mubr.msk.f32.gmra.mrb[6].mxu0 %vm684_vm2, %v1995_v59  ;;  %v6019_v46 = vld [vmem:[%s9214_s26 + $0x1050] sm:$0xff]  ;;  %v6029_v59 = vld [vmem:[%s9214_s26 + $0x10a0] sm:$0xff]  ;;  %v391_v36 = vld [vmem:[%s9214_s26 + $0x148] sm:$0xff] }
 0x146   : > { %7851 = vmatpush1.bf16.msra.mxu0 %v7850_v53  ;;  %7533 = vmatprep.subr.bf16.mxu1 %v7532_v54  ;;  %v6022_v53 = vld [vmem:[%s9214_s26 + $0x1068] sm:$0xff]  ;;  %v424_v54 = vld [vmem:[%s9214_s26 + $0x250] sm:$0xff] }
 0x147   : > { %7853 = vmatprep.subr.bf16.mxu0 %v7852_v60  ;;  %2774 = vmatprep.mubr.f32.mxu0 %v9856_v3  ;;  %v7546_v60 = vpack.c.bf16 %v373_v45, %v370_v44  ;;  %v7866_v14 = vpack.c.bf16 %v6022_v53, %v6019_v46  ;;  %v7548_v0 = vpack.c.bf16 %v427_v55, %v424_v54  ;;  %v6044_v44 = vld [vmem:[%s9214_s26 + $0x1118] sm:$0xff]  ;;  %v6047_v45 = vld [vmem:[%s9214_s26 + $0x1130] sm:$0xff]  ;;  %v394_v54 = vld [vmem:[%s9214_s26 + $0x160] sm:$0xff] }
 0x148   : > { %1118 = vmatmul.mubr.f32.vlgmr.msra.gmra.mrb[0].mxu1 %v9858_v5  ;;  %v7558_v46 = vpack.c.bf16 %v391_v36, %v388_v35  ;;  %v397_v55 = vld [vmem:[%s9214_s26 + $0x178] sm:$0xff] }
 0x149   : > { %7535 = vmatpush3.bf16.msra.mxu1 %v7534_v27  ;;  %1123 = vmatprep.mubr.f32.mxu1 %v9680_v28  ;;  %v7868_v27 = vpack.c.bf16 %v6029_v59, %v6026_v49  ;;  %v6043_v49 = vld [vmem:[%s9214_s26 + $0x1110] sm:$0xff]  ;;  %v7880_v59 = vpack.c.bf16 %v6047_v45, %v6044_v44  ;;  %v6064_v36 = vld [vmem:[%s9214_s26 + $0x11b8] sm:$0xff]  ;;  %v6070_v44 = vld [vmem:[%s9214_s26 + $0x11e8] sm:$0xff] }
 0x14a   : > { %7855 = vmatpush1.bf16.msra.mxu0 %v7854_v7  ;;  %7537 = vmatprep.subr.bf16.mxu1 %v7536_v9  ;;  %v6028_v7 = vld [vmem:[%s9214_s26 + $0x1098] sm:$0xff]  ;;  %v430_v9 = vld [vmem:[%s9214_s26 + $0x280] sm:$0xff]  ;;  %v5771_v45 = vld [vmem:[%s9214_s26 + $0x910] sm:$0xff] }
 0x14b   : > { %7857 = vmatprep.subr.bf16.mxu0 %v7856_v16  ;;  %v7550_v16 = vpack.c.bf16 %v379_v2, %v376_v1  ;;  %v7870_v17 = vpack.c.bf16 %v6028_v7, %v6025_v47  ;;  %v7552_v18 = vpack.c.bf16 %v433_v12, %v430_v9  ;;  %v6050_v1 = vld [vmem:[%s9214_s26 + $0x1148] sm:$0xff]  ;;  %v6053_v2 = vld [vmem:[%s9214_s26 + $0x1160] sm:$0xff]  ;;  %v7562_v47 = vpack.c.bf16 %v397_v55, %v394_v54  ;;  %v5723_v55 = vld [vmem:[%s9214_s26 + $0x790] sm:$0xff] }
 0x14c   : > { %1124 = vmatmul.mubr.f32.gmra.mrb[2].mxu1 %v9769_v6  ;;  %v6049_v9 = vld [vmem:[%s9214_s26 + $0x1140] sm:$0xff]  ;;  %v7884_v12 = vpack.c.bf16 %v6053_v2, %v6050_v1  ;;  %v6074_v54 = vld [vmem:[%s9214_s26 + $0x1208] sm:$0xff] }
 0x14d   : > { %7539 = vmatpush3.bf16.msra.mxu1 %v7538_v21  ;;  %1129 = vmatprep.mubr.f32.mxu1 %v9777_v58  ;;  %v7872_v21 = vpack.c.bf16 %v6035_v15, %v6032_v13  ;;  %v6052_v13 = vld [vmem:[%s9214_s26 + $0x1158] sm:$0xff]  ;;  %v454_v15 = vld [vmem:[%s9214_s26 + $0x340] sm:$0xff] }
 0x14e   : > { %7859 = vmatpush1.bf16.msra.mxu0 %v7858_v48  ;;  %7541 = vmatprep.subr.bf16.mxu1 %v7540_v23  ;;  %v6034_v48 = vld [vmem:[%s9214_s26 + $0x10c8] sm:$0xff]  ;;  %v436_v23 = vld [vmem:[%s9214_s26 + $0x2b0] sm:$0xff]  ;;  %v7886_v8 = vpack.c.bf16 %v6052_v13, %v6049_v9  ;;  %v6073_v2 = vld [vmem:[%s9214_s26 + $0x1200] sm:$0xff] }
 0x14f   : > { %7861 = vmatprep.subr.bf16.mxu0 %v7860_v31  ;;  %v7874_v31 = vpack.c.bf16 %v6034_v48, %v6031_v20  ;;  %v7556_v34 = vpack.c.bf16 %v439_v24, %v436_v23  ;;  %v6055_v20 = vld [vmem:[%s9214_s26 + $0x1170] sm:$0xff]  ;;  %v6058_v48 = vld [vmem:[%s9214_s26 + $0x1188] sm:$0xff]  ;;  %v5780_v9 = vld [vmem:[%s9214_s26 + $0x958] sm:$0xff] }
 0x150   : > { %1130 = vmatmul.mubr.f32.gmra.mrb[4].mxu1 %v9782_v62  ;;  %v460_v23 = vld [vmem:[%s9214_s26 + $0x370] sm:$0xff]  ;;  %v463_v24 = vld [vmem:[%s9214_s26 + $0x388] sm:$0xff] }
 0x151   : > { %7543 = vmatpush3.bf16.msra.mxu1 %v7542_v39  ;;  %1135 = vmatprep.mubr.f32.mxu1 %v9791_v29  ;;  %v6040_v39 = vld [vmem:[%s9214_s26 + $0x10f8] sm:$0xff] }
 0x152   : > { %7863 = vmatpush1.bf16.msra.mxu0 %v7862_v41  ;;  %7545 = vmatprep.subr.bf16.mxu1 %v7544_v42  ;;  %v442_v41 = vld [vmem:[%s9214_s26 + $0x2e0] sm:$0xff]  ;;  %v445_v42 = vld [vmem:[%s9214_s26 + $0x2f8] sm:$0xff] }
 0x153   : > { %7865 = vmatprep.subr.bf16.mxu0 %v7864_v51  ;;  %v7878_v51 = vpack.c.bf16 %v6040_v39, %v6037_v37  ;;  %v7560_v53 = vpack.c.bf16 %v445_v42, %v442_v41  ;;  %v466_v37 = vld [vmem:[%s9214_s26 + $0x3a0] sm:$0xff]  ;;  %v6071_v39 = vld [vmem:[%s9214_s26 + $0x11f0] sm:$0xff] }
 0x154   : > { %1136 = vmatmul.mubr.f32.gmra.mrb[6].mxu1 %v9796_v40  ;;  %v6067_v42 = vld [vmem:[%s9214_s26 + $0x11d0] sm:$0xff] }
 0x155   : > { %7547 = vmatpush3.bf16.msra.mxu1 %v7546_v60  ;;  %1295 = vmatprep.mubr.f32.mxu1 %v9737_v22  ;;  %v6041_v22 = vld [vmem:[%s9214_s26 + $0x1100] sm:$0xff]  ;;  %v6046_v60 = vld [vmem:[%s9214_s26 + $0x1128] sm:$0xff] }
 0x156   : > { %7867 = vmatpush1.bf16.msra.mxu0 %v7866_v14  ;;  %7549 = vmatprep.subr.bf16.mxu1 %v7548_v0  ;;  %v7876_v38 = vpack.c.bf16 %v6041_v22, %v6038_v63  ;;  %v448_v14 = vld [vmem:[%s9214_s26 + $0x310] sm:$0xff]  ;;  %v451_v0 = vld [vmem:[%s9214_s26 + $0x328] sm:$0xff]  ;;  %v6065_v22 = vld [vmem:[%s9214_s26 + $0x11c0] sm:$0xff] }
 0x157   : > { %7869 = vmatprep.subr.bf16.mxu0 %v7868_v27  ;;  %v7882_v27 = vpack.c.bf16 %v6046_v60, %v6043_v49  ;;  %v7564_v7 = vpack.c.bf16 %v451_v0, %v448_v14  ;;  %v6062_v63 = vld [vmem:[%s9214_s26 + $0x11a8] sm:$0xff]  ;;  %v2499_v60 = vld [vmem:[#allocation2 + $0x80] sm:$0x1]  ;;  %v7898_v14 = vpack.c.bf16 %v6070_v44, %v6067_v42 }
 0x158   : > { %v7892_v35 = vpack.c.bf16 %v6065_v22, %v6062_v63  ;;  %v5726_v49 = vld [vmem:[%s9214_s26 + $0x7a8] sm:$0xff]  ;;  %v6089_v44 = vld [vmem:[%s9214_s26 + $0x1280] sm:$0xff] }
 0x159   : > { %7551 = vmatpush3.bf16.msra.mxu1 %v7550_v16  ;;  %v457_v16 = vld [vmem:[%s9214_s26 + $0x358] sm:$0xff]  ;;  %v6086_v42 = vld [vmem:[%s9214_s26 + $0x1268] sm:$0xff] }
 0x15a   : > { %7871 = vmatpush1.bf16.msra.mxu0 %v7870_v17  ;;  %7553 = vmatprep.subr.bf16.mxu1 %v7552_v18  ;;  %v6056_v17 = vld [vmem:[%s9214_s26 + $0x1178] sm:$0xff]  ;;  %v6059_v18 = vld [vmem:[%s9214_s26 + $0x1190] sm:$0xff]  ;;  %v7568_v52 = vpack.c.bf16 %v457_v16, %v454_v15  ;;  %v2550_v15 = vrot.slane %v2499_v60, 1  ;;  %v6085_v60 = vld [vmem:[%s9214_s26 + $0x1260] sm:$0xff] }
 0x15b   : > { %7873 = vmatprep.subr.bf16.mxu0 %v7872_v21  ;;  %v7888_v21 = vpack.c.bf16 %v6059_v18, %v6056_v17  ;;  %v6080_v16 = vld [vmem:[%s9214_s26 + $0x1238] sm:$0xff]  ;;  %v6083_v17 = vld [vmem:[%s9214_s26 + $0x1250] sm:$0xff]  ;;  %v5729_v18 = vld [vmem:[%s9214_s26 + $0x7c0] sm:$0xff] }
 0x15d   : > { %7555 = vmatpush3.bf16.msra.mxu1 %v7554_v30  ;;  %v7890_v30 = vpack.c.bf16 %v6058_v48, %v6055_v20  ;;  %v2502_v48 = vld [vmem:[#allocation2 + $0x98] sm:$0xfe] }
 0x15e   : > { %7875 = vmatpush1.bf16.msra.mxu0 %v7874_v31  ;;  %7557 = vmatprep.subr.bf16.mxu1 %v7556_v34  ;;  %v7572_v31 = vpack.c.bf16 %v463_v24, %v460_v23  ;;  %v6061_v34 = vld [vmem:[%s9214_s26 + $0x11a0] sm:$0xff]  ;;  %v2505_v23 = vld [vmem:[#allocation2 + $0xb0] sm:$0x1] }
 0x15f   : > { %7877 = vmatprep.subr.bf16.mxu0 %v7876_v38  ;;  %v6068_v38 = vld [vmem:[%s9214_s26 + $0x11d8] sm:$0xff] }
 0x161   : > { %7559 = vmatpush3.bf16.msra.mxu1 %v7558_v46  ;;  %v7896_v46 = vpack.c.bf16 %v6071_v39, %v6068_v38  ;;  %v8802_v38 = vld [vmem:[#allocation2 + $0x40] sm:$0xff] }
 0x162   : > { %7879 = vmatpush1.bf16.msra.mxu0 %v7878_v51  ;;  %7561 = vmatprep.subr.bf16.mxu1 %v7560_v53  ;;  %v5774_v51 = vld [vmem:[%s9214_s26 + $0x928] sm:$0xff] }
 0x163   : > { %7881 = vmatprep.subr.bf16.mxu0 %v7880_v59  ;;  %v2492_v53 = vld [vmem:[#allocation2 + $0x48] sm:$0x1]  ;;  %v2496_v59 = vld [vmem:[#allocation2 + $0x68] sm:$0xfe]  ;;  %v7660_v0 = vpack.c.bf16 %v5774_v51, %v5771_v45  ;;  %v5735_v45 = vld [vmem:[%s9214_s26 + $0x7f0] sm:$0xff] }
 0x164   : > { %v2538_v1 = vrot.slane %v2492_v53, 1  ;;  %v2549_v13 = vrot.slane %v2496_v59, 1  ;;  %v2508_v53 = vld [vmem:[#allocation2 + $0xc8] sm:$0xfe] }
 0x165   : > { %7563 = vmatpush3.bf16.msra.mxu1 %v7562_v47  ;;  %v6076_v47 = vld [vmem:[%s9214_s26 + $0x1218] sm:$0xff] }
 0x166   : > { %7883 = vmatpush1.bf16.msra.mxu0 %v7882_v27  ;;  %7565 = vmatprep.subr.bf16.mxu1 %v7564_v7  ;;  %v5777_v27 = vld [vmem:[%s9214_s26 + $0x940] sm:$0xff]  ;;  %v7902_v20 = vpack.c.bf16 %v6076_v47, %v6073_v2  ;;  %v9977_v39 = vsel %vm518_vm3, %v2549_v13, %v2550_v15  ;;  %v2510_v47 = vld [vmem:[#allocation2 + $0xd8] sm:$0x1]  ;;  %v8803_v13 = vld [vmem:[#allocation2 + $0x70] sm:$0xff] }
 0x167   : > { %7885 = vmatprep.subr.bf16.mxu0 %v7884_v12  ;;  %v2498_v12 = vld [vmem:[#allocation2 + $0x78] sm:$0x1]  ;;  %v7664_v24 = vpack.c.bf16 %v5780_v9, %v5777_v27  ;;  %v2507_v2 = vld [vmem:[#allocation2 + $0xc0] sm:$0xfe] }
 0x168   : > { %1296 = vmatmul.mubr.f32.vlgmr.msra.gmra.mrb[20].mxu1 %v9858_v5  ;;  %v469_v5 = vld [vmem:[%s9214_s26 + $0x3b8] sm:$0xff]  ;;  %v2547_v22 = vrot.slane %v2498_v12, 1  ;;  %v6095_v12 = vld [vmem:[%s9214_s26 + $0x12b0] sm:$0xff] }
 0x169   : > { %7567 = vmatpush3.bf16.msra.mxu1 %v7564_v7  ;;  %1300 = vmatprep.mubr.f32.mxu1 %v9680_v28  ;;  %v7894_v28 = vpack.c.bf16 %v6064_v36, %v6061_v34  ;;  %v7576_v41 = vpack.c.bf16 %v469_v5, %v466_v37  ;;  %v5783_v34 = vld [vmem:[%s9214_s26 + $0x970] sm:$0xff]  ;;  %v5786_v36 = vld [vmem:[%s9214_s26 + $0x988] sm:$0xff] }
 0x16a   : > { %7887 = vmatpush1.bf16.msra.mxu0 %v7886_v8  ;;  %7569 = vmatprep.subr.bf16.mxu1 %v7568_v52  ;;  %v8801_v8 = vld [vmem:[#allocation2 + $0x10] sm:$0xff]  ;;  %v2504_v5 = vld [vmem:[#allocation2 + $0xa8] sm:$0x1] }
 0x16b   : > { %7889 = vmatprep.subr.bf16.mxu0 %v7888_v21  ;;  %v5732_v21 = vld [vmem:[%s9214_s26 + $0x7d8] sm:$0xff]  ;;  %v2501_v37 = vld [vmem:[#allocation2 + $0x90] sm:$0xfe]  ;;  %v2556_v59 = vrot.slane %v2504_v5, 1 }
 0x16c   : > { %1301 = vmatmul.mubr.f32.gmra.mrb[22].mxu1 %v9769_v6  ;;  %v2489_v6 = vld [vmem:[#allocation2 + $0x30] sm:$0xfe] }
 0x16d   : > { %7571 = vmatpush3.bf16.msra.mxu1 %v7568_v52  ;;  %1305 = vmatprep.mubr.f32.mxu1 %v9777_v58  ;;  %v6077_v58 = vld [vmem:[%s9214_s26 + $0x1220] sm:$0xff]  ;;  %v7662_v52 = vpack.c.bf16 %v5726_v49, %v5723_v55  ;;  %v7668_v55 = vpack.c.bf16 %v5786_v36, %v5783_v34  ;;  %v2555_v49 = vrot.slane %v2501_v37, 1 }
 0x16e   : > { %7891 = vmatpush1.bf16.msra.mxu0 %v7890_v30  ;;  %7573 = vmatprep.subr.bf16.mxu1 %v7572_v31  ;;  %v7900_v7 = vpack.c.bf16 %v6077_v58, %v6074_v54  ;;  %v6079_v30 = vld [vmem:[%s9214_s26 + $0x1230] sm:$0xff]  ;;  %v2511_v54 = vld [vmem:[#allocation2 + $0xe0] sm:$0x1] }
 0x16f   : > { %7893 = vmatprep.subr.bf16.mxu0 %v7892_v35  ;;  %v7904_v35 = vpack.c.bf16 %v6083_v17, %v6080_v16  ;;  %v2568_v9 = vrot.slane %v2511_v54, 1  ;;  %v5741_v17 = vld [vmem:[%s9214_s26 + $0x820] sm:$0xff] }
 0x170   : > { %1306 = vmatmul.mubr.f32.gmra.mrb[24].mxu1 %v9782_v62  ;;  %v2537_v62 = vrot.slane %v2489_v6, 1  ;;  %v5738_v6 = vld [vmem:[%s9214_s26 + $0x808] sm:$0xff]  ;;  %v6109_v36 = vld [vmem:[%s9214_s26 + $0x12e0] sm:$0xff] }
 0x171   : > { %7575 = vmatpush3.bf16.msra.mxu1 %v7572_v31  ;;  %1310 = vmatprep.mubr.f32.mxu1 %v9791_v29  ;;  %v2495_v29 = vld [vmem:[#allocation2 + $0x60] sm:$0xfe]  ;;  %v6082_v31 = vld [vmem:[%s9214_s26 + $0x1248] sm:$0xff]  ;;  %v7670_v15 = vpack.c.bf16 %v5738_v6, %v5735_v45  ;;  %v6108_v6 = vld [vmem:[%s9214_s26 + $0x12d8] sm:$0xff] }
 0x172   : > { %7895 = vmatpush1.bf16.msra.mxu0 %v7894_v28  ;;  %7577 = vmatprep.subr.bf16.mxu1 %v7576_v41  ;;  %v2546_v63 = vrot.slane %v2495_v29, 1  ;;  %v2558_v28 = vrot.slane %v2502_v48, 1  ;;  %v7906_v51 = vpack.c.bf16 %v6082_v31, %v6079_v30  ;;  %v6092_v29 = vld [vmem:[%s9214_s26 + $0x1298] sm:$0xff]  ;;  %v6091_v48 = vld [vmem:[%s9214_s26 + $0x1290] sm:$0xff]  ;;  %v2491_v30 = vld [vmem:[#allocation2 + $0x40] sm:$0xfe] }
 0x173   : > { %7897 = vmatprep.subr.bf16.mxu0 %v7896_v46  ;;  %v7666_v46 = vpack.c.bf16 %v5732_v21, %v5729_v18  ;;  %v5744_v18 = vld [vmem:[%s9214_s26 + $0x838] sm:$0xff]  ;;  %v2565_v21 = vrot.slane %v2510_v47, 1  ;;  %v8804_v37 = vld [vmem:[#allocation2 + $0xa0] sm:$0xff]  ;;  %v2543_v45 = vrot.slane %v2491_v30, 1 }
 0x174   : > { %1311 = vmatmul.mubr.f32.gmra.mrb[26].mxu1 %v9796_v40  ;;  %v9969_v40 = vsel %vm518_vm3, %v2537_v62, %v2538_v1  ;;  %v9985_v58 = vsel %vm518_vm3, %v2546_v63, %v2547_v22  ;;  %v7908_v62 = vpack.c.bf16 %v6089_v44, %v6086_v42  ;;  %v5792_v1 = vld [vmem:[%s9214_s26 + $0x9b8] sm:$0xff]  ;;  %v7912_v63 = vpack.c.bf16 %v6095_v12, %v6092_v29  ;;  %v5798_v22 = vld [vmem:[%s9214_s26 + $0x9e8] sm:$0xff] }
 0x175   : > { %7579 = vmatpush3.bf16.msra.mxu1 %v7576_v41  ;;  %7164 = vmatprep.mubr.msk.f32.mxu1 %vm684_vm2, %v8801_v8  ;;  %v2559_v41 = vrot.slane %v2505_v23, 1  ;;  %v10002_v8 = vsel %vm518_vm3, %v2555_v49, %v2556_v59  ;;  %v6094_v23 = vld [vmem:[%s9214_s26 + $0x12a8] sm:$0xff]  ;;  %v2494_v31 = vld [vmem:[#allocation2 + $0x58] sm:$0x1]  ;;  %v7674_v5 = vpack.c.bf16 %v5744_v18, %v5741_v17  ;;  %v2497_v49 = vld [vmem:[#allocation2 + $0x70] sm:$0xfe] }
 0x176   : > { %7899 = vmatpush1.bf16.msra.mxu0 %v7898_v14  ;;  %7661 = vmatprep.subr.bf16.mxu1 %v7660_v0  ;;  %v6088_v14 = vld [vmem:[%s9214_s26 + $0x1278] sm:$0xff]  ;;  %v5789_v0 = vld [vmem:[%s9214_s26 + $0x9a0] sm:$0xff]  ;;  %v2500_v59 = vld [vmem:[#allocation2 + $0x88] sm:$0x1]  ;;  %v2552_v12 = vrot.slane %v2497_v49, 1 }
 0x177   : > { %7901 = vmatprep.subr.bf16.mxu0 %v7900_v7  ;;  %v9993_v27 = vsel %vm518_vm3, %v2558_v28, %v2559_v41  ;;  %v2567_v7 = vrot.slane %v2508_v53, 1  ;;  %v7910_v16 = vpack.c.bf16 %v6088_v14, %v6085_v60  ;;  %v5747_v28 = vld [vmem:[%s9214_s26 + $0x850] sm:$0xff]  ;;  %v5750_v41 = vld [vmem:[%s9214_s26 + $0x868] sm:$0xff]  ;;  %v5801_v53 = vld [vmem:[%s9214_s26 + $0xa00] sm:$0xff] }
 0x178   : > { %7165 = vmatmul.mubr.msk.f32.vlgmr.msra.gmra.mrb[16].mxu1 %vm684_vm2, %v8802_v38  ;;  %v7914_v38 = vpack.c.bf16 %v6094_v23, %v6091_v48  ;;  %v6112_v60 = vld [vmem:[%s9214_s26 + $0x12f8] sm:$0xff]  ;;  %v6115_v14 = vld [vmem:[%s9214_s26 + $0x1310] sm:$0xff]  ;;  %v6114_v29 = vld [vmem:[%s9214_s26 + $0x1308] sm:$0xff] }
 0x179   : > { %7663 = vmatpush3.bf16.msra.mxu1 %v7662_v52  ;;  %2775 = vmatmul.mubr.f32.vlgmr.msra.gmra.mrb[0].mxu0 %v9969_v40  ;;  %v7672_v52 = vpack.c.bf16 %v5792_v1, %v5789_v0  ;;  %v10010_v34 = vsel %vm518_vm3, %v2567_v7, %v2568_v9  ;;  %v7678_v0 = vpack.c.bf16 %v5750_v41, %v5747_v28  ;;  %v5753_v1 = vld [vmem:[%s9214_s26 + $0x880] sm:$0xff]  ;;  %v6111_v9 = vld [vmem:[%s9214_s26 + $0x12f0] sm:$0xff]  ;;  %v2506_v18 = vld [vmem:[#allocation2 + $0xb8] sm:$0x1] }
 0x17a   : > { %7903 = vmatpush1.bf16.msra.mxu0 %v7902_v20  ;;  %7665 = vmatprep.subr.bf16.mxu1 %v7664_v24  ;;  %v2564_v20 = vrot.slane %v2507_v2, 1  ;;  %v5795_v24 = vld [vmem:[%s9214_s26 + $0x9d0] sm:$0xff]  ;;  %v5756_v2 = vld [vmem:[%s9214_s26 + $0x898] sm:$0xff]  ;;  %v2503_v17 = vld [vmem:[#allocation2 + $0xa0] sm:$0xfe]  ;;  %v7970_v48 = vpack.c.bf16 %v6114_v29, %v6111_v9 }
 0x17b   : > { %2780 = vmatprep.mubr.f32.mxu0 %v9977_v39  ;;  %7905 = vmatprep.subr.bf16.mxu0 %v7904_v35  ;;  %v6106_v35 = vld [vmem:[%s9214_s26 + $0x12c8] sm:$0xff]  ;;  %v7676_v44 = vpack.c.bf16 %v5798_v22, %v5795_v24  ;;  %v5759_v23 = vld [vmem:[%s9214_s26 + $0x8b0] sm:$0xff]  ;;  %v6117_v22 = vld [vmem:[%s9214_s26 + $0x1320] sm:$0xff] }
 0x17c   : > { %7167 = vmatprep.mubr.msk.f32.mxu1 %vm684_vm2, %v8803_v13  ;;  %v10019_v42 = vsel %vm518_vm3, %v2564_v20, %v2565_v21  ;;  %v7964_v54 = vpack.c.bf16 %v6109_v36, %v6106_v35  ;;  %v2553_v13 = vrot.slane %v2500_v59, 1  ;;  %v6121_v20 = vld [vmem:[%s9214_s26 + $0x1340] sm:$0xff]  ;;  %v7682_v21 = vpack.c.bf16 %v5756_v2, %v5753_v1  ;;  %v5762_v24 = vld [vmem:[%s9214_s26 + $0x8c8] sm:$0xff]  ;;  %v6120_v30 = vld [vmem:[%s9214_s26 + $0x1338] sm:$0xff] }
 0x17d   : > { %7667 = vmatpush3.bf16.msra.mxu1 %v7666_v46  ;;  %2781 = vmatmul.mubr.f32.gmra.mrb[2].mxu0 %v9985_v58  ;;  %v2544_v46 = vrot.slane %v2494_v31, 1  ;;  %v5813_v31 = vld [vmem:[%s9214_s26 + $0xa60] sm:$0xff]  ;;  %v2561_v36 = vrot.slane %v2503_v17, 1  ;;  %v2509_v28 = vld [vmem:[#allocation2 + $0xd0] sm:$0xfe]  ;;  %v5768_v49 = vld [vmem:[%s9214_s26 + $0x8f8] sm:$0xff] }
 0x17e   : > { %7907 = vmatpush1.bf16.msra.mxu0 %v7906_v51  ;;  %7669 = vmatprep.subr.bf16.mxu1 %v7668_v55  ;;  %v6105_v51 = vld [vmem:[%s9214_s26 + $0x12c0] sm:$0xff]  ;;  %v5804_v55 = vld [vmem:[%s9214_s26 + $0xa18] sm:$0xff]  ;;  %v10050_v35 = vsel %vm518_vm3, %v2552_v12, %v2553_v13  ;;  %v2512_v41 = vld [vmem:[#allocation2 + $0xe8] sm:$0x1] }
 0x17f   : > { %2786 = vmatprep.mubr.f32.mxu0 %v9993_v27  ;;  %7909 = vmatprep.subr.bf16.mxu0 %v7908_v62  ;;  %v7966_v62 = vpack.c.bf16 %v6108_v6, %v6105_v51  ;;  %v10033_v47 = vsel %vm518_vm3, %v2543_v45, %v2544_v46  ;;  %v7680_v7 = vpack.c.bf16 %v5804_v55, %v5801_v53  ;;  %v6127_v45 = vld [vmem:[%s9214_s26 + $0x1370] sm:$0xff]  ;;  %v3071_v6 = vld [vmem:[#allocation2 + $0x38] sm:$0xfc]  ;;  %v5765_v55 = vld [vmem:[%s9214_s26 + $0x8e0] sm:$0xff] }
 0x180   : > { %7168 = vmatmul.mubr.msk.f32.gmra.mrb[18].mxu1 %vm684_vm2, %v8804_v37  ;;  %v2562_v37 = vrot.slane %v2506_v18, 1  ;;  %v7686_v46 = vpack.c.bf16 %v5762_v24, %v5759_v23  ;;  %v7974_v51 = vpack.c.bf16 %v6120_v30, %v6117_v22  ;;  %v3074_v53 = vld [vmem:[#allocation2 + $0x50] sm:$0x3]  ;;  %v6126_v1 = vld [vmem:[%s9214_s26 + $0x1368] sm:$0xff]  ;;  %v6133_v29 = vld [vmem:[%s9214_s26 + $0x13a0] sm:$0xff]  ;;  %v7690_v13 = vpack.c.bf16 %v5768_v49, %v5765_v55 }
 0x181   : > { %7671 = vmatpush3.bf16.msra.mxu1 %v7670_v15  ;;  %2787 = vmatmul.mubr.f32.gmra.mrb[4].mxu0 %v10002_v8  ;;  %v7968_v15 = vpack.c.bf16 %v6115_v14, %v6112_v60  ;;  %v6123_v59 = vld [vmem:[%s9214_s26 + $0x1350] sm:$0xff]  ;;  %v2570_v14 = vrot.slane %v2509_v28, 1  ;;  %v6130_v9 = vld [vmem:[%s9214_s26 + $0x1388] sm:$0xff]  ;;  %v3122_v12 = vrot.slane %v3074_v53, 2  ;;  %v6129_v17 = vld [vmem:[%s9214_s26 + $0x1380] sm:$0xff] }
 0x182   : > { %7911 = vmatpush1.bf16.msra.mxu0 %v7910_v16  ;;  %7673 = vmatprep.subr.bf16.mxu1 %v7672_v52  ;;  %v5810_v16 = vld [vmem:[%s9214_s26 + $0xa48] sm:$0xff]  ;;  %v10062_v60 = vsel %vm518_vm3, %v2561_v36, %v2562_v37  ;;  %v5819_v2 = vld [vmem:[%s9214_s26 + $0xa90] sm:$0xff]  ;;  %v6136_v23 = vld [vmem:[%s9214_s26 + $0x13b8] sm:$0xff] }
 0x183   : > { %2792 = vmatprep.mubr.f32.mxu0 %v10010_v34  ;;  %7913 = vmatprep.subr.bf16.mxu0 %v7912_v63  ;;  %v6118_v52 = vld [vmem:[%s9214_s26 + $0x1328] sm:$0xff]  ;;  %v6139_v24 = vld [vmem:[%s9214_s26 + $0x13d0] sm:$0xff]  ;;  %v5837_v53 = vld [vmem:[%s9214_s26 + $0xb20] sm:$0xff] }
 0x184   : > { %1865 = vmatprep.mubr.f32.mxu1 %v9448_v25  ;;  %v5807_v25 = vld [vmem:[%s9214_s26 + $0xa30] sm:$0xff]  ;;  %v7984_v36 = vpack.c.bf16 %v6139_v24, %v6136_v23  ;;  %v6138_v37 = vld [vmem:[%s9214_s26 + $0x13c8] sm:$0xff] }
 0x185   : > { %7675 = vmatpush3.bf16.msra.mxu1 %v7674_v5  ;;  %2793 = vmatmul.mubr.f32.gmra.mrb[6].mxu0 %v10019_v42  ;;  %v7684_v63 = vpack.c.bf16 %v5810_v16, %v5807_v25  ;;  %v7972_v5 = vpack.c.bf16 %v6121_v20, %v6118_v52  ;;  %v3121_v25 = vrot.slane %v3071_v6, 2  ;;  %v7980_v52 = vpack.c.bf16 %v6133_v29, %v6130_v9  ;;  %v6132_v20 = vld [vmem:[%s9214_s26 + $0x1398] sm:$0xff]  ;;  %v6142_v28 = vld [vmem:[%s9214_s26 + $0x13e8] sm:$0xff]  ;;  %v5851_v9 = vld [vmem:[%s9214_s26 + $0xb50] sm:$0xff] }
 0x186   : > { %7915 = vmatpush1.bf16.msra.mxu0 %v7914_v38  ;;  %7677 = vmatprep.subr.bf16.mxu1 %v7676_v44  ;;  %v5816_v38 = vld [vmem:[%s9214_s26 + $0xa78] sm:$0xff]  ;;  %v7982_v22 = vpack.c.bf16 %v6132_v20, %v6129_v17  ;;  %v5854_v29 = vld [vmem:[%s9214_s26 + $0xb68] sm:$0xff]  ;;  %v6159_v23 = vld [vmem:[%s9214_s26 + $0x1470] sm:$0xff] }
 0x187   : > { %2863 = vmatprep.mubr.f32.mxu0 %v9009_v43  ;;  %7965 = vmatprep.subr.bf16.mxu0 %v7964_v54  ;;  %v6124_v44 = vld [vmem:[%s9214_s26 + $0x1358] sm:$0xff]  ;;  %v7688_v54 = vpack.c.bf16 %v5816_v38, %v5813_v31  ;;  %v6135_v31 = vld [vmem:[%s9214_s26 + $0x13b0] sm:$0xff]  ;;  %v5834_v38 = vld [vmem:[%s9214_s26 + $0xb08] sm:$0xff]  ;;  %v7790_v17 = vpack.c.bf16 %v5854_v29, %v5851_v9 }
 0x188   : > { %v6144_v6 = vld [vmem:[%s9214_s26 + $0x13f8] sm:$0xff]  ;;  %v6162_v24 = vld [vmem:[%s9214_s26 + $0x1488] sm:$0xff]  ;;  %v6177_v29 = vld [vmem:[%s9214_s26 + $0x1500] sm:$0xff] }
 0x189   : > { %7679 = vmatpush3.bf16.msra.mxu1 %v7678_v0  ;;  %6097 = vmatmul.mubr.msk.f32.vlgmr.msra.gmra.mrb[0].mxu0 %vm684_vm2, %v10033_v47  ;;  %v2571_v0 = vrot.slane %v2512_v41, 1  ;;  %v6145_v41 = vld [vmem:[%s9214_s26 + $0x1400] sm:$0xff]  ;;  %v5878_v9 = vld [vmem:[%s9214_s26 + $0xc28] sm:$0xff] }
 0x18a   : > { %7967 = vmatpush1.bf16.msra.mxu0 %v7966_v62  ;;  %7681 = vmatprep.subr.bf16.mxu1 %v7680_v7  ;;  %v7976_v62 = vpack.c.bf16 %v6127_v45, %v6124_v44  ;;  %v5822_v7 = vld [vmem:[%s9214_s26 + $0xaa8] sm:$0xff]  ;;  %v7986_v44 = vpack.c.bf16 %v6138_v37, %v6135_v31  ;;  %v6169_v31 = vld [vmem:[%s9214_s26 + $0x14c0] sm:$0xff]  ;;  %v8002_v37 = vpack.c.bf16 %v6162_v24, %v6159_v23  ;;  %v5935_v24 = vld [vmem:[%s9214_s26 + $0xdf0] sm:$0xff] }
 0x18b   : > { %7969 = vmatprep.subr.bf16.mxu0 %v7968_v15  ;;  %2869 = vmatprep.mubr.f32.mxu0 %v9009_v43  ;;  %v7978_v15 = vpack.c.bf16 %v6126_v1, %v6123_v59  ;;  %v7692_v16 = vpack.c.bf16 %v5822_v7, %v5819_v2  ;;  %v10074_v18 = vsel %vm518_vm3, %v2570_v14, %v2571_v0  ;;  %v6147_v59 = vld [vmem:[%s9214_s26 + $0x1410] sm:$0xff]  ;;  %v6150_v0 = vld [vmem:[%s9214_s26 + $0x1428] sm:$0xff] }
 0x18c   : > { %v6154_v1 = vld [vmem:[%s9214_s26 + $0x1448] sm:$0xff]  ;;  %v7994_v2 = vpack.c.bf16 %v6150_v0, %v6147_v59 }
 0x18d   : > { %7683 = vmatpush3.bf16.msra.mxu1 %v7682_v21  ;;  %6098 = vmatmul.mubr.msk.f32.gmra.mrb[2].mxu0 %vm684_vm2, %v10050_v35  ;;  %v5825_v21 = vld [vmem:[%s9214_s26 + $0xac0] sm:$0xff]  ;;  %v5926_v0 = vld [vmem:[%s9214_s26 + $0xda8] sm:$0xff] }
 0x18e   : > { %7971 = vmatpush1.bf16.msra.mxu0 %v7970_v48  ;;  %7685 = vmatprep.subr.bf16.mxu1 %v7684_v63  ;;  %v5828_v48 = vld [vmem:[%s9214_s26 + $0xad8] sm:$0xff]  ;;  %v10083_v63 = vsel %vm1449_vm4, %v3121_v25, %v3122_v12  ;;  %v6153_v25 = vld [vmem:[%s9214_s26 + $0x1440] sm:$0xff] }
 0x18f   : > { %7973 = vmatprep.subr.bf16.mxu0 %v7972_v5  ;;  %2875 = vmatprep.mubr.f32.mxu0 %v9009_v43  ;;  %v7696_v30 = vpack.c.bf16 %v5828_v48, %v5825_v21  ;;  %v5831_v5 = vld [vmem:[%s9214_s26 + $0xaf0] sm:$0xff]  ;;  %v5857_v21 = vld [vmem:[%s9214_s26 + $0xb80] sm:$0xff]  ;;  %v5860_v48 = vld [vmem:[%s9214_s26 + $0xb98] sm:$0xff] }
 0x190   : > { %v7700_v45 = vpack.c.bf16 %v5834_v38, %v5831_v5  ;;  %v5863_v38 = vld [vmem:[%s9214_s26 + $0xbb0] sm:$0xff] }
 0x191   : > { %7687 = vmatpush3.bf16.msra.mxu1 %v7686_v46  ;;  %6099 = vmatmul.mubr.msk.f32.gmra.mrb[4].mxu0 %vm684_vm2, %v10062_v60  ;;  %v6141_v46 = vld [vmem:[%s9214_s26 + $0x13e0] sm:$0xff] }
 0x192   : > { %7975 = vmatpush1.bf16.msra.mxu0 %v7974_v51  ;;  %7689 = vmatprep.subr.bf16.mxu1 %v7688_v54  ;;  %v7988_v51 = vpack.c.bf16 %v6145_v41, %v6142_v28  ;;  %v6148_v54 = vld [vmem:[%s9214_s26 + $0x1418] sm:$0xff]  ;;  %v7990_v55 = vpack.c.bf16 %v6144_v6, %v6141_v46  ;;  %v5866_v28 = vld [vmem:[%s9214_s26 + $0xbc8] sm:$0xff]  ;;  %v6165_v41 = vld [vmem:[%s9214_s26 + $0x14a0] sm:$0xff] }
 0x193   : > { %7977 = vmatprep.subr.bf16.mxu0 %v7976_v62  ;;  %2881 = vmatprep.mubr.f32.mxu0 %v9009_v43  ;;  %v5899_v62 = vld [vmem:[%s9214_s26 + $0xcd0] sm:$0xff]  ;;  %v5920_v46 = vld [vmem:[%s9214_s26 + $0xd78] sm:$0xff] }
 0x194   : > { %v6175_v6 = vld [vmem:[%s9214_s26 + $0x14f0] sm:$0xff] }
 0x195   : > { %7691 = vmatpush3.bf16.msra.mxu1 %v7690_v13  ;;  %6100 = vmatmul.mubr.msk.f32.gmra.mrb[6].mxu0 %vm684_vm2, %v10074_v18  ;;  %v5905_v13 = vld [vmem:[%s9214_s26 + $0xd00] sm:$0xff] }
 0x196   : > { %7979 = vmatpush1.bf16.msra.mxu0 %v7978_v15  ;;  %7693 = vmatprep.subr.bf16.mxu1 %v7692_v16  ;;  %v5908_v15 = vld [vmem:[%s9214_s26 + $0xd18] sm:$0xff] }
 0x197   : > { %7981 = vmatprep.subr.bf16.mxu0 %v7980_v52  ;;  %3355 = vmatprep.mubr.f32.mxu0 %v10083_v63  ;;  %v7792_v20 = vpack.c.bf16 %v5908_v15, %v5905_v13  ;;  %v5932_v13 = vld [vmem:[%s9214_s26 + $0xdd8] sm:$0xff] }
 0x198   : > { %1866 = vmatmul.mubr.f32.vlgmr.msra.gmra.mrb[28].mxu1 %v9524_v56  ;;  %v5840_v56 = vld [vmem:[%s9214_s26 + $0xb38] sm:$0xff] }
 0x199   : > { %7695 = vmatpush3.bf16.msra.mxu1 %v7692_v16  ;;  %1870 = vmatprep.mubr.f32.mxu1 %v9532_v4  ;;  %v6151_v4 = vld [vmem:[%s9214_s26 + $0x1430] sm:$0xff]  ;;  %v7704_v49 = vpack.c.bf16 %v5840_v56, %v5837_v53  ;;  %v8805_v53 = vld [vmem:[#allocation2 + $0x38] sm:$0xff] }
 0x19a   : > { %7983 = vmatpush1.bf16.msra.mxu0 %v7982_v22  ;;  %7697 = vmatprep.subr.bf16.mxu1 %v7696_v30  ;;  %v7992_v14 = vpack.c.bf16 %v6151_v4, %v6148_v54  ;;  %v6163_v16 = vld [vmem:[%s9214_s26 + $0x1490] sm:$0xff]  ;;  %v5869_v4 = vld [vmem:[%s9214_s26 + $0xbe0] sm:$0xff]  ;;  %v6184_v15 = vld [vmem:[%s9214_s26 + $0x1538] sm:$0xff] }
 0x19b   : > { %7985 = vmatprep.subr.bf16.mxu0 %v7984_v36  ;;  %v5911_v22 = vld [vmem:[%s9214_s26 + $0xd30] sm:$0xff]  ;;  %v7794_v36 = vpack.c.bf16 %v5860_v48, %v5857_v21  ;;  %v5884_v21 = vld [vmem:[%s9214_s26 + $0xc58] sm:$0xff] }
 0x19c   : > { %1871 = vmatmul.mubr.f32.gmra.mrb[30].mxu1 %v9541_v19  ;;  %v5902_v19 = vld [vmem:[%s9214_s26 + $0xce8] sm:$0xff]  ;;  %v6183_v48 = vld [vmem:[%s9214_s26 + $0x1530] sm:$0xff] }
 0x19d   : > { %7699 = vmatpush3.bf16.msra.mxu1 %v7696_v30  ;;  %1875 = vmatprep.mubr.f32.mxu1 %v9551_v33  ;;  %v6157_v33 = vld [vmem:[%s9214_s26 + $0x1460] sm:$0xff]  ;;  %v7788_v7 = vpack.c.bf16 %v5902_v19, %v5899_v62  ;;  %v5914_v30 = vld [vmem:[%s9214_s26 + $0xd48] sm:$0xff] }
 0x19e   : > { %7987 = vmatpush1.bf16.msra.mxu0 %v7986_v44  ;;  %7701 = vmatprep.subr.bf16.mxu1 %v7700_v45  ;;  %v7996_v12 = vpack.c.bf16 %v6157_v33, %v6154_v1  ;;  %v7796_v5 = vpack.c.bf16 %v5914_v30, %v5911_v22  ;;  %v6168_v44 = vld [vmem:[%s9214_s26 + $0x14b8] sm:$0xff]  ;;  %v6178_v62 = vld [vmem:[%s9214_s26 + $0x1508] sm:$0xff]  ;;  %v6181_v19 = vld [vmem:[%s9214_s26 + $0x1520] sm:$0xff] }
 0x19f   : > { %7989 = vmatprep.subr.bf16.mxu0 %v7988_v51  ;;  %v6172_v51 = vld [vmem:[%s9214_s26 + $0x14d8] sm:$0xff]  ;;  %v8006_v56 = vpack.c.bf16 %v6168_v44, %v6165_v41  ;;  %v5938_v22 = vld [vmem:[%s9214_s26 + $0xe08] sm:$0xff]  ;;  %v5941_v44 = vld [vmem:[%s9214_s26 + $0xe20] sm:$0xff] }
 0x1a0   : > { %1876 = vmatmul.mubr.f32.gmra.mrb[32].mxu1 %v9565_v50  ;;  %v6156_v50 = vld [vmem:[%s9214_s26 + $0x1458] sm:$0xff]  ;;  %v8008_v59 = vpack.c.bf16 %v6175_v6, %v6172_v51  ;;  %v6190_v30 = vld [vmem:[%s9214_s26 + $0x1568] sm:$0xff]  ;;  %v6199_v51 = vld [vmem:[%s9214_s26 + $0x15b0] sm:$0xff] }
 0x1a1   : > { %7703 = vmatpush3.bf16.msra.mxu1 %v7700_v45  ;;  %1880 = vmatprep.mubr.f32.mxu1 %v9571_v61  ;;  %v6160_v61 = vld [vmem:[%s9214_s26 + $0x1478] sm:$0xff]  ;;  %v7998_v52 = vpack.c.bf16 %v6156_v50, %v6153_v25  ;;  %v5917_v45 = vld [vmem:[%s9214_s26 + $0xd60] sm:$0xff]  ;;  %v8012_v25 = vpack.c.bf16 %v6181_v19, %v6178_v62  ;;  %v6202_v62 = vld [vmem:[%s9214_s26 + $0x15c8] sm:$0xff] }
 0x1a2   : > { %7991 = vmatpush1.bf16.msra.mxu0 %v7990_v55  ;;  %7705 = vmatprep.subr.bf16.mxu1 %v7704_v49  ;;  %v7800_v54 = vpack.c.bf16 %v5920_v46, %v5917_v45  ;;  %v5872_v55 = vld [vmem:[%s9214_s26 + $0xbf8] sm:$0xff]  ;;  %v5929_v50 = vld [vmem:[%s9214_s26 + $0xdc0] sm:$0xff] }
 0x1a3   : > { %7993 = vmatprep.subr.bf16.mxu0 %v7992_v14  ;;  %v5923_v14 = vld [vmem:[%s9214_s26 + $0xd90] sm:$0xff]  ;;  %v7802_v1 = vpack.c.bf16 %v5872_v55, %v5869_v4  ;;  %v5944_v45 = vld [vmem:[%s9214_s26 + $0xe38] sm:$0xff]  ;;  %v6198_v55 = vld [vmem:[%s9214_s26 + $0x15a8] sm:$0xff] }
 0x1a4   : > { %1881 = vmatmul.mubr.f32.gmra.mrb[34].mxu1 %v9581_v10  ;;  %v8000_v10 = vpack.c.bf16 %v6163_v16, %v6160_v61  ;;  %v6187_v61 = vld [vmem:[%s9214_s26 + $0x1550] sm:$0xff]  ;;  %v6196_v46 = vld [vmem:[%s9214_s26 + $0x1598] sm:$0xff]  ;;  %v6205_v19 = vld [vmem:[%s9214_s26 + $0x15e0] sm:$0xff] }
 0x1a5   : > { %7707 = vmatpush3.bf16.msra.mxu1 %v7704_v49  ;;  %7186 = vmatprep.mubr.msk.f32.mxu1 %vm684_vm2, %v9596_v32  ;;  %v6166_v32 = vld [vmem:[%s9214_s26 + $0x14a8] sm:$0xff]  ;;  %v6171_v49 = vld [vmem:[%s9214_s26 + $0x14d0] sm:$0xff]  ;;  %v8016_v23 = vpack.c.bf16 %v6187_v61, %v6184_v15  ;;  %v3076_v15 = vld [vmem:[#allocation2 + $0x60] sm:$0xfc] }
 0x1a6   : > { %7995 = vmatpush1.bf16.msra.mxu0 %v7994_v2  ;;  %7789 = vmatprep.subr.bf16.mxu1 %v7788_v7  ;;  %v7804_v2 = vpack.c.bf16 %v5926_v0, %v5923_v14  ;;  %v5875_v7 = vld [vmem:[%s9214_s26 + $0xc10] sm:$0xff]  ;;  %v3073_v0 = vld [vmem:[#allocation2 + $0x48] sm:$0x3]  ;;  %v3079_v61 = vld [vmem:[#allocation2 + $0x78] sm:$0x3] }
 0x1a7   : > { %7997 = vmatprep.subr.bf16.mxu0 %v7996_v12  ;;  %v6180_v12 = vld [vmem:[%s9214_s26 + $0x1518] sm:$0xff]  ;;  %v7806_v16 = vpack.c.bf16 %v5878_v9, %v5875_v7  ;;  %v6195_v4 = vld [vmem:[%s9214_s26 + $0x1590] sm:$0xff] }
 0x1a8   : > { %7187 = vmatmul.mubr.msk.f32.vlgmr.msra.gmra.mrb[16].mxu1 %vm684_vm2, %v9650_v57  ;;  %v8004_v57 = vpack.c.bf16 %v6169_v31, %v6166_v32  ;;  %v6193_v32 = vld [vmem:[%s9214_s26 + $0x1580] sm:$0xff]  ;;  %v3070_v14 = vld [vmem:[#allocation2 + $0x30] sm:$0xfc]  ;;  %v8026_v7 = vpack.c.bf16 %v6198_v55, %v6195_v4 }
 0x1a9   : > { %7791 = vmatpush3.bf16.msra.mxu1 %v7790_v17  ;;  %7189 = vmatprep.mubr.msk.f32.mxu1 %vm684_vm2, %v9664_v11  ;;  %v7798_v11 = vpack.c.bf16 %v5866_v28, %v5863_v38  ;;  %v8014_v17 = vpack.c.bf16 %v6180_v12, %v6177_v29  ;;  %v5890_v38 = vld [vmem:[%s9214_s26 + $0xc88] sm:$0xff]  ;;  %v6189_v28 = vld [vmem:[%s9214_s26 + $0x1560] sm:$0xff]  ;;  %v8020_v41 = vpack.c.bf16 %v6193_v32, %v6190_v30  ;;  %v3118_v29 = vrot.slane %v3070_v14, 2 }
 0x1aa   : > { %7999 = vmatpush1.bf16.msra.mxu0 %v7998_v52  ;;  %7793 = vmatprep.subr.bf16.mxu1 %v7792_v20  ;;  %v7808_v52 = vpack.c.bf16 %v5932_v13, %v5929_v50  ;;  %v5881_v20 = vld [vmem:[%s9214_s26 + $0xc40] sm:$0xff]  ;;  %v8028_v50 = vpack.c.bf16 %v6205_v19, %v6202_v62  ;;  %v6204_v13 = vld [vmem:[%s9214_s26 + $0x15d8] sm:$0xff]  ;;  %v3127_v30 = vrot.slane %v3076_v15, 2  ;;  %v3128_v32 = vrot.slane %v3079_v61, 2  ;;  %v6223_v61 = vld [vmem:[%s9214_s26 + $0x1670] sm:$0xff] }
 0x1ab   : > { %8001 = vmatprep.subr.bf16.mxu0 %v8000_v10  ;;  %v6186_v10 = vld [vmem:[%s9214_s26 + $0x1548] sm:$0xff]  ;;  %v7810_v31 = vpack.c.bf16 %v5884_v21, %v5881_v20  ;;  %v6201_v12 = vld [vmem:[%s9214_s26 + $0x15c0] sm:$0xff]  ;;  %v6208_v21 = vld [vmem:[%s9214_s26 + $0x15f8] sm:$0xff] }
 0x1ac   : > { %7190 = vmatmul.mubr.msk.f32.gmra.mrb[18].mxu1 %vm684_vm2, %v9677_v26  ;;  %v6174_v26 = vld [vmem:[%s9214_s26 + $0x14e8] sm:$0xff]  ;;  %v10205_v4 = vsel %vm1449_vm4, %v3127_v30, %v3128_v32  ;;  %v3088_v19 = vld [vmem:[#allocation2 + $0xc0] sm:$0xfc]  ;;  %v6220_v15 = vld [vmem:[%s9214_s26 + $0x1658] sm:$0xff] }
 0x1ad   : > { %7795 = vmatpush3.bf16.msra.mxu1 %v7794_v36  ;;  %2371 = vmatprep.mubr.f32.mxu1 %v8805_v53  ;;  %v8010_v33 = vpack.c.bf16 %v6174_v26, %v6171_v49  ;;  %v8018_v36 = vpack.c.bf16 %v6186_v10, %v6183_v48  ;;  %v5896_v53 = vld [vmem:[%s9214_s26 + $0xcb8] sm:$0xff]  ;;  %v5947_v49 = vld [vmem:[%s9214_s26 + $0xe50] sm:$0xff]  ;;  %v5950_v26 = vld [vmem:[%s9214_s26 + $0xe68] sm:$0xff] }
 0x1ae   : > { %8003 = vmatpush1.bf16.msra.mxu0 %v8002_v37  ;;  %7797 = vmatprep.subr.bf16.mxu1 %v7796_v5  ;;  %v7812_v37 = vpack.c.bf16 %v5938_v22, %v5935_v24  ;;  %v5887_v5 = vld [vmem:[%s9214_s26 + $0xc70] sm:$0xff]  ;;  %v7820_v9 = vpack.c.bf16 %v5950_v26, %v5947_v49  ;;  %v8030_v22 = vpack.c.bf16 %v6204_v13, %v6201_v12  ;;  %v6213_v26 = vld [vmem:[%s9214_s26 + $0x1620] sm:$0xff]  ;;  %v3075_v32 = vld [vmem:[#allocation2 + $0x58] sm:$0x3] }
 0x1af   : > { %8005 = vmatprep.subr.bf16.mxu0 %v8004_v57  ;;  %v6192_v57 = vld [vmem:[%s9214_s26 + $0x1578] sm:$0xff]  ;;  %v7814_v6 = vpack.c.bf16 %v5890_v38, %v5887_v5  ;;  %v6211_v48 = vld [vmem:[%s9214_s26 + $0x1610] sm:$0xff]  ;;  %v3085_v38 = vld [vmem:[#allocation2 + $0xa8] sm:$0x3] }
 0x1b0   : > { %v3086_v10 = vld [vmem:[#allocation2 + $0xb0] sm:$0x3]  ;;  %v3082_v5 = vld [vmem:[#allocation2 + $0x90] sm:$0xfc]  ;;  %v3072_v30 = vld [vmem:[#allocation2 + $0x40] sm:$0xfc] }
 0x1b1   : > { %7799 = vmatpush3.bf16.msra.mxu1 %v7798_v11  ;;  %v5893_v11 = vld [vmem:[%s9214_s26 + $0xca0] sm:$0xff]  ;;  %v3136_v49 = vrot.slane %v3082_v5, 2 }
 0x1b2   : > { %8007 = vmatpush1.bf16.msra.mxu0 %v8006_v56  ;;  %7801 = vmatprep.subr.bf16.mxu1 %v7800_v54  ;;  %v8022_v56 = vpack.c.bf16 %v6192_v57, %v6189_v28  ;;  %v7816_v54 = vpack.c.bf16 %v5944_v45, %v5941_v44  ;;  %v8806_v28 = vld [vmem:[#allocation2 + $0x30] sm:$0xff]  ;;  %v8032_v57 = vpack.c.bf16 %v6211_v48, %v6208_v21  ;;  %v5962_v45 = vld [vmem:[%s9214_s26 + $0xec8] sm:$0xff] }
 0x1b3   : > { %8009 = vmatprep.subr.bf16.mxu0 %v8008_v59  ;;  %v8024_v59 = vpack.c.bf16 %v6199_v51, %v6196_v46  ;;  %v5959_v44 = vld [vmem:[%s9214_s26 + $0xeb0] sm:$0xff]  ;;  %v3140_v51 = vrot.slane %v3086_v10, 2  ;;  %v6222_v10 = vld [vmem:[%s9214_s26 + $0x1668] sm:$0xff] }
 0x1b4   : > { %v7828_v14 = vpack.c.bf16 %v5962_v45, %v5959_v44  ;;  %v6219_v48 = vld [vmem:[%s9214_s26 + $0x1650] sm:$0xff]  ;;  %v6234_v44 = vld [vmem:[%s9214_s26 + $0x1688] sm:$0xff]  ;;  %v6237_v45 = vld [vmem:[%s9214_s26 + $0x16a0] sm:$0xff] }
 0x1b5   : > { %7803 = vmatpush3.bf16.msra.mxu1 %v7802_v1  ;;  %v7818_v1 = vpack.c.bf16 %v5896_v53, %v5893_v11  ;;  %v6217_v11 = vld [vmem:[%s9214_s26 + $0x1640] sm:$0xff]  ;;  %v3089_v53 = vld [vmem:[#allocation2 + $0xc8] sm:$0xfc] }
 0x1b6   : > { %8011 = vmatpush1.bf16.msra.mxu0 %v8010_v33  ;;  %7805 = vmatprep.subr.bf16.mxu1 %v7804_v2  ;;  %v3077_v33 = vld [vmem:[#allocation2 + $0x68] sm:$0xfc]  ;;  %v3080_v2 = vld [vmem:[#allocation2 + $0x80] sm:$0x3]  ;;  %v3148_v12 = vrot.slane %v3089_v53, 2 }
 0x1b7   : > { %8013 = vmatprep.subr.bf16.mxu0 %v8012_v25  ;;  %v3119_v25 = vrot.slane %v3073_v0, 2  ;;  %v3131_v20 = vrot.slane %v3080_v2, 2  ;;  %v6216_v0 = vld [vmem:[%s9214_s26 + $0x1638] sm:$0xff]  ;;  %v5982_v53 = vld [vmem:[%s9214_s26 + $0xf28] sm:$0xff] }
 0x1b9   : > { %7807 = vmatpush3.bf16.msra.mxu1 %v7806_v16  ;;  %v5953_v16 = vld [vmem:[%s9214_s26 + $0xe80] sm:$0xff]  ;;  %v10192_v24 = vsel %vm1449_vm4, %v3118_v29, %v3119_v25  ;;  %v5968_v25 = vld [vmem:[%s9214_s26 + $0xef8] sm:$0xff] }
 0x1ba   : > { %8015 = vmatpush1.bf16.msra.mxu0 %v8014_v17  ;;  %7809 = vmatprep.subr.bf16.mxu1 %v7808_v52  ;;  %v5956_v17 = vld [vmem:[%s9214_s26 + $0xe98] sm:$0xff]  ;;  %v3130_v52 = vrot.slane %v3077_v33, 2  ;;  %v8808_v33 = vld [vmem:[#allocation2 + $0x60] sm:$0xff] }
 0x1bb   : > { %8017 = vmatprep.subr.bf16.mxu0 %v8016_v23  ;;  %v3083_v23 = vld [vmem:[#allocation2 + $0x98] sm:$0xfc]  ;;  %v5965_v29 = vld [vmem:[%s9214_s26 + $0xee0] sm:$0xff] }
 0x1bc   : > { %v3139_v46 = vrot.slane %v3083_v23, 2  ;;  %v7832_v23 = vpack.c.bf16 %v5968_v25, %v5965_v29  ;;  %v3078_v25 = vld [vmem:[#allocation2 + $0x70] sm:$0xfc] }
 0x1bd   : > { %7811 = vmatpush3.bf16.msra.mxu1 %v7810_v31  ;;  %v6207_v31 = vld [vmem:[%s9214_s26 + $0x15f0] sm:$0xff] }
 0x1be   : > { %8019 = vmatpush1.bf16.msra.mxu0 %v8018_v36  ;;  %7813 = vmatprep.subr.bf16.mxu1 %v7812_v37  ;;  %v7824_v36 = vpack.c.bf16 %v5956_v17, %v5953_v16  ;;  %v6210_v37 = vld [vmem:[%s9214_s26 + $0x1608] sm:$0xff]  ;;  %v10211_v2 = vsel %vm1449_vm4, %v3139_v46, %v3140_v51  ;;  %v8809_v16 = vld [vmem:[#allocation2 + $0x98] sm:$0xff] }
 0x1bf   : > { %8021 = vmatprep.subr.bf16.mxu0 %v8020_v41  ;;  %v10197_v41 = vsel %vm1449_vm4, %v3130_v52, %v3131_v20  ;;  %v8034_v55 = vpack.c.bf16 %v6210_v37, %v6207_v31  ;;  %v8038_v52 = vpack.c.bf16 %v6216_v0, %v6213_v26  ;;  %v3145_v20 = vrot.slane %v3088_v19, 2  ;;  %v8810_v31 = vld [vmem:[#allocation2 + $0x90] sm:$0xff]  ;;  %v8811_v46 = vld [vmem:[#allocation2 + $0xc8] sm:$0xff]  ;;  %v6036_v0 = vld [vmem:[%s9214_s26 + $0x10d8] sm:$0xff] }
 0x1c0   : > { %v8040_v37 = vpack.c.bf16 %v6223_v61, %v6220_v15  ;;  %v8092_v19 = vpack.c.bf16 %v6237_v45, %v6234_v44 }
 0x1c1   : > { %7815 = vmatpush3.bf16.msra.mxu1 %v7814_v6  ;;  %v6214_v6 = vld [vmem:[%s9214_s26 + $0x1628] sm:$0xff] }
 0x1c2   : > { %8023 = vmatpush1.bf16.msra.mxu0 %v8022_v56  ;;  %7817 = vmatprep.subr.bf16.mxu1 %v7816_v54  ;;  %v3092_v56 = vld [vmem:[#allocation2 + $0xe0] sm:$0x3]  ;;  %v8807_v54 = vld [vmem:[#allocation2 + $0x68] sm:$0xff] }
 0x1c3   : > { %8025 = vmatprep.subr.bf16.mxu0 %v8024_v59  ;;  %v3137_v59 = vrot.slane %v3085_v38, 2  ;;  %v6027_v38 = vld [vmem:[%s9214_s26 + $0x1090] sm:$0xff] }
 0x1c5   : > { %7819 = vmatpush3.bf16.msra.mxu1 %v7818_v1  ;;  %v3091_v1 = vld [vmem:[#allocation2 + $0xd8] sm:$0x3]  ;;  %v10221_v17 = vsel %vm1449_vm4, %v3136_v49, %v3137_v59 }
 0x1c6   : > { %8027 = vmatpush1.bf16.msra.mxu0 %v8026_v7  ;;  %7821 = vmatprep.subr.bf16.mxu1 %v7820_v9  ;;  %v8036_v7 = vpack.c.bf16 %v6217_v11, %v6214_v6  ;;  %v3146_v21 = vrot.slane %v3091_v1, 2  ;;  %v8042_v6 = vpack.c.bf16 %v6222_v10, %v6219_v48  ;;  %v5979_v11 = vld [vmem:[%s9214_s26 + $0xf10] sm:$0xff]  ;;  %v6236_v59 = vld [vmem:[%s9214_s26 + $0x1698] sm:$0xff] }
 0x1c7   : > { %8029 = vmatprep.subr.bf16.mxu0 %v8028_v50  ;;  %v3149_v50 = vrot.slane %v3092_v56, 2  ;;  %v3124_v56 = vrot.slane %v3072_v30, 2  ;;  %v6042_v30 = vld [vmem:[%s9214_s26 + $0x1108] sm:$0xff] }
 0x1c8   : > { %2372 = vmatmul.mubr.f32.vlgmr.msra.gmra.mrb[36].mxu1 %v8806_v28  ;;  %v6030_v28 = vld [vmem:[%s9214_s26 + $0x10a8] sm:$0xff]  ;;  %v10237_v51 = vsel %vm1449_vm4, %v3145_v20, %v3146_v21  ;;  %v5988_v20 = vld [vmem:[%s9214_s26 + $0xf58] sm:$0xff]  ;;  %v6239_v21 = vld [vmem:[%s9214_s26 + $0x16b0] sm:$0xff] }
 0x1c9   : > { %7823 = vmatpush3.bf16.msra.mxu1 %v7820_v9  ;;  %3356 = vmatmul.mubr.f32.vlgmr.msra.gmra.mrb[0].mxu0 %v10192_v24  ;;  %v7916_v49 = vpack.c.bf16 %v6030_v28, %v6027_v38  ;;  %v3133_v38 = vrot.slane %v3078_v25, 2 }
 0x1ca   : > { %8031 = vmatpush1.bf16.msra.mxu0 %v8030_v22  ;;  %2376 = vmatprep.mubr.f32.mxu1 %v8807_v54  ;;  %v3125_v54 = vrot.slane %v3075_v32, 2  ;;  %v8814_v32 = vld [vmem:[#allocation2 + $0x70] sm:$0xff] }
 0x1cb   : > { %7825 = vmatprep.subr.bf16.mxu1 %v7824_v36  ;;  %3361 = vmatprep.mubr.f32.mxu0 %v10197_v41  ;;  %v6654_v62 = vpop.f32.mrb[8].mxu1 }
 0x1cc   : > { %2377 = vmatmul.mubr.f32.gmra.mrb[38].mxu1 %v8808_v33  ;;  %8033 = vmatprep.subr.bf16.mxu0 %v8032_v57  ;;  %v6655_v9 = vpop.f32.mrb[9].mxu1  ;;  %v6240_v33 = vld [vmem:[%s9214_s26 + $0x16b8] sm:$0xff]  ;;  %v10253_v15 = vsel %vm1449_vm4, %v3124_v56, %v3125_v54  ;;  %v5991_v56 = vld [vmem:[%s9214_s26 + $0xf70] sm:$0xff]  ;;  %v5994_v54 = vld [vmem:[%s9214_s26 + $0xf88] sm:$0xff] }
 0x1cd   : > { %7827 = vmatpush3.bf16.msra.mxu1 %v7824_v36  ;;  %3362 = vmatmul.mubr.f32.gmra.mrb[2].mxu0 %v10205_v4  ;;  %v10216_v13 = vadd.f32 %v6655_v9, %v6654_v62  ;;  %v10227_v36 = vsel %vm1449_vm4, %v3148_v12, %v3149_v50  ;;  %v8812_v62 = vld [vmem:[#allocation2 + $0xc0] sm:$0xff]  ;;  %v7918_v9 = vpack.c.bf16 %v5982_v53, %v5979_v11  ;;  %v3081_v12 = vld [vmem:[#allocation2 + $0x88] sm:$0x3] }
 0x1ce   : > { %8035 = vmatpush1.bf16.msra.mxu0 %v8034_v55  ;;  %2381 = vmatprep.mubr.f32.mxu1 %v8809_v16  ;;  %v6233_v55 = vld [vmem:[%s9214_s26 + $0x1680] sm:$0xff]  ;;  %v3134_v28 = vrot.slane %v3081_v12, 2  ;;  %v7926_v25 = vpack.c.bf16 %v5994_v54, %v5991_v56  ;;  %v3090_v12 = vld [vmem:[#allocation2 + $0xd0] sm:$0xfc]  ;;  %v6060_v54 = vld [vmem:[%s9214_s26 + $0x1198] sm:$0xff] }
 0x1cf   : > { %7829 = vmatprep.subr.bf16.mxu1 %v7828_v14  ;;  %3367 = vmatprep.mubr.f32.mxu0 %v10211_v2  ;;  %v6657_v22 = vpop.f32.mrb[10].mxu1  ;;  %v8813_v50 = vld [vmem:[#allocation2 + $0x40] sm:$0xff]  ;;  %v8094_v61 = vpack.c.bf16 %v6236_v59, %v6233_v55  ;;  %v6248_v59 = vld [vmem:[%s9214_s26 + $0x16f8] sm:$0xff] }
 0x1d0   : > { %2382 = vmatmul.mubr.f32.gmra.mrb[40].mxu1 %v8810_v31  ;;  %8037 = vmatprep.subr.bf16.mxu0 %v8036_v7  ;;  %v6658_v5 = vpop.f32.mrb[11].mxu1  ;;  %v6243_v7 = vld [vmem:[%s9214_s26 + $0x16d0] sm:$0xff]  ;;  %v6245_v55 = vld [vmem:[%s9214_s26 + $0x16e0] sm:$0xff] }
 0x1d1   : > { %7831 = vmatpush3.bf16.msra.mxu1 %v7828_v14  ;;  %3368 = vmatmul.mubr.f32.gmra.mrb[4].mxu0 %v10221_v17  ;;  %v10232_v57 = vadd.f32 %v6658_v5, %v6657_v22  ;;  %v6033_v14 = vld [vmem:[%s9214_s26 + $0x10c0] sm:$0xff]  ;;  %v8096_v48 = vpack.c.bf16 %v6243_v7, %v6240_v33  ;;  %v6039_v22 = vld [vmem:[%s9214_s26 + $0x10f0] sm:$0xff]  ;;  %v10281_v33 = vsel %vm1449_vm4, %v3133_v38, %v3134_v28 }
 0x1d2   : > { %8039 = vmatpush1.bf16.msra.mxu0 %v8038_v52  ;;  %2386 = vmatprep.mubr.f32.mxu1 %v8811_v46  ;;  %v7920_v16 = vpack.c.bf16 %v6036_v0, %v6033_v14  ;;  %v5985_v52 = vld [vmem:[%s9214_s26 + $0xf40] sm:$0xff]  ;;  %v7924_v53 = vpack.c.bf16 %v6042_v30, %v6039_v22  ;;  %v6048_v14 = vld [vmem:[%s9214_s26 + $0x1138] sm:$0xff]  ;;  %v6054_v22 = vld [vmem:[%s9214_s26 + $0x1168] sm:$0xff] }
 0x1d3   : > { %7833 = vmatprep.subr.bf16.mxu1 %v7832_v23  ;;  %3373 = vmatprep.mubr.f32.mxu0 %v10227_v36  ;;  %v6660_v26 = vpop.f32.mrb[12].mxu1  ;;  %v6249_v5 = vld [vmem:[%s9214_s26 + $0x1700] sm:$0xff]  ;;  %v7922_v44 = vpack.c.bf16 %v5988_v20, %v5985_v52  ;;  %v6000_v20 = vld [vmem:[%s9214_s26 + $0xfb8] sm:$0xff] }
 0x1d4   : > { %2387 = vmatmul.mubr.f32.gmra.mrb[42].mxu1 %v8812_v62  ;;  %8041 = vmatprep.subr.bf16.mxu0 %v8040_v37  ;;  %v6661_v1 = vpop.f32.mrb[13].mxu1  ;;  %v6246_v37 = vld [vmem:[%s9214_s26 + $0x16e8] sm:$0xff]  ;;  %v3084_v46 = vld [vmem:[#allocation2 + $0xa0] sm:$0xfc]  ;;  %v6252_v62 = vld [vmem:[%s9214_s26 + $0x1718] sm:$0xff] }
 0x1d5   : > { %7835 = vmatpush3.bf16.msra.mxu1 %v7832_v23  ;;  %3374 = vmatmul.mubr.f32.gmra.mrb[6].mxu0 %v10237_v51  ;;  %v10249_v29 = vadd.f32 %v6661_v1, %v6660_v26  ;;  %v6242_v23 = vld [vmem:[%s9214_s26 + $0x16c8] sm:$0xff]  ;;  %v6045_v26 = vld [vmem:[%s9214_s26 + $0x1120] sm:$0xff]  ;;  %v8816_v1 = vld [vmem:[#allocation2 + $0xd0] sm:$0xff]  ;;  %v3142_v7 = vrot.slane %v3084_v46, 2 }
 0x1d6   : > { %8043 = vmatpush1.bf16.msra.mxu0 %v8042_v6  ;;  %7208 = vmatprep.mubr.msk.f32.mxu1 %vm684_vm2, %v8813_v50  ;;  %v3087_v6 = vld [vmem:[#allocation2 + $0xb8] sm:$0x3]  ;;  %v8098_v11 = vpack.c.bf16 %v6242_v23, %v6239_v21  ;;  %v8815_v0 = vld [vmem:[#allocation2 + $0xa0] sm:$0xff]  ;;  %v3093_v50 = vld [vmem:[#allocation2 + $0xe8] sm:$0x3] }
 0x1d7   : > { %7917 = vmatprep.subr.bf16.mxu1 %v7916_v49  ;;  %3444 = vmatprep.mubr.f32.mxu0 %v9009_v43  ;;  %v6663_v10 = vpop.f32.mrb[14].mxu1  ;;  %v8100_v49 = vpack.c.bf16 %v6249_v5, %v6246_v37  ;;  %v5997_v52 = vld [vmem:[%s9214_s26 + $0xfa0] sm:$0xff]  ;;  %v6251_v21 = vld [vmem:[%s9214_s26 + $0x1710] sm:$0xff]  ;;  %v6254_v23 = vld [vmem:[%s9214_s26 + $0x1728] sm:$0xff]  ;;  %v3152_v37 = vrot.slane %v3093_v50, 2 }
 0x1d8   : > { %8093 = vmatprep.subr.bf16.mxu0 %v8092_v19  ;;  %7209 = vmatmul.mubr.msk.f32.vlgmr.msra.gmra.mrb[16].mxu1 %vm684_vm2, %v8814_v32  ;;  %v6664_v31 = vpop.f32.mrb[15].mxu1  ;;  %v6255_v19 = vld [vmem:[%s9214_s26 + $0x1730] sm:$0xff]  ;;  %v6261_v30 = vld [vmem:[%s9214_s26 + $0x1760] sm:$0xff]  ;;  %v7930_v5 = vpack.c.bf16 %v6000_v20, %v5997_v52  ;;  %v8106_v38 = vpack.c.bf16 %v6254_v23, %v6251_v21  ;;  %v6006_v46 = vld [vmem:[%s9214_s26 + $0xfe8] sm:$0xff] }
 0x1d9   : > { %7919 = vmatpush3.bf16.msra.mxu1 %v7918_v9  ;;  %6225 = vmatmul.mubr.msk.f32.vlgmr.msra.gmra.mrb[0].mxu0 %vm684_vm2, %v10253_v15  ;;  %v10267_v45 = vadd.f32 %v6664_v31, %v6663_v10  ;;  %v3143_v9 = vrot.slane %v3087_v6, 2  ;;  %v6051_v10 = vld [vmem:[%s9214_s26 + $0x1150] sm:$0xff]  ;;  %v3151_v31 = vrot.slane %v3090_v12, 2  ;;  %v6257_v6 = vld [vmem:[%s9214_s26 + $0x1740] sm:$0xff]  ;;  %v6066_v50 = vld [vmem:[%s9214_s26 + $0x11c8] sm:$0xff] }
 0x1da   : > { %8095 = vmatpush1.bf16.msra.mxu0 %v8094_v61  ;;  %7921 = vmatprep.subr.bf16.mxu1 %v7920_v16  ;;  %v8102_v61 = vpack.c.bf16 %v6248_v59, %v6245_v55  ;;  %v7928_v16 = vpack.c.bf16 %v6048_v14, %v6045_v26  ;;  %v7932_v28 = vpack.c.bf16 %v6054_v22, %v6051_v10  ;;  %v6057_v56 = vld [vmem:[%s9214_s26 + $0x1180] sm:$0xff]  ;;  %v6264_v55 = vld [vmem:[%s9214_s26 + $0x1778] sm:$0xff]  ;;  %v10312_v14 = vld [vmem:[#allocation2 + $0x68] sm:$0xff] }
 0x1db   : > { %8097 = vmatprep.subr.bf16.mxu0 %v8096_v48  ;;  %7211 = vmatprep.mubr.msk.f32.mxu1 %vm684_vm2, %v8815_v0  ;;  %v8104_v48 = vpack.c.bf16 %v6255_v19, %v6252_v62  ;;  %v10296_v32 = vsel %vm1449_vm4, %v3142_v7, %v3143_v9  ;;  %v10310_v59 = vsel %vm1449_vm4, %v3151_v31, %v3152_v37  ;;  %v6009_v19 = vld [vmem:[%s9214_s26 + $0x1000] sm:$0xff]  ;;  %v6263_v7 = vld [vmem:[%s9214_s26 + $0x1770] sm:$0xff]  ;;  %v6018_v23 = vld [vmem:[%s9214_s26 + $0x1048] sm:$0xff] }
 0x1dc   : > { %7212 = vmatmul.mubr.msk.f32.gmra.mrb[18].mxu1 %vm684_vm2, %v8816_v1  ;;  %3450 = vmatprep.mubr.f32.mxu0 %v9009_v43  ;;  %v7936_v62 = vpack.c.bf16 %v6060_v54, %v6057_v56  ;;  %v6012_v1 = vld [vmem:[%s9214_s26 + $0x1018] sm:$0xff]  ;;  %v6063_v12 = vld [vmem:[%s9214_s26 + $0x11b0] sm:$0xff]  ;;  %v6269_v10 = vld [vmem:[%s9214_s26 + $0x17a0] sm:$0xff] }
 0x1dd   : > { %7923 = vmatpush3.bf16.msra.mxu1 %v7922_v44  ;;  %2952 = vmatprep.mubr.f32.mxu1 %v9856_v3  ;;  %v6258_v3 = vld [vmem:[%s9214_s26 + $0x1748] sm:$0xff]  ;;  %v6003_v44 = vld [vmem:[%s9214_s26 + $0xfd0] sm:$0xff]  ;;  %v7938_v52 = vpack.c.bf16 %v6012_v1, %v6009_v19  ;;  %v7940_v21 = vpack.c.bf16 %v6066_v50, %v6063_v12  ;;  %v6072_v31 = vld [vmem:[%s9214_s26 + $0x11f8] sm:$0xff] }
 0x1de   : > { %8099 = vmatpush1.bf16.msra.mxu0 %v8098_v11  ;;  %7925 = vmatprep.subr.bf16.mxu1 %v7924_v53  ;;  %v8108_v11 = vpack.c.bf16 %v6261_v30, %v6258_v3  ;;  %v6260_v53 = vld [vmem:[%s9214_s26 + $0x1758] sm:$0xff]  ;;  %v7934_v26 = vpack.c.bf16 %v6006_v46, %v6003_v44  ;;  %v6069_v30 = vld [vmem:[%s9214_s26 + $0x11e0] sm:$0xff]  ;;  %v6278_v56 = vld [vmem:[%s9214_s26 + $0x17e8] sm:$0xff] }
 0x1df   : > { %8101 = vmatprep.subr.bf16.mxu0 %v8100_v49  ;;  %6226 = vmatmul.mubr.msk.f32.gmra.mrb[2].mxu0 %vm684_vm2, %v10281_v33  ;;  %v6267_v49 = vld [vmem:[%s9214_s26 + $0x1790] sm:$0xff]  ;;  %v8110_v0 = vpack.c.bf16 %v6260_v53, %v6257_v6  ;;  %v6272_v3 = vld [vmem:[%s9214_s26 + $0x17b8] sm:$0xff]  ;;  %v7944_v44 = vpack.c.bf16 %v6072_v31, %v6069_v30  ;;  %v6021_v46 = vld [vmem:[%s9214_s26 + $0x1060] sm:$0xff] }
 0x1e0   : > { %3456 = vmatprep.mubr.f32.mxu0 %v9009_v43  ;;  %v8112_v9 = vpack.c.bf16 %v6267_v49, %v6264_v55  ;;  %v6276_v37 = vld [vmem:[%s9214_s26 + $0x17d8] sm:$0xff]  ;;  %v6075_v54 = vld [vmem:[%s9214_s26 + $0x1210] sm:$0xff]  ;;  %v6078_v55 = vld [vmem:[%s9214_s26 + $0x1228] sm:$0xff] }
 0x1e1   : > { %7927 = vmatpush3.bf16.msra.mxu1 %v7926_v25  ;;  %v6266_v25 = vld [vmem:[%s9214_s26 + $0x1788] sm:$0xff]  ;;  %v6024_v6 = vld [vmem:[%s9214_s26 + $0x1078] sm:$0xff]  ;;  %v7948_v19 = vpack.c.bf16 %v6078_v55, %v6075_v54  ;;  %v6281_v1 = vld [vmem:[%s9214_s26 + $0x1800] sm:$0xff] }
 0x1e2   : > { %8103 = vmatpush1.bf16.msra.mxu0 %v8102_v61  ;;  %7929 = vmatprep.subr.bf16.mxu1 %v7928_v16  ;;  %v6270_v61 = vld [vmem:[%s9214_s26 + $0x17a8] sm:$0xff]  ;;  %v6273_v16 = vld [vmem:[%s9214_s26 + $0x17c0] sm:$0xff]  ;;  %v8114_v20 = vpack.c.bf16 %v6266_v25, %v6263_v7  ;;  %v6084_v12 = vld [vmem:[%s9214_s26 + $0x1258] sm:$0xff] }
 0x1e3   : > { %8105 = vmatprep.subr.bf16.mxu0 %v8104_v48  ;;  %6227 = vmatmul.mubr.msk.f32.gmra.mrb[4].mxu0 %vm684_vm2, %v10296_v32  ;;  %v6015_v48 = vld [vmem:[%s9214_s26 + $0x1030] sm:$0xff]  ;;  %v8116_v22 = vpack.c.bf16 %v6273_v16, %v6270_v61  ;;  %v6282_v49 = vld [vmem:[%s9214_s26 + $0x1808] sm:$0xff]  ;;  %v6081_v25 = vld [vmem:[%s9214_s26 + $0x1240] sm:$0xff] }
 0x1e4   : > { %3462 = vmatprep.mubr.f32.mxu0 %v9009_v43  ;;  %v6288_v50 = vld [vmem:[%s9214_s26 + $0x1838] sm:$0xff]  ;;  %v6291_v61 = vld [vmem:[%s9214_s26 + $0x1850] sm:$0xff]  ;;  %v6306_v55 = vld [vmem:[%s9214_s26 + $0x18c8] sm:$0xff] }
 0x1e5   : > { %7931 = vmatpush3.bf16.msra.mxu1 %v7930_v5  ;;  %v6279_v5 = vld [vmem:[%s9214_s26 + $0x17f0] sm:$0xff] }
 0x1e6   : > { %8107 = vmatpush1.bf16.msra.mxu0 %v8106_v38  ;;  %7933 = vmatprep.subr.bf16.mxu1 %v7932_v28  ;;  %v7942_v38 = vpack.c.bf16 %v6018_v23, %v6015_v48  ;;  %v8118_v28 = vpack.c.bf16 %v6272_v3, %v6269_v10  ;;  %v8120_v53 = vpack.c.bf16 %v6279_v5, %v6276_v37  ;;  %v6290_v48 = vld [vmem:[%s9214_s26 + $0x1848] sm:$0xff]  ;;  %v6087_v23 = vld [vmem:[%s9214_s26 + $0x1270] sm:$0xff]  ;;  %v6297_v3 = vld [vmem:[%s9214_s26 + $0x1880] sm:$0xff] }
 0x1e7   : > { %8109 = vmatprep.subr.bf16.mxu0 %v8108_v11  ;;  %6228 = vmatmul.mubr.msk.f32.gmra.mrb[6].mxu0 %vm684_vm2, %v10310_v59  ;;  %v6275_v11 = vld [vmem:[%s9214_s26 + $0x17d0] sm:$0xff]  ;;  %v6090_v10 = vld [vmem:[%s9214_s26 + $0x1288] sm:$0xff]  ;;  %v6293_v37 = vld [vmem:[%s9214_s26 + $0x1860] sm:$0xff] }
 0x1e8   : > { %3861 = vmatprep.mubr.f32.mxu0 %v10312_v14  ;;  %v7956_v31 = vpack.c.bf16 %v6090_v10, %v6087_v23  ;;  %v6155_v54 = vld [vmem:[%s9214_s26 + $0x1450] sm:$0xff]  ;;  %v6170_v23 = vld [vmem:[%s9214_s26 + $0x14c8] sm:$0xff]  ;;  %v6321_v10 = vld [vmem:[%s9214_s26 + $0x1940] sm:$0xff] }
 0x1e9   : > { %7935 = vmatpush3.bf16.msra.mxu1 %v7934_v26  ;;  %v6285_v26 = vld [vmem:[%s9214_s26 + $0x1820] sm:$0xff] }
 0x1ea   : > { %8111 = vmatpush1.bf16.msra.mxu0 %v8110_v0  ;;  %7937 = vmatprep.subr.bf16.mxu1 %v7936_v62  ;;  %v7946_v0 = vpack.c.bf16 %v6024_v6, %v6021_v46  ;;  %v8122_v62 = vpack.c.bf16 %v6278_v56, %v6275_v11  ;;  %v8124_v7 = vpack.c.bf16 %v6285_v26, %v6282_v49  ;;  %v6299_v11 = vld [vmem:[%s9214_s26 + $0x1890] sm:$0xff]  ;;  %v6302_v56 = vld [vmem:[%s9214_s26 + $0x18a8] sm:$0xff] }
 0x1eb   : > { %8113 = vmatprep.subr.bf16.mxu0 %v8112_v9  ;;  %v6284_v9 = vld [vmem:[%s9214_s26 + $0x1818] sm:$0xff]  ;;  %v8138_v49 = vpack.c.bf16 %v6302_v56, %v6299_v11  ;;  %v6125_v11 = vld [vmem:[%s9214_s26 + $0x1360] sm:$0xff]  ;;  %v6323_v56 = vld [vmem:[%s9214_s26 + $0x1950] sm:$0xff] }
 0x1ec   : > { %v8126_v16 = vpack.c.bf16 %v6284_v9, %v6281_v1  ;;  %v6164_v9 = vld [vmem:[%s9214_s26 + $0x1498] sm:$0xff] }
 0x1ed   : > { %7939 = vmatpush3.bf16.msra.mxu1 %v7938_v52  ;;  %v7952_v52 = vpack.c.bf16 %v6084_v12, %v6081_v25  ;;  %v6315_v25 = vld [vmem:[%s9214_s26 + $0x1910] sm:$0xff] }
 0x1ee   : > { %8115 = vmatpush1.bf16.msra.mxu0 %v8114_v20  ;;  %7941 = vmatprep.subr.bf16.mxu1 %v7940_v21  ;;  %v6287_v20 = vld [vmem:[%s9214_s26 + $0x1830] sm:$0xff]  ;;  %v8128_v21 = vpack.c.bf16 %v6291_v61, %v6288_v50 }
 0x1ef   : > { %8117 = vmatprep.subr.bf16.mxu0 %v8116_v22  ;;  %v6294_v22 = vld [vmem:[%s9214_s26 + $0x1868] sm:$0xff]  ;;  %v8130_v30 = vpack.c.bf16 %v6290_v48, %v6287_v20  ;;  %v6311_v20 = vld [vmem:[%s9214_s26 + $0x18f0] sm:$0xff] }
 0x1f0   : > { %v8132_v5 = vpack.c.bf16 %v6297_v3, %v6294_v22  ;;  %v6167_v48 = vld [vmem:[%s9214_s26 + $0x14b0] sm:$0xff] }
 0x1f1   : > { %7943 = vmatpush3.bf16.msra.mxu1 %v7942_v38  ;;  %v6296_v38 = vld [vmem:[%s9214_s26 + $0x1878] sm:$0xff] }
 0x1f2   : > { %8119 = vmatpush1.bf16.msra.mxu0 %v8118_v28  ;;  %7945 = vmatprep.subr.bf16.mxu1 %v7944_v44  ;;  %v6093_v28 = vld [vmem:[%s9214_s26 + $0x12a0] sm:$0xff]  ;;  %v6300_v44 = vld [vmem:[%s9214_s26 + $0x1898] sm:$0xff]  ;;  %v8134_v46 = vpack.c.bf16 %v6296_v38, %v6293_v37  ;;  %v6122_v37 = vld [vmem:[%s9214_s26 + $0x1348] sm:$0xff] }
 0x1f3   : > { %8121 = vmatprep.subr.bf16.mxu0 %v8120_v53  ;;  %v6320_v38 = vld [vmem:[%s9214_s26 + $0x1938] sm:$0xff] }
 0x1f5   : > { %7947 = vmatpush3.bf16.msra.mxu1 %v7946_v0  ;;  %v6107_v0 = vld [vmem:[%s9214_s26 + $0x12d0] sm:$0xff] }
 0x1f6   : > { %8123 = vmatpush1.bf16.msra.mxu0 %v8122_v62  ;;  %7949 = vmatprep.subr.bf16.mxu1 %v7948_v19  ;;  %v6110_v62 = vld [vmem:[%s9214_s26 + $0x12e8] sm:$0xff] }
 0x1f7   : > { %8125 = vmatprep.subr.bf16.mxu0 %v8124_v7  ;;  %v6161_v7 = vld [vmem:[%s9214_s26 + $0x1480] sm:$0xff]  ;;  %v8046_v12 = vpack.c.bf16 %v6110_v62, %v6107_v0  ;;  %v6131_v62 = vld [vmem:[%s9214_s26 + $0x1390] sm:$0xff] }
 0x1f8   : > { %2953 = vmatmul.mubr.f32.vlgmr.msra.gmra.mrb[44].mxu1 %v9969_v40  ;;  %v6096_v40 = vld [vmem:[%s9214_s26 + $0x12b8] sm:$0xff]  ;;  %v8048_v61 = vpack.c.bf16 %v6164_v9, %v6161_v7  ;;  %v6185_v9 = vld [vmem:[%s9214_s26 + $0x1540] sm:$0xff] }
 0x1f9   : > { %7951 = vmatpush3.bf16.msra.mxu1 %v7948_v19  ;;  %2957 = vmatprep.mubr.f32.mxu1 %v9977_v39  ;;  %v6303_v39 = vld [vmem:[%s9214_s26 + $0x18b0] sm:$0xff]  ;;  %v7960_v6 = vpack.c.bf16 %v6096_v40, %v6093_v28  ;;  %v6305_v19 = vld [vmem:[%s9214_s26 + $0x18c0] sm:$0xff]  ;;  %v6176_v40 = vld [vmem:[%s9214_s26 + $0x14f8] sm:$0xff] }
 0x1fa   : > { %8127 = vmatpush1.bf16.msra.mxu0 %v8126_v16  ;;  %7953 = vmatprep.subr.bf16.mxu1 %v7952_v52  ;;  %v8136_v53 = vpack.c.bf16 %v6303_v39, %v6300_v44  ;;  %v6113_v16 = vld [vmem:[%s9214_s26 + $0x1300] sm:$0xff]  ;;  %v6324_v44 = vld [vmem:[%s9214_s26 + $0x1958] sm:$0xff]  ;;  %v6327_v39 = vld [vmem:[%s9214_s26 + $0x1970] sm:$0xff] }
 0x1fb   : > { %8129 = vmatprep.subr.bf16.mxu0 %v8128_v21  ;;  %v6314_v21 = vld [vmem:[%s9214_s26 + $0x1908] sm:$0xff]  ;;  %v6173_v28 = vld [vmem:[%s9214_s26 + $0x14e0] sm:$0xff]  ;;  %v6332_v7 = vld [vmem:[%s9214_s26 + $0x1998] sm:$0xff] }
 0x1fc   : > { %2958 = vmatmul.mubr.f32.gmra.mrb[46].mxu1 %v9985_v58  ;;  %v6158_v58 = vld [vmem:[%s9214_s26 + $0x1468] sm:$0xff]  ;;  %v8146_v3 = vpack.c.bf16 %v6314_v21, %v6311_v20  ;;  %v6137_v20 = vld [vmem:[%s9214_s26 + $0x13c0] sm:$0xff]  ;;  %v6335_v21 = vld [vmem:[%s9214_s26 + $0x19b0] sm:$0xff] }
 0x1fd   : > { %7955 = vmatpush3.bf16.msra.mxu1 %v7952_v52  ;;  %2962 = vmatprep.mubr.f32.mxu1 %v9993_v27  ;;  %v6309_v27 = vld [vmem:[%s9214_s26 + $0x18e0] sm:$0xff]  ;;  %v8044_v26 = vpack.c.bf16 %v6158_v58, %v6155_v54  ;;  %v6116_v52 = vld [vmem:[%s9214_s26 + $0x1318] sm:$0xff]  ;;  %v8152_v54 = vpack.c.bf16 %v6327_v39, %v6324_v44  ;;  %v6326_v58 = vld [vmem:[%s9214_s26 + $0x1968] sm:$0xff] }
 0x1fe   : > { %8131 = vmatpush1.bf16.msra.mxu0 %v8130_v30  ;;  %7957 = vmatprep.subr.bf16.mxu1 %v7956_v31  ;;  %v8140_v1 = vpack.c.bf16 %v6309_v27, %v6306_v55  ;;  %v8050_v22 = vpack.c.bf16 %v6116_v52, %v6113_v16  ;;  %v8052_v30 = vpack.c.bf16 %v6170_v23, %v6167_v48  ;;  %v6182_v55 = vld [vmem:[%s9214_s26 + $0x1528] sm:$0xff] }
 0x1ff   : > { %8133 = vmatprep.subr.bf16.mxu0 %v8132_v5  ;;  %v6317_v5 = vld [vmem:[%s9214_s26 + $0x1920] sm:$0xff]  ;;  %v6330_v27 = vld [vmem:[%s9214_s26 + $0x1988] sm:$0xff] }
 0x200   : > { %2963 = vmatmul.mubr.f32.gmra.mrb[48].mxu1 %v10002_v8  ;;  %v6308_v8 = vld [vmem:[%s9214_s26 + $0x18d8] sm:$0xff]  ;;  %v6338_v23 = vld [vmem:[%s9214_s26 + $0x19c8] sm:$0xff] }
 0x201   : > { %7959 = vmatpush3.bf16.msra.mxu1 %v7956_v31  ;;  %2967 = vmatprep.mubr.f32.mxu1 %v10010_v34  ;;  %v6312_v34 = vld [vmem:[%s9214_s26 + $0x18f8] sm:$0xff]  ;;  %v8142_v50 = vpack.c.bf16 %v6308_v8, %v6305_v19  ;;  %v6119_v31 = vld [vmem:[%s9214_s26 + $0x1330] sm:$0xff]  ;;  %v6134_v19 = vld [vmem:[%s9214_s26 + $0x13a8] sm:$0xff] }
 0x202   : > { %8135 = vmatpush1.bf16.msra.mxu0 %v8134_v46  ;;  %7961 = vmatprep.subr.bf16.mxu1 %v7960_v6  ;;  %v8150_v46 = vpack.c.bf16 %v6320_v38, %v6317_v5  ;;  %v8162_v5 = vpack.c.bf16 %v6338_v23, %v6335_v21  ;;  %v6143_v38 = vld [vmem:[%s9214_s26 + $0x13f0] sm:$0xff]  ;;  %v6361_v21 = vld [vmem:[%s9214_s26 + $0x1a40] sm:$0xff] }
 0x203   : > { %8137 = vmatprep.subr.bf16.mxu0 %v8136_v53  ;;  %v6128_v53 = vld [vmem:[%s9214_s26 + $0x1378] sm:$0xff]  ;;  %v6209_v23 = vld [vmem:[%s9214_s26 + $0x1600] sm:$0xff] }
 0x204   : > { %2968 = vmatmul.mubr.f32.gmra.mrb[50].mxu1 %v10019_v42  ;;  %v8144_v42 = vpack.c.bf16 %v6315_v25, %v6312_v34  ;;  %v6188_v34 = vld [vmem:[%s9214_s26 + $0x1558] sm:$0xff] }
 0x205   : > { %7963 = vmatpush3.bf16.msra.mxu1 %v7960_v6  ;;  %7230 = vmatprep.mubr.msk.f32.mxu1 %vm684_vm2, %v10033_v47  ;;  %v6318_v47 = vld [vmem:[%s9214_s26 + $0x1928] sm:$0xff]  ;;  %v8056_v6 = vpack.c.bf16 %v6176_v40, %v6173_v28  ;;  %v6336_v25 = vld [vmem:[%s9214_s26 + $0x19b8] sm:$0xff]  ;;  %v8064_v52 = vpack.c.bf16 %v6188_v34, %v6185_v9  ;;  %v6341_v40 = vld [vmem:[%s9214_s26 + $0x19e0] sm:$0xff] }
 0x206   : > { %8139 = vmatpush1.bf16.msra.mxu0 %v8138_v49  ;;  %8045 = vmatprep.subr.bf16.mxu1 %v8044_v26  ;;  %v8058_v49 = vpack.c.bf16 %v6128_v53, %v6125_v11  ;;  %v8154_v26 = vpack.c.bf16 %v6326_v58, %v6323_v56  ;;  %v6146_v28 = vld [vmem:[%s9214_s26 + $0x1408] sm:$0xff]  ;;  %v6348_v56 = vld [vmem:[%s9214_s26 + $0x1a18] sm:$0xff] }
 0x207   : > { %8141 = vmatprep.subr.bf16.mxu0 %v8140_v1  ;;  %v6329_v1 = vld [vmem:[%s9214_s26 + $0x1980] sm:$0xff]  ;;  %v10447_v53 = vld [vmem:[#allocation2 + $0xc8] sm:$0xff]  ;;  %v8070_v58 = vpack.c.bf16 %v6146_v28, %v6143_v38  ;;  %v10465_v9 = vld [vmem:[#allocation2 + $0xf8] sm:$0xff] }
 0x208   : > { %7231 = vmatmul.mubr.msk.f32.vlgmr.msra.gmra.mrb[16].mxu1 %vm684_vm2, %v10050_v35  ;;  %v8148_v35 = vpack.c.bf16 %v6321_v10, %v6318_v47  ;;  %v8158_v16 = vpack.c.bf16 %v6332_v7, %v6329_v1  ;;  %v6191_v47 = vld [vmem:[%s9214_s26 + $0x1570] sm:$0xff]  ;;  %v6194_v10 = vld [vmem:[%s9214_s26 + $0x1588] sm:$0xff] }
 0x209   : > { %8047 = vmatpush3.bf16.msra.mxu1 %v8046_v12  ;;  %7233 = vmatprep.mubr.msk.f32.mxu1 %vm684_vm2, %v10062_v60  ;;  %v8054_v60 = vpack.c.bf16 %v6122_v37, %v6119_v31  ;;  %v6339_v12 = vld [vmem:[%s9214_s26 + $0x19d0] sm:$0xff]  ;;  %v6362_v34 = vld [vmem:[%s9214_s26 + $0x1a48] sm:$0xff] }
 0x20a   : > { %8143 = vmatpush1.bf16.msra.mxu0 %v8142_v50  ;;  %8049 = vmatprep.subr.bf16.mxu1 %v8048_v61  ;;  %v8062_v50 = vpack.c.bf16 %v6134_v19, %v6131_v62  ;;  %v10421_v61 = vld [vmem:[#allocation2 + $0x60] sm:$0xff]  ;;  %v8160_v48 = vpack.c.bf16 %v6339_v12, %v6336_v25  ;;  %v10434_v37 = vld [vmem:[#allocation2 + $0x90] sm:$0xff]  ;;  %v6350_v19 = vld [vmem:[%s9214_s26 + $0x1a28] sm:$0xff] }
 0x20b   : > { %8145 = vmatprep.subr.bf16.mxu0 %v8144_v42  ;;  %v6140_v42 = vld [vmem:[%s9214_s26 + $0x13d8] sm:$0xff]  ;;  %v6203_v1 = vld [vmem:[%s9214_s26 + $0x15d0] sm:$0xff]  ;;  %v6365_v25 = vld [vmem:[%s9214_s26 + $0x1a60] sm:$0xff] }
 0x20c   : > { %7234 = vmatmul.mubr.msk.f32.gmra.mrb[18].mxu1 %vm684_vm2, %v10074_v18  ;;  %v6179_v18 = vld [vmem:[%s9214_s26 + $0x1510] sm:$0xff]  ;;  %v8066_v31 = vpack.c.bf16 %v6140_v42, %v6137_v20  ;;  %v8220_v42 = vpack.c.bf16 %v6365_v25, %v6362_v34  ;;  %v4161_v25 = vld [vmem:[#allocation2 + $0x80] sm:$0x1] }
 0x20d   : > { %8051 = vmatpush3.bf16.msra.mxu1 %v8050_v22  ;;  %3533 = vmatprep.mubr.f32.mxu1 %v10083_v63  ;;  %v6333_v63 = vld [vmem:[%s9214_s26 + $0x19a0] sm:$0xff]  ;;  %v8060_v0 = vpack.c.bf16 %v6182_v55, %v6179_v18  ;;  %v10429_v22 = vld [vmem:[#allocation2 + $0x98] sm:$0xff]  ;;  %v6379_v34 = vld [vmem:[%s9214_s26 + $0x1ad0] sm:$0xff] }
 0x20e   : > { %8147 = vmatpush1.bf16.msra.mxu0 %v8146_v3  ;;  %8053 = vmatprep.subr.bf16.mxu1 %v8052_v30  ;;  %v8156_v8 = vpack.c.bf16 %v6333_v63, %v6330_v27  ;;  %v6342_v3 = vld [vmem:[%s9214_s26 + $0x19e8] sm:$0xff]  ;;  %v6345_v30 = vld [vmem:[%s9214_s26 + $0x1a00] sm:$0xff] }
 0x20f   : > { %8149 = vmatprep.subr.bf16.mxu0 %v8148_v35  ;;  %v8068_v35 = vpack.c.bf16 %v6194_v10, %v6191_v47  ;;  %v8164_v39 = vpack.c.bf16 %v6345_v30, %v6342_v3  ;;  %v10452_v18 = vld [vmem:[#allocation2 + $0xc0] sm:$0xff]  ;;  %v6212_v10 = vld [vmem:[%s9214_s26 + $0x1618] sm:$0xff]  ;;  %v6371_v30 = vld [vmem:[%s9214_s26 + $0x1a90] sm:$0xff] }
 0x210   : > { %v6149_v63 = vld [vmem:[%s9214_s26 + $0x1420] sm:$0xff]  ;;  %v6368_v3 = vld [vmem:[%s9214_s26 + $0x1a78] sm:$0xff]  ;;  %v8080_v28 = vpack.c.bf16 %v6212_v10, %v6209_v23  ;;  %v4209_v10 = vrot.slane %v4161_v25, 1  ;;  %v6247_v25 = vld [vmem:[%s9214_s26 + $0x16f0] sm:$0xff] }
 0x211   : > { %8055 = vmatpush3.bf16.msra.mxu1 %v8054_v60  ;;  %v6344_v60 = vld [vmem:[%s9214_s26 + $0x19f8] sm:$0xff] }
 0x212   : > { %8151 = vmatpush1.bf16.msra.mxu0 %v8150_v46  ;;  %8057 = vmatprep.subr.bf16.mxu1 %v8056_v6  ;;  %v6197_v46 = vld [vmem:[%s9214_s26 + $0x15a0] sm:$0xff]  ;;  %v6200_v6 = vld [vmem:[%s9214_s26 + $0x15b8] sm:$0xff]  ;;  %v8166_v55 = vpack.c.bf16 %v6344_v60, %v6341_v40  ;;  %v8224_v40 = vpack.c.bf16 %v6371_v30, %v6368_v3  ;;  %v6215_v60 = vld [vmem:[%s9214_s26 + $0x1630] sm:$0xff] }
 0x213   : > { %8153 = vmatprep.subr.bf16.mxu0 %v8152_v54  ;;  %v6351_v54 = vld [vmem:[%s9214_s26 + $0x1a30] sm:$0xff]  ;;  %v8072_v27 = vpack.c.bf16 %v6200_v6, %v6197_v46  ;;  %v6218_v46 = vld [vmem:[%s9214_s26 + $0x1648] sm:$0xff] }
 0x214   : > { %v8168_v62 = vpack.c.bf16 %v6351_v54, %v6348_v56  ;;  %v6374_v56 = vld [vmem:[%s9214_s26 + $0x1aa8] sm:$0xff]  ;;  %v6377_v54 = vld [vmem:[%s9214_s26 + $0x1ac0] sm:$0xff]  ;;  %v6235_v30 = vld [vmem:[%s9214_s26 + $0x1690] sm:$0xff] }
 0x215   : > { %8059 = vmatpush3.bf16.msra.mxu1 %v8058_v49  ;;  %v6152_v49 = vld [vmem:[%s9214_s26 + $0x1438] sm:$0xff] }
 0x216   : > { %8155 = vmatpush1.bf16.msra.mxu0 %v8154_v26  ;;  %8061 = vmatprep.subr.bf16.mxu1 %v8060_v0  ;;  %v6347_v26 = vld [vmem:[%s9214_s26 + $0x1a10] sm:$0xff]  ;;  %v8074_v12 = vpack.c.bf16 %v6152_v49, %v6149_v63  ;;  %v8228_v63 = vpack.c.bf16 %v6377_v54, %v6374_v56  ;;  %v6376_v49 = vld [vmem:[%s9214_s26 + $0x1ab8] sm:$0xff]  ;;  %v10537_v56 = vld [vmem:[#allocation2 + $0x100] sm:$0xff] }
 0x217   : > { %8157 = vmatprep.subr.bf16.mxu0 %v8156_v8  ;;  %v6206_v8 = vld [vmem:[%s9214_s26 + $0x15e8] sm:$0xff] }
 0x219   : > { %8063 = vmatpush3.bf16.msra.mxu1 %v8062_v50  ;;  %3862 = vmatmul.mubr.f32.vlgmr.msra.gmra.mrb[0].mxu0 %v10421_v61  ;;  %v10470_v50 = vld [vmem:[#allocation2 + $0xf0] sm:$0xff] }
 0x21a   : > { %8159 = vmatpush1.bf16.msra.mxu0 %v8158_v16  ;;  %8065 = vmatprep.subr.bf16.mxu1 %v8064_v52  ;;  %v8170_v16 = vpack.c.bf16 %v6350_v19, %v6347_v26  ;;  %v8076_v52 = vpack.c.bf16 %v6206_v8, %v6203_v1  ;;  %v6224_v26 = vld [vmem:[%s9214_s26 + $0x1678] sm:$0xff]  ;;  %v6383_v19 = vld [vmem:[%s9214_s26 + $0x1af0] sm:$0xff] }
 0x21b   : > { %v10439_v44 = vpop.f32.mrb[0].mxu1  ;;  %3867 = vmatprep.mubr.f32.mxu0 %v10429_v22  ;;  %8161 = vmatprep.subr.bf16.mxu0 %v8160_v48  ;;  %v6364_v48 = vld [vmem:[%s9214_s26 + $0x1a58] sm:$0xff] }
 0x21c   : > { %v10445_v11 = vpop.f32.mrb[1].mxu1 }
 0x21d   : > { %8067 = vmatpush3.bf16.msra.mxu1 %v8066_v31  ;;  %3868 = vmatmul.mubr.f32.gmra.mrb[2].mxu0 %v10434_v37  ;;  %v10484_v31 = vld [vmem:[#allocation2 + $0x70] sm:$0xff] }
 0x21e   : > { %8163 = vmatpush1.bf16.msra.mxu0 %v8162_v5  ;;  %8069 = vmatprep.subr.bf16.mxu1 %v8068_v35  ;;  %v8222_v5 = vpack.c.bf16 %v6364_v48, %v6361_v21  ;;  %v6367_v35 = vld [vmem:[%s9214_s26 + $0x1a70] sm:$0xff]  ;;  %v6389_v21 = vld [vmem:[%s9214_s26 + $0x1b20] sm:$0xff] }
 0x21f   : > { %v10457_v0 = vpop.f32.mrb[2].mxu1  ;;  %3873 = vmatprep.mubr.f32.mxu0 %v10447_v53  ;;  %8165 = vmatprep.subr.bf16.mxu0 %v8164_v39  ;;  %v6370_v39 = vld [vmem:[%s9214_s26 + $0x1a88] sm:$0xff]  ;;  %v10522_v48 = vld [vmem:[#allocation2 + $0xd0] sm:$0xff] }
 0x220   : > { %v10463_v7 = vpop.f32.mrb[3].mxu1 }
 0x221   : > { %8071 = vmatpush3.bf16.msra.mxu1 %v8070_v58  ;;  %3874 = vmatmul.mubr.f32.gmra.mrb[4].mxu0 %v10452_v18  ;;  %v8226_v58 = vpack.c.bf16 %v6370_v39, %v6367_v35  ;;  %v6385_v35 = vld [vmem:[%s9214_s26 + $0x1b00] sm:$0xff] }
 0x222   : > { %8167 = vmatpush1.bf16.msra.mxu0 %v8166_v55  ;;  %8073 = vmatprep.subr.bf16.mxu1 %v8072_v27  ;;  %v8084_v55 = vpack.c.bf16 %v6218_v46, %v6215_v60  ;;  %v6373_v27 = vld [vmem:[%s9214_s26 + $0x1aa0] sm:$0xff]  ;;  %v6292_v60 = vld [vmem:[%s9214_s26 + $0x1858] sm:$0xff]  ;;  %v6395_v46 = vld [vmem:[%s9214_s26 + $0x1b50] sm:$0xff] }
 0x223   : > { %v10472_v20 = vpop.f32.mrb[4].mxu1  ;;  %3879 = vmatprep.mubr.f32.mxu0 %v10465_v9  ;;  %8169 = vmatprep.subr.bf16.mxu0 %v8168_v62  ;;  %v6380_v62 = vld [vmem:[%s9214_s26 + $0x1ad8] sm:$0xff]  ;;  %v8230_v1 = vpack.c.bf16 %v6376_v49, %v6373_v27  ;;  %v6289_v39 = vld [vmem:[%s9214_s26 + $0x1840] sm:$0xff]  ;;  %v6391_v49 = vld [vmem:[%s9214_s26 + $0x1b30] sm:$0xff] }
 0x224   : > { %v10478_v47 = vpop.f32.mrb[5].mxu1  ;;  %v6241_v27 = vld [vmem:[%s9214_s26 + $0x16c0] sm:$0xff] }
 0x225   : > { %8075 = vmatpush3.bf16.msra.mxu1 %v8074_v12  ;;  %3880 = vmatmul.mubr.f32.gmra.mrb[6].mxu0 %v10470_v50  ;;  %v8232_v12 = vpack.c.bf16 %v6383_v19, %v6380_v62  ;;  %v6295_v62 = vld [vmem:[%s9214_s26 + $0x1870] sm:$0xff]  ;;  %v6398_v19 = vld [vmem:[%s9214_s26 + $0x1b68] sm:$0xff] }
 0x226   : > { %8171 = vmatpush1.bf16.msra.mxu0 %v8170_v16  ;;  %8077 = vmatprep.subr.bf16.mxu1 %v8076_v52  ;;  %v6382_v16 = vld [vmem:[%s9214_s26 + $0x1ae8] sm:$0xff] }
 0x227   : > { %v10487_v38 = vpop.f32.mrb[6].mxu1  ;;  %3950 = vmatprep.mubr.f32.mxu0 %v9009_v43  ;;  %8221 = vmatprep.subr.bf16.mxu0 %v8220_v42  ;;  %v6286_v42 = vld [vmem:[%s9214_s26 + $0x1828] sm:$0xff]  ;;  %v8234_v3 = vpack.c.bf16 %v6382_v16, %v6379_v34 }
 0x228   : > { %v10493_v6 = vpop.f32.mrb[7].mxu1  ;;  %3534 = vmatmul.mubr.f32.vlgmr.msra.gmra.mrb[52].mxu1 %v10192_v24  ;;  %v6221_v24 = vld [vmem:[%s9214_s26 + $0x1660] sm:$0xff] }
 0x229   : > { %8079 = vmatpush3.bf16.msra.mxu1 %v8076_v52  ;;  %6353 = vmatmul.mubr.msk.f32.vlgmr.msra.gmra.mrb[0].mxu0 %vm684_vm2, %v10484_v31  ;;  %v8088_v8 = vpack.c.bf16 %v6224_v26, %v6221_v24  ;;  %v6283_v52 = vld [vmem:[%s9214_s26 + $0x1810] sm:$0xff]  ;;  %v6394_v26 = vld [vmem:[%s9214_s26 + $0x1b48] sm:$0xff] }
 0x22a   : > { %8223 = vmatpush1.bf16.msra.mxu0 %v8222_v5  ;;  %3538 = vmatprep.mubr.f32.mxu1 %v10197_v41  ;;  %v10509_v41 = vld [vmem:[#allocation2 + $0xa0] sm:$0xff]  ;;  %v6238_v5 = vld [vmem:[%s9214_s26 + $0x16a8] sm:$0xff]  ;;  %v8242_v34 = vpack.c.bf16 %v6394_v26, %v6391_v49 }
 0x22b   : > { %8081 = vmatprep.subr.bf16.mxu1 %v8080_v28  ;;  %8225 = vmatprep.subr.bf16.mxu0 %v8224_v40  ;;  %v6388_v40 = vld [vmem:[%s9214_s26 + $0x1b18] sm:$0xff]  ;;  %v8174_v54 = vpack.c.bf16 %v6238_v5, %v6235_v30  ;;  %v6262_v26 = vld [vmem:[%s9214_s26 + $0x1768] sm:$0xff] }
 0x22c   : > { %3539 = vmatmul.mubr.f32.gmra.mrb[54].mxu1 %v10205_v4  ;;  %3956 = vmatprep.mubr.f32.mxu0 %v9009_v43  ;;  %v4158_v4 = vld [vmem:[#allocation2 + $0x68] sm:$0xfe] }
 0x22d   : > { %8083 = vmatpush3.bf16.msra.mxu1 %v8080_v28  ;;  %3543 = vmatprep.mubr.f32.mxu1 %v10211_v2  ;;  %v6386_v2 = vld [vmem:[%s9214_s26 + $0x1b08] sm:$0xff]  ;;  %v4208_v23 = vrot.slane %v4158_v4, 1 }
 0x22e   : > { %8227 = vmatpush1.bf16.msra.mxu0 %v8226_v58  ;;  %8085 = vmatprep.subr.bf16.mxu1 %v8084_v55  ;;  %v8236_v28 = vpack.c.bf16 %v6389_v21, %v6386_v2  ;;  %v6301_v2 = vld [vmem:[%s9214_s26 + $0x18a0] sm:$0xff]  ;;  %v6304_v21 = vld [vmem:[%s9214_s26 + $0x18b8] sm:$0xff] }
 0x22f   : > { %8229 = vmatprep.subr.bf16.mxu0 %v8228_v63  ;;  %6354 = vmatmul.mubr.msk.f32.gmra.mrb[2].mxu0 %vm684_vm2, %v10509_v41  ;;  %v10542_v58 = vsel %vm518_vm3, %v4208_v23, %v4209_v10  ;;  %v6244_v63 = vld [vmem:[%s9214_s26 + $0x16d8] sm:$0xff]  ;;  %v8184_v5 = vpack.c.bf16 %v6304_v21, %v6301_v2  ;;  %v6265_v2 = vld [vmem:[%s9214_s26 + $0x1780] sm:$0xff] }
 0x230   : > { %3544 = vmatmul.mubr.f32.gmra.mrb[56].mxu1 %v10221_v17  ;;  %3962 = vmatprep.mubr.f32.mxu0 %v9009_v43  ;;  %v8172_v17 = vpack.c.bf16 %v6286_v42, %v6283_v52  ;;  %v6400_v42 = vld [vmem:[%s9214_s26 + $0x1b78] sm:$0xff] }
 0x231   : > { %8087 = vmatpush3.bf16.msra.mxu1 %v8084_v55  ;;  %3548 = vmatprep.mubr.f32.mxu1 %v10227_v36  ;;  %v6392_v36 = vld [vmem:[%s9214_s26 + $0x1b38] sm:$0xff]  ;;  %v8176_v55 = vpack.c.bf16 %v6292_v60, %v6289_v39 }
 0x232   : > { %8231 = vmatpush1.bf16.msra.mxu0 %v8230_v1  ;;  %8089 = vmatprep.subr.bf16.mxu1 %v8088_v8  ;;  %v8240_v24 = vpack.c.bf16 %v6395_v46, %v6392_v36  ;;  %v6401_v1 = vld [vmem:[%s9214_s26 + $0x1b80] sm:$0xff]  ;;  %v6404_v10 = vld [vmem:[%s9214_s26 + $0x1b98] sm:$0xff]  ;;  %v6406_v36 = vld [vmem:[%s9214_s26 + $0x1ba8] sm:$0xff] }
 0x233   : > { %8233 = vmatprep.subr.bf16.mxu0 %v8232_v12  ;;  %6355 = vmatmul.mubr.msk.f32.gmra.mrb[4].mxu0 %vm684_vm2, %v10522_v48  ;;  %v6397_v12 = vld [vmem:[%s9214_s26 + $0x1b60] sm:$0xff]  ;;  %v8244_v52 = vpack.c.bf16 %v6401_v1, %v6398_v19  ;;  %v6310_v46 = vld [vmem:[%s9214_s26 + $0x18e8] sm:$0xff]  ;;  %v6268_v21 = vld [vmem:[%s9214_s26 + $0x1798] sm:$0xff] }
 0x234   : > { %3549 = vmatmul.mubr.f32.gmra.mrb[58].mxu1 %v10237_v51  ;;  %3968 = vmatprep.mubr.f32.mxu0 %v9009_v43  ;;  %v8238_v51 = vpack.c.bf16 %v6388_v40, %v6385_v35  ;;  %v8246_v30 = vpack.c.bf16 %v6400_v42, %v6397_v12  ;;  %v6253_v35 = vld [vmem:[%s9214_s26 + $0x1720] sm:$0xff]  ;;  %v6403_v40 = vld [vmem:[%s9214_s26 + $0x1b90] sm:$0xff] }
 0x235   : > { %8091 = vmatpush3.bf16.msra.mxu1 %v8088_v8  ;;  %7252 = vmatprep.mubr.msk.f32.mxu1 %vm684_vm2, %v10253_v15  ;;  %v6298_v15 = vld [vmem:[%s9214_s26 + $0x1888] sm:$0xff]  ;;  %v8178_v8 = vpack.c.bf16 %v6244_v63, %v6241_v27  ;;  %v6419_v12 = vld [vmem:[%s9214_s26 + $0x1c10] sm:$0xff] }
 0x236   : > { %8235 = vmatpush1.bf16.msra.mxu0 %v8234_v3  ;;  %8173 = vmatprep.subr.bf16.mxu1 %v8172_v17  ;;  %v8180_v4 = vpack.c.bf16 %v6298_v15, %v6295_v62  ;;  %v6409_v62 = vld [vmem:[%s9214_s26 + $0x1bc0] sm:$0xff] }
 0x237   : > { %8237 = vmatprep.subr.bf16.mxu0 %v8236_v28  ;;  %6356 = vmatmul.mubr.msk.f32.gmra.mrb[6].mxu0 %vm684_vm2, %v10537_v56  ;;  %v6256_v28 = vld [vmem:[%s9214_s26 + $0x1738] sm:$0xff] }
 0x238   : > { %7253 = vmatmul.mubr.msk.f32.vlgmr.msra.gmra.mrb[16].mxu1 %vm684_vm2, %v10281_v33  ;;  %4442 = vmatprep.mubr.f32.mxu0 %v10542_v58  ;;  %v6250_v33 = vld [vmem:[%s9214_s26 + $0x1708] sm:$0xff]  ;;  %v8186_v63 = vpack.c.bf16 %v6256_v28, %v6253_v35 }
 0x239   : > { %8175 = vmatpush3.bf16.msra.mxu1 %v8174_v54  ;;  %7255 = vmatprep.mubr.msk.f32.mxu1 %vm684_vm2, %v10296_v32  ;;  %v6407_v32 = vld [vmem:[%s9214_s26 + $0x1bb0] sm:$0xff]  ;;  %v8182_v17 = vpack.c.bf16 %v6250_v33, %v6247_v25  ;;  %v6416_v33 = vld [vmem:[%s9214_s26 + $0x1bf8] sm:$0xff]  ;;  %v6422_v28 = vld [vmem:[%s9214_s26 + $0x1c28] sm:$0xff] }
 0x23a   : > { %8239 = vmatpush1.bf16.msra.mxu0 %v8238_v51  ;;  %8177 = vmatprep.subr.bf16.mxu1 %v8176_v55  ;;  %v8248_v60 = vpack.c.bf16 %v6407_v32, %v6404_v10  ;;  %v6410_v51 = vld [vmem:[%s9214_s26 + $0x1bc8] sm:$0xff]  ;;  %v6413_v55 = vld [vmem:[%s9214_s26 + $0x1be0] sm:$0xff] }
 0x23b   : > { %v6710_v16 = vpop.f32.mrb[20].mxu1  ;;  %8241 = vmatprep.subr.bf16.mxu0 %v8240_v24  ;;  %v6259_v24 = vld [vmem:[%s9214_s26 + $0x1750] sm:$0xff]  ;;  %v8252_v1 = vpack.c.bf16 %v6413_v55, %v6410_v51 }
 0x23c   : > { %v6711_v23 = vpop.f32.mrb[21].mxu1  ;;  %7256 = vmatmul.mubr.msk.f32.gmra.mrb[18].mxu1 %vm684_vm2, %v10310_v59 }
 0x23d   : > { %v6712_v3 = vadd.f32 %v6711_v23, %v6710_v16  ;;  %8179 = vmatpush3.bf16.msra.mxu1 %v8178_v8  ;;  %4039 = vmatprep.mubr.f32.mxu1 %v10312_v14  ;;  %v6307_v14 = vld [vmem:[%s9214_s26 + $0x18d0] sm:$0xff]  ;;  %v6412_v8 = vld [vmem:[%s9214_s26 + $0x1bd8] sm:$0xff] }
 0x23e   : > { %8243 = vmatpush1.bf16.msra.mxu0 %v8242_v34  ;;  %8181 = vmatprep.subr.bf16.mxu1 %v8180_v4  ;;  %v8188_v49 = vpack.c.bf16 %v6310_v46, %v6307_v14  ;;  %v6313_v34 = vld [vmem:[%s9214_s26 + $0x1900] sm:$0xff]  ;;  %v6316_v4 = vld [vmem:[%s9214_s26 + $0x1918] sm:$0xff]  ;;  %v6415_v23 = vld [vmem:[%s9214_s26 + $0x1bf0] sm:$0xff] }
 0x23f   : > { %v10574_v39 = vadd.f32 %v6712_v3, %v10216_v13  ;;  %v6713_v59 = vpop.f32.mrb[22].mxu1  ;;  %8245 = vmatprep.subr.bf16.mxu0 %v8244_v52  ;;  %v8250_v13 = vpack.c.bf16 %v6406_v36, %v6403_v40  ;;  %v8190_v52 = vpack.c.bf16 %v6262_v26, %v6259_v24  ;;  %v8192_v42 = vpack.c.bf16 %v6316_v4, %v6313_v34  ;;  %v6425_v40 = vld [vmem:[%s9214_s26 + $0x1c40] sm:$0xff]  ;;  %v6271_v14 = vld [vmem:[%s9214_s26 + $0x17b0] sm:$0xff]  ;;  %v6274_v46 = vld [vmem:[%s9214_s26 + $0x17c8] sm:$0xff] }
 0x240   : > { %v6714_v54 = vpop.f32.mrb[23].mxu1  ;;  %v8256_v3 = vpack.c.bf16 %v6419_v12, %v6416_v33  ;;  %v8260_v55 = vpack.c.bf16 %v6425_v40, %v6422_v28  ;;  %v6431_v24 = vld [vmem:[%s9214_s26 + $0x1c70] sm:$0xff]  ;;  %v8198_v26 = vpack.c.bf16 %v6274_v46, %v6271_v14  ;;  %v6430_v4 = vld [vmem:[%s9214_s26 + $0x1c68] sm:$0xff]  ;;  %v6449_v14 = vld [vmem:[%s9214_s26 + $0x1d00] sm:$0xff] }
 0x241   : > { %v6715_v27 = vadd.f32 %v6714_v54, %v6713_v59  ;;  %8183 = vmatpush3.bf16.msra.mxu1 %v8182_v17  ;;  %v6418_v17 = vld [vmem:[%s9214_s26 + $0x1c08] sm:$0xff]  ;;  %v6421_v54 = vld [vmem:[%s9214_s26 + $0x1c20] sm:$0xff]  ;;  %v6439_v28 = vld [vmem:[%s9214_s26 + $0x1cb0] sm:$0xff] }
 0x242   : > { %8247 = vmatpush1.bf16.msra.mxu0 %v8246_v30  ;;  %8185 = vmatprep.subr.bf16.mxu1 %v8184_v5  ;;  %v6319_v30 = vld [vmem:[%s9214_s26 + $0x1930] sm:$0xff]  ;;  %v6322_v5 = vld [vmem:[%s9214_s26 + $0x1948] sm:$0xff] }
 0x243   : > { %v10585_v15 = vadd.f32 %v6715_v27, %v10232_v57  ;;  %v6716_v19 = vpop.f32.mrb[24].mxu1  ;;  %8249 = vmatprep.subr.bf16.mxu0 %v8248_v60  ;;  %v8254_v57 = vpack.c.bf16 %v6412_v8, %v6409_v62  ;;  %v8258_v60 = vpack.c.bf16 %v6418_v17, %v6415_v23  ;;  %v8196_v36 = vpack.c.bf16 %v6322_v5, %v6319_v30  ;;  %v6424_v27 = vld [vmem:[%s9214_s26 + $0x1c38] sm:$0xff]  ;;  %v6427_v8 = vld [vmem:[%s9214_s26 + $0x1c50] sm:$0xff]  ;;  %v6334_v33 = vld [vmem:[%s9214_s26 + $0x19a8] sm:$0xff] }
 0x244   : > { %v6717_v25 = vpop.f32.mrb[25].mxu1  ;;  %v8262_v62 = vpack.c.bf16 %v6424_v27, %v6421_v54  ;;  %v6434_v12 = vld [vmem:[%s9214_s26 + $0x1c88] sm:$0xff]  ;;  %v6436_v23 = vld [vmem:[%s9214_s26 + $0x1c98] sm:$0xff]  ;;  %v6443_v30 = vld [vmem:[%s9214_s26 + $0x1cd0] sm:$0xff] }
 0x245   : > { %v6718_v16 = vadd.f32 %v6717_v25, %v6716_v19  ;;  %8187 = vmatpush3.bf16.msra.mxu1 %v8186_v63  ;;  %v6325_v63 = vld [vmem:[%s9214_s26 + $0x1960] sm:$0xff]  ;;  %v6331_v25 = vld [vmem:[%s9214_s26 + $0x1990] sm:$0xff]  ;;  %v6440_v17 = vld [vmem:[%s9214_s26 + $0x1cb8] sm:$0xff] }
 0x246   : > { %8251 = vmatpush1.bf16.msra.mxu0 %v8250_v13  ;;  %8189 = vmatprep.subr.bf16.mxu1 %v8188_v49  ;;  %v6328_v13 = vld [vmem:[%s9214_s26 + $0x1978] sm:$0xff]  ;;  %v6277_v19 = vld [vmem:[%s9214_s26 + $0x17e0] sm:$0xff]  ;;  %v8272_v40 = vpack.c.bf16 %v6443_v30, %v6440_v17 }
 0x247   : > { %v10596_v10 = vadd.f32 %v6718_v16, %v10249_v29  ;;  %v6719_v32 = vpop.f32.mrb[26].mxu1  ;;  %8253 = vmatprep.subr.bf16.mxu0 %v8252_v1  ;;  %v8194_v29 = vpack.c.bf16 %v6268_v21, %v6265_v2  ;;  %v6428_v49 = vld [vmem:[%s9214_s26 + $0x1c58] sm:$0xff]  ;;  %v6437_v16 = vld [vmem:[%s9214_s26 + $0x1ca0] sm:$0xff] }
 0x248   : > { %v6720_v35 = vpop.f32.mrb[27].mxu1  ;;  %v6280_v1 = vld [vmem:[%s9214_s26 + $0x17f8] sm:$0xff]  ;;  %v8264_v34 = vpack.c.bf16 %v6431_v24, %v6428_v49  ;;  %v6433_v2 = vld [vmem:[%s9214_s26 + $0x1c80] sm:$0xff]  ;;  %v8268_v21 = vpack.c.bf16 %v6437_v16, %v6434_v12  ;;  %v6455_v24 = vld [vmem:[%s9214_s26 + $0x1d30] sm:$0xff] }
 0x249   : > { %v6721_v59 = vadd.f32 %v6720_v35, %v6719_v32  ;;  %8191 = vmatpush3.bf16.msra.mxu1 %v8190_v52  ;;  %v8202_v52 = vpack.c.bf16 %v6280_v1, %v6277_v19  ;;  %v6337_v32 = vld [vmem:[%s9214_s26 + $0x19c0] sm:$0xff]  ;;  %v8270_v5 = vpack.c.bf16 %v6436_v23, %v6433_v2  ;;  %v6352_v49 = vld [vmem:[%s9214_s26 + $0x1a38] sm:$0xff] }
 0x24a   : > { %8255 = vmatpush1.bf16.msra.mxu0 %v8254_v57  ;;  %8193 = vmatprep.subr.bf16.mxu1 %v8192_v42  ;;  %v8266_v57 = vpack.c.bf16 %v6430_v4, %v6427_v8  ;;  %v8204_v42 = vpack.c.bf16 %v6334_v33, %v6331_v25  ;;  %v4157_v19 = vld [vmem:[#allocation2 + $0x60] sm:$0xfe]  ;;  %v4160_v1 = vld [vmem:[#allocation2 + $0x78] sm:$0x1]  ;;  %v6411_v8 = vld [vmem:[%s9214_s26 + $0x1bd0] sm:$0xff] }
 0x24b   : > { %v10607_v51 = vadd.f32 %v6721_v59, %v10267_v45  ;;  %8257 = vmatprep.subr.bf16.mxu0 %v8256_v3  ;;  %v8200_v45 = vpack.c.bf16 %v6328_v13, %v6325_v63  ;;  %v6340_v3 = vld [vmem:[%s9214_s26 + $0x19d8] sm:$0xff]  ;;  %v6442_v59 = vld [vmem:[%s9214_s26 + $0x1cc8] sm:$0xff]  ;;  %v6349_v13 = vld [vmem:[%s9214_s26 + $0x1a20] sm:$0xff]  ;;  %v4205_v12 = vrot.slane %v4157_v19, 1  ;;  %v4206_v16 = vrot.slane %v4160_v1, 1 }
 0x24c   : > { %v8208_v35 = vpack.c.bf16 %v6340_v3, %v6337_v32  ;;  %v8274_v46 = vpack.c.bf16 %v6442_v59, %v6439_v28  ;;  %v6448_v63 = vld [vmem:[%s9214_s26 + $0x1cf8] sm:$0xff]  ;;  %v6461_v25 = vld [vmem:[%s9214_s26 + $0x1d60] sm:$0xff]  ;;  %v4167_v33 = vld [vmem:[#allocation2 + $0xb0] sm:$0x1] }
 0x24d   : > { %8195 = vmatpush3.bf16.msra.mxu1 %v8194_v29  ;;  %v6343_v29 = vld [vmem:[%s9214_s26 + $0x19f0] sm:$0xff]  ;;  %v4164_v4 = vld [vmem:[#allocation2 + $0x98] sm:$0xfe]  ;;  %v4166_v3 = vld [vmem:[#allocation2 + $0xa8] sm:$0x1]  ;;  %v4218_v17 = vrot.slane %v4167_v33, 1 }
 0x24e   : > { %8259 = vmatpush1.bf16.msra.mxu0 %v8258_v60  ;;  %8197 = vmatprep.subr.bf16.mxu1 %v8196_v36  ;;  %v6346_v60 = vld [vmem:[%s9214_s26 + $0x1a08] sm:$0xff]  ;;  %v4217_v23 = vrot.slane %v4164_v4, 1  ;;  %v4163_v32 = vld [vmem:[#allocation2 + $0x90] sm:$0xfe]  ;;  %v6464_v30 = vld [vmem:[%s9214_s26 + $0x1d78] sm:$0xff] }
 0x24f   : > { %8261 = vmatprep.subr.bf16.mxu0 %v8260_v55  ;;  %v6446_v36 = vld [vmem:[%s9214_s26 + $0x1ce8] sm:$0xff]  ;;  %v8212_v54 = vpack.c.bf16 %v6346_v60, %v6343_v29  ;;  %v6445_v55 = vld [vmem:[%s9214_s26 + $0x1ce0] sm:$0xff]  ;;  %v6467_v28 = vld [vmem:[%s9214_s26 + $0x1d90] sm:$0xff]  ;;  %v4214_v60 = vrot.slane %v4163_v32, 1 }
 0x250   : > { %v8276_v27 = vpack.c.bf16 %v6449_v14, %v6446_v36  ;;  %v6420_v59 = vld [vmem:[%s9214_s26 + $0x1c18] sm:$0xff]  ;;  %v4215_v36 = vrot.slane %v4166_v3, 1  ;;  %v6463_v14 = vld [vmem:[%s9214_s26 + $0x1d70] sm:$0xff]  ;;  %v6473_v19 = vld [vmem:[%s9214_s26 + $0x1dc0] sm:$0xff] }
 0x251   : > { %8199 = vmatpush3.bf16.msra.mxu1 %v8198_v26  ;;  %v8278_v26 = vpack.c.bf16 %v6448_v63, %v6445_v55  ;;  %v6423_v1 = vld [vmem:[%s9214_s26 + $0x1c30] sm:$0xff] }
 0x252   : > { %8263 = vmatpush1.bf16.msra.mxu0 %v8262_v62  ;;  %8201 = vmatprep.subr.bf16.mxu1 %v8200_v45  ;;  %v8216_v62 = vpack.c.bf16 %v6352_v49, %v6349_v13  ;;  %v6454_v45 = vld [vmem:[%s9214_s26 + $0x1d28] sm:$0xff]  ;;  %v10684_v33 = vsel %vm518_vm3, %v4214_v60, %v4215_v36  ;;  %v6479_v32 = vld [vmem:[%s9214_s26 + $0x1df0] sm:$0xff] }
 0x253   : > { %8265 = vmatprep.subr.bf16.mxu0 %v8264_v34  ;;  %v6414_v34 = vld [vmem:[%s9214_s26 + $0x1be8] sm:$0xff]  ;;  %v4175_v3 = vld [vmem:[#allocation2 + $0xf0] sm:$0xfe] }
 0x254   : > { %v6470_v49 = vld [vmem:[%s9214_s26 + $0x1da8] sm:$0xff]  ;;  %v4232_v36 = vrot.slane %v4175_v3, 1 }
 0x255   : > { %8203 = vmatpush3.bf16.msra.mxu1 %v8202_v52  ;;  %v6457_v52 = vld [vmem:[%s9214_s26 + $0x1d40] sm:$0xff] }
 0x256   : > { %8267 = vmatpush1.bf16.msra.mxu0 %v8266_v57  ;;  %8205 = vmatprep.subr.bf16.mxu1 %v8204_v42  ;;  %v6460_v57 = vld [vmem:[%s9214_s26 + $0x1d58] sm:$0xff] }
 0x257   : > { %8269 = vmatprep.subr.bf16.mxu0 %v8268_v21  ;;  %v8300_v21 = vpack.c.bf16 %v6414_v34, %v6411_v8  ;;  %v8286_v55 = vpack.c.bf16 %v6460_v57, %v6457_v52 }
 0x258   : > { %4040 = vmatmul.mubr.f32.vlgmr.msra.gmra.mrb[60].mxu1 %v10421_v61  ;;  %v6452_v61 = vld [vmem:[%s9214_s26 + $0x1d18] sm:$0xff] }
 0x259   : > { %8207 = vmatpush3.bf16.msra.mxu1 %v8204_v42  ;;  %4044 = vmatprep.mubr.f32.mxu1 %v10429_v22  ;;  %v6451_v22 = vld [vmem:[%s9214_s26 + $0x1d10] sm:$0xff] }
 0x25a   : > { %8271 = vmatpush1.bf16.msra.mxu0 %v8270_v5  ;;  %8209 = vmatprep.subr.bf16.mxu1 %v8208_v35  ;;  %v6363_v42 = vld [vmem:[%s9214_s26 + $0x1a50] sm:$0xff]  ;;  %v8282_v2 = vpack.c.bf16 %v6454_v45, %v6451_v22  ;;  %v4170_v5 = vld [vmem:[#allocation2 + $0xc8] sm:$0xfe] }
 0x25b   : > { %8273 = vmatprep.subr.bf16.mxu0 %v8272_v40  ;;  %v6417_v40 = vld [vmem:[%s9214_s26 + $0x1c00] sm:$0xff]  ;;  %v4226_v63 = vrot.slane %v4170_v5, 1  ;;  %v4179_v45 = vld [vmem:[#allocation2 + $0x110] sm:$0x1]  ;;  %v6432_v5 = vld [vmem:[%s9214_s26 + $0x1c78] sm:$0xff] }
 0x25c   : > { %4045 = vmatmul.mubr.f32.gmra.mrb[62].mxu1 %v10434_v37  ;;  %v8280_v37 = vpack.c.bf16 %v6455_v24, %v6452_v61  ;;  %v10672_v61 = vsel %vm518_vm3, %v4217_v23, %v4218_v17  ;;  %v8288_v24 = vpack.c.bf16 %v6467_v28, %v6464_v30  ;;  %v8304_v22 = vpack.c.bf16 %v6420_v59, %v6417_v40  ;;  %v6429_v30 = vld [vmem:[%s9214_s26 + $0x1c60] sm:$0xff]  ;;  %v6475_v59 = vld [vmem:[%s9214_s26 + $0x1dd0] sm:$0xff] }
 0x25d   : > { %8211 = vmatpush3.bf16.msra.mxu1 %v8208_v35  ;;  %4049 = vmatprep.mubr.f32.mxu1 %v10447_v53  ;;  %v6458_v53 = vld [vmem:[%s9214_s26 + $0x1d48] sm:$0xff]  ;;  %v4173_v35 = vld [vmem:[#allocation2 + $0xe0] sm:$0x1]  ;;  %v4236_v57 = vrot.slane %v4179_v45, 1 }
 0x25e   : > { %8275 = vmatpush1.bf16.msra.mxu0 %v8274_v46  ;;  %8213 = vmatprep.subr.bf16.mxu1 %v8212_v54  ;;  %v6466_v46 = vld [vmem:[%s9214_s26 + $0x1d88] sm:$0xff]  ;;  %v4227_v13 = vrot.slane %v4173_v35, 1  ;;  %v6493_v45 = vld [vmem:[%s9214_s26 + $0x1e20] sm:$0xff] }
 0x25f   : > { %8277 = vmatprep.subr.bf16.mxu0 %v8276_v27  ;;  %v6372_v27 = vld [vmem:[%s9214_s26 + $0x1a98] sm:$0xff]  ;;  %v8290_v8 = vpack.c.bf16 %v6466_v46, %v6463_v14  ;;  %v6381_v46 = vld [vmem:[%s9214_s26 + $0x1ae0] sm:$0xff] }
 0x260   : > { %4050 = vmatmul.mubr.f32.gmra.mrb[64].mxu1 %v10452_v18  ;;  %v6366_v18 = vld [vmem:[%s9214_s26 + $0x1a68] sm:$0xff] }
 0x261   : > { %8215 = vmatpush3.bf16.msra.mxu1 %v8212_v54  ;;  %4054 = vmatprep.mubr.f32.mxu1 %v10465_v9  ;;  %v8284_v9 = vpack.c.bf16 %v6461_v25, %v6458_v53  ;;  %v8302_v29 = vpack.c.bf16 %v6366_v18, %v6363_v42  ;;  %v6369_v54 = vld [vmem:[%s9214_s26 + $0x1a80] sm:$0xff]  ;;  %v6472_v25 = vld [vmem:[%s9214_s26 + $0x1db8] sm:$0xff]  ;;  %v8292_v18 = vpack.c.bf16 %v6473_v19, %v6470_v49  ;;  %v6435_v49 = vld [vmem:[%s9214_s26 + $0x1c90] sm:$0xff] }
 0x262   : > { %8279 = vmatpush1.bf16.msra.mxu0 %v8278_v26  ;;  %8217 = vmatprep.subr.bf16.mxu1 %v8216_v62  ;;  %v4172_v26 = vld [vmem:[#allocation2 + $0xd8] sm:$0x1]  ;;  %v8306_v34 = vpack.c.bf16 %v6372_v27, %v6369_v54  ;;  %v6469_v53 = vld [vmem:[%s9214_s26 + $0x1da0] sm:$0xff] }
 0x263   : > { %8281 = vmatprep.subr.bf16.mxu0 %v8280_v37  ;;  %v6426_v37 = vld [vmem:[%s9214_s26 + $0x1c48] sm:$0xff]  ;;  %v6476_v42 = vld [vmem:[%s9214_s26 + $0x1dd8] sm:$0xff]  ;;  %v8294_v28 = vpack.c.bf16 %v6472_v25, %v6469_v53  ;;  %v6489_v53 = vld [vmem:[%s9214_s26 + $0x1e00] sm:$0xff] }
 0x264   : > { %4055 = vmatmul.mubr.f32.gmra.mrb[66].mxu1 %v10470_v50  ;;  %v10667_v50 = vsel %vm518_vm3, %v4205_v12, %v4206_v16  ;;  %v6375_v12 = vld [vmem:[%s9214_s26 + $0x1ab0] sm:$0xff]  ;;  %v6378_v16 = vld [vmem:[%s9214_s26 + $0x1ac8] sm:$0xff]  ;;  %v8308_v23 = vpack.c.bf16 %v6426_v37, %v6423_v1  ;;  %v8296_v60 = vpack.c.bf16 %v6479_v32, %v6476_v42  ;;  %v6384_v54 = vld [vmem:[%s9214_s26 + $0x1af8] sm:$0xff] }
 0x265   : > { %8219 = vmatpush3.bf16.msra.mxu1 %v8216_v62  ;;  %7274 = vmatprep.mubr.msk.f32.mxu1 %vm684_vm2, %v10484_v31  ;;  %v4169_v31 = vld [vmem:[#allocation2 + $0xc0] sm:$0xfe]  ;;  %v4176_v62 = vld [vmem:[#allocation2 + $0xf8] sm:$0xfe]  ;;  %v8310_v40 = vpack.c.bf16 %v6378_v16, %v6375_v12  ;;  %v8314_v19 = vpack.c.bf16 %v6384_v54, %v6381_v46  ;;  %v4171_v46 = vld [vmem:[#allocation2 + $0xd0] sm:$0xfe] }
 0x266   : > { %8283 = vmatpush1.bf16.msra.mxu0 %v8282_v2  ;;  %8301 = vmatprep.subr.bf16.mxu1 %v8300_v21  ;;  %v4223_v4 = vrot.slane %v4169_v31, 1  ;;  %v4235_v52 = vrot.slane %v4176_v62, 1  ;;  %v10690_v21 = vsel %vm518_vm3, %v4226_v63, %v4227_v13  ;;  %v8312_v13 = vpack.c.bf16 %v6432_v5, %v6429_v30  ;;  %v4159_v31 = vld [vmem:[#allocation2 + $0x70] sm:$0xfe]  ;;  %v6490_v62 = vld [vmem:[%s9214_s26 + $0x1e08] sm:$0xff]  ;;  %v6444_v42 = vld [vmem:[%s9214_s26 + $0x1cd8] sm:$0xff] }
 0x267   : > { %8285 = vmatprep.subr.bf16.mxu0 %v8284_v9  ;;  %v4178_v9 = vld [vmem:[#allocation2 + $0x108] sm:$0x1]  ;;  %v8348_v16 = vpack.c.bf16 %v6493_v45, %v6490_v62  ;;  %v6393_v32 = vld [vmem:[%s9214_s26 + $0x1b40] sm:$0xff]  ;;  %v4168_v30 = vld [vmem:[#allocation2 + $0xb8] sm:$0x1] }
 0x268   : > { %7275 = vmatmul.mubr.msk.f32.vlgmr.msra.gmra.mrb[16].mxu1 %vm684_vm2, %v10509_v41  ;;  %v4224_v41 = vrot.slane %v4172_v26, 1  ;;  %v4233_v14 = vrot.slane %v4178_v9, 1  ;;  %v10710_v63 = vsel %vm518_vm3, %v4235_v52, %v4236_v57  ;;  %v6438_v26 = vld [vmem:[%s9214_s26 + $0x1ca8] sm:$0xff]  ;;  %v6492_v52 = vld [vmem:[%s9214_s26 + $0x1e18] sm:$0xff]  ;;  %v6441_v57 = vld [vmem:[%s9214_s26 + $0x1cc0] sm:$0xff] }
 0x269   : > { %4443 = vmatmul.mubr.f32.vlgmr.msra.gmra.mrb[0].mxu0 %v10667_v50  ;;  %8303 = vmatpush3.bf16.msra.mxu1 %v8302_v29  ;;  %v8316_v12 = vpack.c.bf16 %v6438_v26, %v6435_v49  ;;  %v6396_v9 = vld [vmem:[%s9214_s26 + $0x1b58] sm:$0xff]  ;;  %v4174_v54 = vld [vmem:[#allocation2 + $0xe8] sm:$0x1]  ;;  %v6505_v49 = vld [vmem:[%s9214_s26 + $0x1e80] sm:$0xff] }
 0x26a   : > { %8287 = vmatpush1.bf16.msra.mxu0 %v8286_v55  ;;  %4448 = vmatprep.mubr.f32.mxu0 %v10672_v61  ;;  %v10701_v29 = vsel %vm518_vm3, %v4223_v4, %v4224_v41  ;;  %v10721_v1 = vsel %vm518_vm3, %v4232_v36, %v4233_v14  ;;  %v6390_v4 = vld [vmem:[%s9214_s26 + $0x1b28] sm:$0xff]  ;;  %v6399_v26 = vld [vmem:[%s9214_s26 + $0x1b70] sm:$0xff] }
 0x26b   : > { %v6766_v2 = vpop.f32.mrb[28].mxu1  ;;  %8289 = vmatprep.subr.bf16.mxu0 %v8288_v24  ;;  %8305 = vmatprep.subr.bf16.mxu1 %v8304_v22  ;;  %v4162_v24 = vld [vmem:[#allocation2 + $0x88] sm:$0x1] }
 0x26c   : > { %v6767_v17 = vpop.f32.mrb[29].mxu1  ;;  %7277 = vmatprep.mubr.msk.f32.mxu1 %vm684_vm2, %v10522_v48  ;;  %v6478_v48 = vld [vmem:[%s9214_s26 + $0x1de8] sm:$0xff] }
 0x26d   : > { %v6768_v35 = vadd.f32 %v6767_v17, %v6766_v2  ;;  %4449 = vmatmul.mubr.f32.gmra.mrb[2].mxu0 %v10684_v33  ;;  %8307 = vmatpush3.bf16.msra.mxu1 %v8306_v34  ;;  %v8298_v37 = vpack.c.bf16 %v6478_v48, %v6475_v59  ;;  %v4212_v34 = vrot.slane %v4162_v24, 1  ;;  %v4165_v17 = vld [vmem:[#allocation2 + $0xa0] sm:$0xfe]  ;;  %v6447_v59 = vld [vmem:[%s9214_s26 + $0x1cf0] sm:$0xff]  ;;  %v6450_v48 = vld [vmem:[%s9214_s26 + $0x1d08] sm:$0xff]  ;;  %v4221_v24 = vrot.slane %v4168_v30, 1 }
 0x26e   : > { %8291 = vmatpush1.bf16.msra.mxu0 %v8290_v8  ;;  %4454 = vmatprep.mubr.f32.mxu0 %v10690_v21  ;;  %v4211_v8 = vrot.slane %v4159_v31, 1  ;;  %v4220_v31 = vrot.slane %v4165_v17, 1  ;;  %v6402_v62 = vld [vmem:[%s9214_s26 + $0x1b88] sm:$0xff] }
 0x26f   : > { %v10707_v55 = vadd.f32 %v10574_v39, %v6768_v35  ;;  %v6769_v27 = vpop.f32.mrb[30].mxu1  ;;  %8293 = vmatprep.subr.bf16.mxu0 %v8292_v18  ;;  %8309 = vmatprep.subr.bf16.mxu1 %v8308_v23  ;;  %v6496_v18 = vld [vmem:[%s9214_s26 + $0x1e38] sm:$0xff]  ;;  %v6499_v23 = vld [vmem:[%s9214_s26 + $0x1e50] sm:$0xff]  ;;  %v8350_v35 = vpack.c.bf16 %v6492_v52, %v6489_v53 }
 0x270   : > { %v6770_v22 = vpop.f32.mrb[31].mxu1  ;;  %7278 = vmatmul.mubr.msk.f32.gmra.mrb[18].mxu1 %vm684_vm2, %v10537_v56  ;;  %v6387_v56 = vld [vmem:[%s9214_s26 + $0x1b10] sm:$0xff]  ;;  %v10740_v5 = vsel %vm518_vm3, %v4211_v8, %v4212_v34  ;;  %v8352_v14 = vpack.c.bf16 %v6499_v23, %v6496_v18  ;;  %v6453_v8 = vld [vmem:[%s9214_s26 + $0x1d20] sm:$0xff]  ;;  %v4229_v34 = vrot.slane %v4171_v46, 1  ;;  %v6508_v52 = vld [vmem:[%s9214_s26 + $0x1e98] sm:$0xff] }
 0x271   : > { %v6771_v39 = vadd.f32 %v6770_v22, %v6769_v27  ;;  %4455 = vmatmul.mubr.f32.gmra.mrb[4].mxu0 %v10701_v29  ;;  %8311 = vmatpush3.bf16.msra.mxu1 %v8310_v40  ;;  %v8318_v3 = vpack.c.bf16 %v6390_v4, %v6387_v56  ;;  %v6498_v40 = vld [vmem:[%s9214_s26 + $0x1e48] sm:$0xff]  ;;  %v4230_v56 = vrot.slane %v4174_v54, 1  ;;  %v4742_v23 = vld [vmem:[#allocation2 + $0x80] sm:$0x3] }
 0x272   : > { %8295 = vmatpush1.bf16.msra.mxu0 %v8294_v28  ;;  %4460 = vmatprep.mubr.f32.mxu0 %v10710_v63  ;;  %v8320_v28 = vpack.c.bf16 %v6444_v42, %v6441_v57  ;;  %v6511_v57 = vld [vmem:[%s9214_s26 + $0x1eb0] sm:$0xff]  ;;  %v10766_v42 = vsel %vm518_vm3, %v4220_v31, %v4221_v24  ;;  %v4739_v18 = vld [vmem:[#allocation2 + $0x68] sm:$0xfc]  ;;  %v4790_v46 = vrot.slane %v4742_v23, 2  ;;  %v6477_v23 = vld [vmem:[%s9214_s26 + $0x1de0] sm:$0xff] }
 0x273   : > { %v10727_v25 = vadd.f32 %v10585_v15, %v6771_v39  ;;  %v6772_v41 = vpop.f32.mrb[32].mxu1  ;;  %8297 = vmatprep.subr.bf16.mxu0 %v8296_v60  ;;  %8313 = vmatprep.subr.bf16.mxu1 %v8312_v13  ;;  %v6502_v13 = vld [vmem:[%s9214_s26 + $0x1e68] sm:$0xff]  ;;  %v8324_v39 = vpack.c.bf16 %v6450_v48, %v6447_v59  ;;  %v10774_v17 = vsel %vm518_vm3, %v4229_v34, %v4230_v56  ;;  %v4789_v48 = vrot.slane %v4739_v18, 2  ;;  %v6528_v18 = vld [vmem:[%s9214_s26 + $0x1f38] sm:$0xff] }
 0x274   : > { %v6773_v2 = vpop.f32.mrb[33].mxu1  ;;  %4620 = vmatprep.mubr.f32.mxu1 %v10542_v58  ;;  %v6495_v58 = vld [vmem:[%s9214_s26 + $0x1e30] sm:$0xff]  ;;  %v8356_v53 = vpack.c.bf16 %v6505_v49, %v6502_v13  ;;  %v6462_v59 = vld [vmem:[%s9214_s26 + $0x1d68] sm:$0xff]  ;;  %v6513_v49 = vld [vmem:[%s9214_s26 + $0x1ec0] sm:$0xff] }
 0x275   : > { %v6774_v15 = vadd.f32 %v6773_v2, %v6772_v41  ;;  %4461 = vmatmul.mubr.f32.gmra.mrb[6].mxu0 %v10721_v1  ;;  %8315 = vmatpush3.bf16.msra.mxu1 %v8314_v19  ;;  %v8354_v45 = vpack.c.bf16 %v6498_v40, %v6495_v58  ;;  %v6501_v19 = vld [vmem:[%s9214_s26 + $0x1e60] sm:$0xff]  ;;  %v6456_v41 = vld [vmem:[%s9214_s26 + $0x1d38] sm:$0xff]  ;;  %v8326_v2 = vpack.c.bf16 %v6402_v62, %v6399_v26  ;;  %v6510_v58 = vld [vmem:[%s9214_s26 + $0x1ea8] sm:$0xff] }
 0x276   : > { %8299 = vmatpush1.bf16.msra.mxu0 %v8298_v37  ;;  %4531 = vmatprep.mubr.f32.mxu0 %v9009_v43  ;;  %v6504_v37 = vld [vmem:[%s9214_s26 + $0x1e78] sm:$0xff]  ;;  %v6459_v40 = vld [vmem:[%s9214_s26 + $0x1d50] sm:$0xff]  ;;  %v6522_v56 = vld [vmem:[%s9214_s26 + $0x1f08] sm:$0xff] }
 0x277   : > { %v10746_v60 = vadd.f32 %v10596_v10, %v6774_v15  ;;  %v6775_v36 = vpop.f32.mrb[34].mxu1  ;;  %8317 = vmatprep.subr.bf16.mxu1 %v8316_v12  ;;  %8349 = vmatprep.subr.bf16.mxu0 %v8348_v16  ;;  %v8322_v10 = vpack.c.bf16 %v6396_v9, %v6393_v32  ;;  %v4177_v12 = vld [vmem:[#allocation2 + $0x100] sm:$0xfe]  ;;  %v4180_v16 = vld [vmem:[#allocation2 + $0x118] sm:$0x1]  ;;  %v8328_v32 = vpack.c.bf16 %v6456_v41, %v6453_v8  ;;  %v6507_v9 = vld [vmem:[%s9214_s26 + $0x1e90] sm:$0xff] }
 0x278   : > { %v6776_v27 = vpop.f32.mrb[35].mxu1  ;;  %v6405_v15 = vld [vmem:[%s9214_s26 + $0x1ba0] sm:$0xff]  ;;  %v4238_v30 = vrot.slane %v4177_v12, 1  ;;  %v8332_v13 = vpack.c.bf16 %v6462_v59, %v6459_v40  ;;  %v6468_v26 = vld [vmem:[%s9214_s26 + $0x1d98] sm:$0xff]  ;;  %v6519_v8 = vld [vmem:[%s9214_s26 + $0x1ef0] sm:$0xff] }
 0x279   : > { %v6777_v22 = vadd.f32 %v6776_v27, %v6775_v36  ;;  %6481 = vmatmul.mubr.msk.f32.vlgmr.msra.gmra.mrb[0].mxu0 %vm684_vm2, %v10740_v5  ;;  %8319 = vmatpush3.bf16.msra.mxu1 %v8318_v3  ;;  %v6408_v3 = vld [vmem:[%s9214_s26 + $0x1bb8] sm:$0xff]  ;;  %v6514_v36 = vld [vmem:[%s9214_s26 + $0x1ec8] sm:$0xff]  ;;  %v8362_v27 = vpack.c.bf16 %v6510_v58, %v6507_v9  ;;  %v6531_v9 = vld [vmem:[%s9214_s26 + $0x1f50] sm:$0xff] }
 0x27a   : > { %8351 = vmatpush1.bf16.msra.mxu0 %v8350_v35  ;;  %8321 = vmatprep.subr.bf16.mxu1 %v8320_v28  ;;  %v4239_v35 = vrot.slane %v4180_v16, 1  ;;  %v8360_v28 = vpack.c.bf16 %v6511_v57, %v6508_v52  ;;  %v8330_v54 = vpack.c.bf16 %v6408_v3, %v6405_v15  ;;  %v6520_v62 = vld [vmem:[%s9214_s26 + $0x1ef8] sm:$0xff]  ;;  %v6474_v41 = vld [vmem:[%s9214_s26 + $0x1dc8] sm:$0xff]  ;;  %v6529_v16 = vld [vmem:[%s9214_s26 + $0x1f40] sm:$0xff]  ;;  %v8370_v52 = vpack.c.bf16 %v6522_v56, %v6519_v8 }
 0x27b   : > { %v10759_v4 = vadd.f32 %v10607_v51, %v6777_v22  ;;  %8353 = vmatprep.subr.bf16.mxu0 %v8352_v14  ;;  %4537 = vmatprep.mubr.f32.mxu0 %v9009_v43  ;;  %v8358_v51 = vpack.c.bf16 %v6504_v37, %v6501_v19  ;;  %v6517_v14 = vld [vmem:[%s9214_s26 + $0x1ee0] sm:$0xff]  ;;  %v6516_v22 = vld [vmem:[%s9214_s26 + $0x1ed8] sm:$0xff]  ;;  %v6526_v12 = vld [vmem:[%s9214_s26 + $0x1f28] sm:$0xff] }
 0x27c   : > { %v10786_v31 = vsel %vm518_vm3, %v4238_v30, %v4239_v35  ;;  %v8364_v24 = vpack.c.bf16 %v6517_v14, %v6514_v36  ;;  %v8366_v19 = vpack.c.bf16 %v6516_v22, %v6513_v49  ;;  %v6534_v35 = vld [vmem:[%s9214_s26 + $0x1f68] sm:$0xff]  ;;  %v6537_v36 = vld [vmem:[%s9214_s26 + $0x1f80] sm:$0xff]  ;;  %v6491_v14 = vld [vmem:[%s9214_s26 + $0x1e10] sm:$0xff] }
 0x27d   : > { %8323 = vmatpush3.bf16.msra.mxu1 %v8322_v10  ;;  %6482 = vmatmul.mubr.msk.f32.gmra.mrb[2].mxu0 %vm684_vm2, %v10766_v42  ;;  %v6465_v10 = vld [vmem:[%s9214_s26 + $0x1d80] sm:$0xff]  ;;  %v6538_v58 = vld [vmem:[%s9214_s26 + $0x1f88] sm:$0xff]  ;;  %v8378_v40 = vpack.c.bf16 %v6534_v35, %v6531_v9 }
 0x27e   : > { %8355 = vmatpush1.bf16.msra.mxu0 %v8354_v45  ;;  %8325 = vmatprep.subr.bf16.mxu1 %v8324_v39  ;;  %v6523_v45 = vld [vmem:[%s9214_s26 + $0x1f10] sm:$0xff]  ;;  %v10795_v39 = vsel %vm1449_vm4, %v4789_v48, %v4790_v46  ;;  %v8336_v37 = vpack.c.bf16 %v6468_v26, %v6465_v10  ;;  %v6494_v48 = vld [vmem:[%s9214_s26 + $0x1e28] sm:$0xff]  ;;  %v6497_v26 = vld [vmem:[%s9214_s26 + $0x1e40] sm:$0xff] }
 0x27f   : > { %8357 = vmatprep.subr.bf16.mxu0 %v8356_v53  ;;  %4543 = vmatprep.mubr.f32.mxu0 %v9009_v43  ;;  %v8368_v34 = vpack.c.bf16 %v6523_v45, %v6520_v62  ;;  %v6471_v53 = vld [vmem:[%s9214_s26 + $0x1db0] sm:$0xff]  ;;  %v8430_v49 = vpack.c.bf16 %v6494_v48, %v6491_v14  ;;  %v6500_v62 = vld [vmem:[%s9214_s26 + $0x1e58] sm:$0xff]  ;;  %v6546_v45 = vld [vmem:[%s9214_s26 + $0x1fc8] sm:$0xff] }
 0x280   : > { %v8340_v57 = vpack.c.bf16 %v6474_v41, %v6471_v53  ;;  %v6543_v10 = vld [vmem:[%s9214_s26 + $0x1fb0] sm:$0xff]  ;;  %v6553_v8 = vld [vmem:[%s9214_s26 + $0x2000] sm:$0xff] }
 0x281   : > { %8327 = vmatpush3.bf16.msra.mxu1 %v8326_v2  ;;  %6483 = vmatmul.mubr.msk.f32.gmra.mrb[4].mxu0 %vm684_vm2, %v10774_v17  ;;  %v6525_v2 = vld [vmem:[%s9214_s26 + $0x1f20] sm:$0xff]  ;;  %v8386_v56 = vpack.c.bf16 %v6546_v45, %v6543_v10 }
 0x282   : > { %8359 = vmatpush1.bf16.msra.mxu0 %v8358_v51  ;;  %8329 = vmatprep.subr.bf16.mxu1 %v8328_v32  ;;  %v8372_v51 = vpack.c.bf16 %v6529_v16, %v6526_v12  ;;  %v6532_v32 = vld [vmem:[%s9214_s26 + $0x1f58] sm:$0xff]  ;;  %v8374_v15 = vpack.c.bf16 %v6528_v18, %v6525_v2  ;;  %v6549_v41 = vld [vmem:[%s9214_s26 + $0x1fe0] sm:$0xff]  ;;  %v6503_v12 = vld [vmem:[%s9214_s26 + $0x1e70] sm:$0xff] }
 0x283   : > { %8361 = vmatprep.subr.bf16.mxu0 %v8360_v28  ;;  %4549 = vmatprep.mubr.f32.mxu0 %v9009_v43  ;;  %v6539_v28 = vld [vmem:[%s9214_s26 + $0x1f90] sm:$0xff]  ;;  %v6506_v16 = vld [vmem:[%s9214_s26 + $0x1e88] sm:$0xff]  ;;  %v6557_v2 = vld [vmem:[%s9214_s26 + $0x2020] sm:$0xff] }
 0x284   : > { %v6509_v9 = vld [vmem:[%s9214_s26 + $0x1ea0] sm:$0xff] }
 0x285   : > { %8331 = vmatpush3.bf16.msra.mxu1 %v8330_v54  ;;  %6484 = vmatmul.mubr.msk.f32.gmra.mrb[6].mxu0 %vm684_vm2, %v10786_v31  ;;  %v6545_v54 = vld [vmem:[%s9214_s26 + $0x1fc0] sm:$0xff] }
 0x286   : > { %8363 = vmatpush1.bf16.msra.mxu0 %v8362_v27  ;;  %8333 = vmatprep.subr.bf16.mxu1 %v8332_v13  ;;  %v6548_v27 = vld [vmem:[%s9214_s26 + $0x1fd8] sm:$0xff] }
 0x287   : > { %8365 = vmatprep.subr.bf16.mxu0 %v8364_v24  ;;  %5023 = vmatprep.mubr.f32.mxu0 %v10795_v39  ;;  %v8432_v22 = vpack.c.bf16 %v6548_v27, %v6545_v54  ;;  %v6518_v54 = vld [vmem:[%s9214_s26 + $0x1ee8] sm:$0xff] }
 0x288   : > { %4621 = vmatmul.mubr.f32.vlgmr.msra.gmra.mrb[68].mxu1 %v10667_v50  ;;  %v6480_v50 = vld [vmem:[%s9214_s26 + $0x1df8] sm:$0xff] }
 0x289   : > { %8335 = vmatpush3.bf16.msra.mxu1 %v8332_v13  ;;  %4625 = vmatprep.mubr.f32.mxu1 %v10672_v61  ;;  %v6535_v61 = vld [vmem:[%s9214_s26 + $0x1f70] sm:$0xff]  ;;  %v8344_v3 = vpack.c.bf16 %v6480_v50, %v6477_v23  ;;  %v6556_v23 = vld [vmem:[%s9214_s26 + $0x2018] sm:$0xff] }
 0x28a   : > { %8367 = vmatpush1.bf16.msra.mxu0 %v8366_v19  ;;  %8337 = vmatprep.subr.bf16.mxu1 %v8336_v37  ;;  %v8376_v30 = vpack.c.bf16 %v6535_v61, %v6532_v32  ;;  %v6547_v13 = vld [vmem:[%s9214_s26 + $0x1fd0] sm:$0xff]  ;;  %v8438_v32 = vpack.c.bf16 %v6506_v16, %v6503_v12  ;;  %v6578_v16 = vld [vmem:[%s9214_s26 + $0x20c8] sm:$0xff] }
 0x28b   : > { %8369 = vmatprep.subr.bf16.mxu0 %v8368_v34  ;;  %v6551_v19 = vld [vmem:[%s9214_s26 + $0x1ff0] sm:$0xff]  ;;  %v8434_v34 = vpack.c.bf16 %v6500_v62, %v6497_v26  ;;  %v6568_v26 = vld [vmem:[%s9214_s26 + $0x2078] sm:$0xff] }
 0x28c   : > { %4626 = vmatmul.mubr.f32.gmra.mrb[70].mxu1 %v10684_v33  ;;  %v6542_v33 = vld [vmem:[%s9214_s26 + $0x1fa8] sm:$0xff]  ;;  %v6571_v62 = vld [vmem:[%s9214_s26 + $0x2090] sm:$0xff] }
 0x28d   : > { %8339 = vmatpush3.bf16.msra.mxu1 %v8336_v37  ;;  %4630 = vmatprep.mubr.f32.mxu1 %v10690_v21  ;;  %v6541_v21 = vld [vmem:[%s9214_s26 + $0x1fa0] sm:$0xff]  ;;  %v8428_v59 = vpack.c.bf16 %v6542_v33, %v6539_v28  ;;  %v6554_v37 = vld [vmem:[%s9214_s26 + $0x2008] sm:$0xff]  ;;  %v6575_v12 = vld [vmem:[%s9214_s26 + $0x20b0] sm:$0xff] }
 0x28e   : > { %8371 = vmatpush1.bf16.msra.mxu0 %v8370_v52  ;;  %8341 = vmatprep.subr.bf16.mxu1 %v8340_v57  ;;  %v8380_v46 = vpack.c.bf16 %v6541_v21, %v6538_v58  ;;  %v8436_v53 = vpack.c.bf16 %v6554_v37, %v6551_v19  ;;  %v6558_v33 = vld [vmem:[%s9214_s26 + $0x2028] sm:$0xff]  ;;  %v6567_v37 = vld [vmem:[%s9214_s26 + $0x2070] sm:$0xff] }
 0x28f   : > { %8373 = vmatprep.subr.bf16.mxu0 %v8372_v51  ;;  %v6560_v51 = vld [vmem:[%s9214_s26 + $0x2038] sm:$0xff]  ;;  %v6566_v58 = vld [vmem:[%s9214_s26 + $0x2068] sm:$0xff] }
 0x290   : > { %4631 = vmatmul.mubr.f32.gmra.mrb[72].mxu1 %v10701_v29  ;;  %v6540_v29 = vld [vmem:[%s9214_s26 + $0x1f98] sm:$0xff] }
 0x291   : > { %8343 = vmatpush3.bf16.msra.mxu1 %v8340_v57  ;;  %4635 = vmatprep.mubr.f32.mxu1 %v10710_v63  ;;  %v6544_v63 = vld [vmem:[%s9214_s26 + $0x1fb8] sm:$0xff]  ;;  %v8382_v24 = vpack.c.bf16 %v6540_v29, %v6537_v36  ;;  %v6515_v29 = vld [vmem:[%s9214_s26 + $0x1ed0] sm:$0xff] }
 0x292   : > { %8375 = vmatpush1.bf16.msra.mxu0 %v8374_v15  ;;  %8345 = vmatprep.subr.bf16.mxu1 %v8344_v3  ;;  %v6552_v57 = vld [vmem:[%s9214_s26 + $0x1ff8] sm:$0xff]  ;;  %v8440_v15 = vpack.c.bf16 %v6560_v51, %v6557_v2  ;;  %v8446_v45 = vpack.c.bf16 %v6518_v54, %v6515_v29  ;;  %v6589_v29 = vld [vmem:[%s9214_s26 + $0x2120] sm:$0xff] }
 0x293   : > { %8377 = vmatprep.subr.bf16.mxu0 %v8376_v30  ;;  %v8390_v61 = vpack.c.bf16 %v6552_v57, %v6549_v41  ;;  %v6512_v30 = vld [vmem:[%s9214_s26 + $0x1eb8] sm:$0xff]  ;;  %v6570_v41 = vld [vmem:[%s9214_s26 + $0x2088] sm:$0xff]  ;;  %v6577_v57 = vld [vmem:[%s9214_s26 + $0x20c0] sm:$0xff] }
 0x294   : > { %4636 = vmatmul.mubr.f32.gmra.mrb[74].mxu1 %v10721_v1  ;;  %v8384_v1 = vpack.c.bf16 %v6547_v13, %v6544_v63  ;;  %v8442_v14 = vpack.c.bf16 %v6512_v30, %v6509_v9  ;;  %v8402_v51 = vpack.c.bf16 %v6570_v41, %v6567_v37  ;;  %v6584_v9 = vld [vmem:[%s9214_s26 + $0x20f8] sm:$0xff] }
 0x295   : > { %8347 = vmatpush3.bf16.msra.mxu1 %v8344_v3  ;;  %7296 = vmatprep.mubr.msk.f32.mxu1 %vm684_vm2, %v10740_v5  ;;  %v6550_v5 = vld [vmem:[%s9214_s26 + $0x1fe8] sm:$0xff]  ;;  %v6555_v3 = vld [vmem:[%s9214_s26 + $0x2010] sm:$0xff]  ;;  %v6580_v30 = vld [vmem:[%s9214_s26 + $0x20d8] sm:$0xff] }
 0x296   : > { %8379 = vmatpush1.bf16.msra.mxu0 %v8378_v40  ;;  %8429 = vmatprep.subr.bf16.mxu1 %v8428_v59  ;;  %v8388_v52 = vpack.c.bf16 %v6553_v8, %v6550_v5  ;;  %v6562_v40 = vld [vmem:[%s9214_s26 + $0x2048] sm:$0xff]  ;;  %v6565_v59 = vld [vmem:[%s9214_s26 + $0x2060] sm:$0xff]  ;;  %v6524_v8 = vld [vmem:[%s9214_s26 + $0x1f18] sm:$0xff] }
 0x297   : > { %8381 = vmatprep.subr.bf16.mxu0 %v8380_v46  ;;  %v6561_v46 = vld [vmem:[%s9214_s26 + $0x2040] sm:$0xff]  ;;  %v8396_v13 = vpack.c.bf16 %v6565_v59, %v6562_v40  ;;  %v6536_v40 = vld [vmem:[%s9214_s26 + $0x1f78] sm:$0xff] }
 0x298   : > { %7297 = vmatmul.mubr.msk.f32.vlgmr.msra.gmra.mrb[16].mxu1 %vm684_vm2, %v10766_v42  ;;  %v6521_v5 = vld [vmem:[%s9214_s26 + $0x1f00] sm:$0xff]  ;;  %v4745_v54 = vld [vmem:[#allocation2 + $0x98] sm:$0xfc] }
 0x299   : > { %8431 = vmatpush3.bf16.msra.mxu1 %v8430_v49  ;;  %7299 = vmatprep.mubr.msk.f32.mxu1 %vm684_vm2, %v10774_v17  ;;  %v6559_v17 = vld [vmem:[%s9214_s26 + $0x2030] sm:$0xff]  ;;  %v6564_v49 = vld [vmem:[%s9214_s26 + $0x2058] sm:$0xff]  ;;  %v4738_v59 = vld [vmem:[#allocation2 + $0x60] sm:$0xfc] }
 0x29a   : > { %8383 = vmatpush1.bf16.msra.mxu0 %v8382_v24  ;;  %8433 = vmatprep.subr.bf16.mxu1 %v8432_v22  ;;  %v8392_v28 = vpack.c.bf16 %v6559_v17, %v6556_v23  ;;  %v6569_v24 = vld [vmem:[%s9214_s26 + $0x2080] sm:$0xff]  ;;  %v6572_v22 = vld [vmem:[%s9214_s26 + $0x2098] sm:$0xff]  ;;  %v6527_v17 = vld [vmem:[%s9214_s26 + $0x1f30] sm:$0xff] }
 0x29b   : > { %v6822_v42 = vpop.f32.mrb[36].mxu1  ;;  %8385 = vmatprep.subr.bf16.mxu0 %v8384_v1  ;;  %v8448_v19 = vpack.c.bf16 %v6572_v22, %v6569_v24  ;;  %v6573_v23 = vld [vmem:[%s9214_s26 + $0x20a0] sm:$0xff] }
 0x29c   : > { %v6823_v18 = vpop.f32.mrb[37].mxu1  ;;  %7300 = vmatmul.mubr.msk.f32.gmra.mrb[18].mxu1 %vm684_vm2, %v10786_v31 }
 0x29d   : > { %v6824_v50 = vadd.f32 %v6823_v18, %v6822_v42  ;;  %8435 = vmatpush3.bf16.msra.mxu1 %v8434_v34  ;;  %5201 = vmatprep.mubr.f32.mxu1 %v10795_v39  ;;  %v6563_v39 = vld [vmem:[%s9214_s26 + $0x2050] sm:$0xff]  ;;  %v8452_v18 = vpack.c.bf16 %v6578_v16, %v6575_v12 }
 0x29e   : > { %8387 = vmatpush1.bf16.msra.mxu0 %v8386_v56  ;;  %8437 = vmatprep.subr.bf16.mxu1 %v8436_v53  ;;  %v8444_v48 = vpack.c.bf16 %v6566_v58, %v6563_v39  ;;  %v8400_v53 = vpack.c.bf16 %v6571_v62, %v6568_v26  ;;  %v6582_v39 = vld [vmem:[%s9214_s26 + $0x20e8] sm:$0xff]  ;;  %v6533_v58 = vld [vmem:[%s9214_s26 + $0x1f60] sm:$0xff]  ;;  %v4744_v26 = vld [vmem:[#allocation2 + $0x90] sm:$0xfc] }
 0x29f   : > { %v10862_v35 = vadd.f32 %v10707_v55, %v6824_v50  ;;  %v6825_v31 = vpop.f32.mrb[38].mxu1  ;;  %8389 = vmatprep.subr.bf16.mxu0 %v8388_v52  ;;  %v8394_v55 = vpack.c.bf16 %v6558_v33, %v6555_v3  ;;  %v6574_v52 = vld [vmem:[%s9214_s26 + $0x20a8] sm:$0xff]  ;;  %v6581_v3 = vld [vmem:[%s9214_s26 + $0x20e0] sm:$0xff]  ;;  %v6579_v33 = vld [vmem:[%s9214_s26 + $0x20d0] sm:$0xff]  ;;  %v4795_v12 = vrot.slane %v4744_v26, 2 }
 0x2a0   : > { %v6826_v21 = vpop.f32.mrb[39].mxu1  ;;  %v6530_v50 = vld [vmem:[%s9214_s26 + $0x1f48] sm:$0xff]  ;;  %v8410_v22 = vpack.c.bf16 %v6582_v39, %v6579_v33  ;;  %v6608_v26 = vld [vmem:[%s9214_s26 + $0x21b8] sm:$0xff] }
 0x2a1   : > { %v6827_v36 = vadd.f32 %v6826_v21, %v6825_v31  ;;  %8439 = vmatpush3.bf16.msra.mxu1 %v8438_v32  ;;  %v6583_v31 = vld [vmem:[%s9214_s26 + $0x20f0] sm:$0xff]  ;;  %v8456_v21 = vpack.c.bf16 %v6584_v9, %v6581_v3  ;;  %v4747_v62 = vld [vmem:[#allocation2 + $0xa8] sm:$0x3]  ;;  %v6601_v9 = vld [vmem:[%s9214_s26 + $0x2180] sm:$0xff] }
 0x2a2   : > { %8391 = vmatpush1.bf16.msra.mxu0 %v8390_v61  ;;  %8441 = vmatprep.subr.bf16.mxu1 %v8440_v15  ;;  %v8404_v61 = vpack.c.bf16 %v6577_v57, %v6574_v52  ;;  %v6576_v15 = vld [vmem:[%s9214_s26 + $0x20b8] sm:$0xff]  ;;  %v4796_v16 = vrot.slane %v4747_v62, 2  ;;  %v4740_v62 = vld [vmem:[#allocation2 + $0x70] sm:$0xfc] }
 0x2a3   : > { %v10873_v27 = vadd.f32 %v10727_v25, %v6827_v36  ;;  %v6828_v63 = vpop.f32.mrb[40].mxu1  ;;  %8393 = vmatprep.subr.bf16.mxu0 %v8392_v28  ;;  %v8398_v25 = vpack.c.bf16 %v6564_v49, %v6561_v46  ;;  %v8454_v28 = vpack.c.bf16 %v6530_v50, %v6527_v17  ;;  %v4741_v36 = vld [vmem:[#allocation2 + $0x78] sm:$0x3]  ;;  %v6590_v46 = vld [vmem:[%s9214_s26 + $0x2128] sm:$0xff]  ;;  %v4786_v49 = vrot.slane %v4738_v59, 2 }
 0x2a4   : > { %v6829_v10 = vpop.f32.mrb[41].mxu1  ;;  %v4787_v24 = vrot.slane %v4741_v36, 2  ;;  %v6596_v52 = vld [vmem:[%s9214_s26 + $0x2158] sm:$0xff]  ;;  %v6594_v17 = vld [vmem:[%s9214_s26 + $0x2148] sm:$0xff] }
 0x2a5   : > { %v6830_v1 = vadd.f32 %v6829_v10, %v6828_v63  ;;  %8443 = vmatpush3.bf16.msra.mxu1 %v8442_v14  ;;  %v8408_v14 = vpack.c.bf16 %v6583_v31, %v6580_v30  ;;  %v4748_v63 = vld [vmem:[#allocation2 + $0xb0] sm:$0x3]  ;;  %v4757_v30 = vld [vmem:[#allocation2 + $0xf8] sm:$0xfc]  ;;  %v4759_v59 = vld [vmem:[#allocation2 + $0x108] sm:$0x3] }
 0x2a6   : > { %8395 = vmatpush1.bf16.msra.mxu0 %v8394_v55  ;;  %8445 = vmatprep.subr.bf16.mxu1 %v8444_v48  ;;  %v6586_v55 = vld [vmem:[%s9214_s26 + $0x2108] sm:$0xff]  ;;  %v6587_v48 = vld [vmem:[%s9214_s26 + $0x2110] sm:$0xff]  ;;  %v4799_v37 = vrot.slane %v4748_v63, 2  ;;  %v4788_v41 = vsel %vm1449_vm4, %v4786_v49, %v4787_v24  ;;  %v6605_v24 = vld [vmem:[%s9214_s26 + $0x21a0] sm:$0xff] }
 0x2a7   : > { %v10884_v34 = vadd.f32 %v10746_v60, %v6830_v1  ;;  %v6831_v56 = vpop.f32.mrb[42].mxu1  ;;  %8397 = vmatprep.subr.bf16.mxu0 %v8396_v13  ;;  %v8450_v60 = vpack.c.bf16 %v6524_v8, %v6521_v5  ;;  %v8458_v13 = vpack.c.bf16 %v6536_v40, %v6533_v58  ;;  %v8460_v10 = vpack.c.bf16 %v6590_v46, %v6587_v48  ;;  %v6592_v5 = vld [vmem:[%s9214_s26 + $0x2138] sm:$0xff]  ;;  %v6595_v8 = vld [vmem:[%s9214_s26 + $0x2150] sm:$0xff] }
 0x2a8   : > { %v6832_v42 = vpop.f32.mrb[43].mxu1  ;;  %v8412_v1 = vpack.c.bf16 %v6589_v29, %v6586_v55  ;;  %v4760_v31 = vld [vmem:[#allocation2 + $0x110] sm:$0x3]  ;;  %v6597_v55 = vld [vmem:[%s9214_s26 + $0x2160] sm:$0xff]  ;;  %v6600_v48 = vld [vmem:[%s9214_s26 + $0x2178] sm:$0xff]  ;;  %v4816_v46 = vrot.slane %v4757_v30, 2 }
 0x2a9   : > { %v6833_v2 = vadd.f32 %v6832_v42, %v6831_v56  ;;  %8447 = vmatpush3.bf16.msra.mxu1 %v8446_v45  ;;  %v6585_v45 = vld [vmem:[%s9214_s26 + $0x2100] sm:$0xff]  ;;  %v4751_v56 = vld [vmem:[#allocation2 + $0xc8] sm:$0xfc]  ;;  %v6599_v58 = vld [vmem:[%s9214_s26 + $0x2170] sm:$0xff]  ;;  %v4817_v29 = vrot.slane %v4760_v31, 2 }
 0x2aa   : > { %8399 = vmatpush1.bf16.msra.mxu0 %v8398_v25  ;;  %8449 = vmatprep.subr.bf16.mxu1 %v8448_v19  ;;  %v6588_v25 = vld [vmem:[%s9214_s26 + $0x2118] sm:$0xff]  ;;  %v4798_v19 = vrot.slane %v4745_v54, 2  ;;  %v6593_v42 = vld [vmem:[%s9214_s26 + $0x2140] sm:$0xff]  ;;  %v4807_v50 = vrot.slane %v4751_v56, 2  ;;  %v6607_v49 = vld [vmem:[%s9214_s26 + $0x21b0] sm:$0xff] }
 0x2ab   : > { %v10895_v32 = vadd.f32 %v10759_v4, %v6833_v2  ;;  %8401 = vmatprep.subr.bf16.mxu0 %v8400_v53  ;;  %v8406_v4 = vpack.c.bf16 %v6576_v15, %v6573_v23  ;;  %v4754_v53 = vld [vmem:[#allocation2 + $0xe0] sm:$0x3]  ;;  %v8414_v57 = vpack.c.bf16 %v6588_v25, %v6585_v45  ;;  %v4750_v2 = vld [vmem:[#allocation2 + $0xc0] sm:$0xfc]  ;;  %v6591_v23 = vld [vmem:[%s9214_s26 + $0x2130] sm:$0xff]  ;;  %v8464_v3 = vpack.c.bf16 %v6596_v52, %v6593_v42 }
 0x2ac   : > { %v6598_v15 = vld [vmem:[%s9214_s26 + $0x2168] sm:$0xff]  ;;  %v4804_v33 = vrot.slane %v4750_v2, 2  ;;  %v8418_v40 = vpack.c.bf16 %v6594_v17, %v6591_v23  ;;  %v8422_v45 = vpack.c.bf16 %v6600_v48, %v6597_v55  ;;  %v6603_v25 = vld [vmem:[%s9214_s26 + $0x2190] sm:$0xff]  ;;  %v4758_v23 = vld [vmem:[#allocation2 + $0x100] sm:$0xfc] }
 0x2ad   : > { %8451 = vmatpush3.bf16.msra.mxu1 %v8450_v60  ;;  %v4753_v60 = vld [vmem:[#allocation2 + $0xd8] sm:$0x3]  ;;  %v6606_v56 = vld [vmem:[%s9214_s26 + $0x21a8] sm:$0xff] }
 0x2ae   : > { %8403 = vmatpush1.bf16.msra.mxu0 %v8402_v51  ;;  %8453 = vmatprep.subr.bf16.mxu1 %v8452_v18  ;;  %v4800_v51 = vsel %vm1449_vm4, %v4798_v19, %v4799_v37  ;;  %v8416_v18 = vpack.c.bf16 %v6595_v8, %v6592_v5  ;;  %v4805_v39 = vrot.slane %v4753_v60, 2  ;;  %v4746_v19 = vld [vmem:[#allocation2 + $0xa0] sm:$0xfc]  ;;  %v4749_v37 = vld [vmem:[#allocation2 + $0xb8] sm:$0x3]  ;;  %v4818_v5 = vsel %vm1449_vm4, %v4816_v46, %v4817_v29 }
 0x2af   : > { %8405 = vmatprep.subr.bf16.mxu0 %v8404_v61  ;;  %v4808_v61 = vrot.slane %v4754_v53, 2  ;;  %v4752_v53 = vld [vmem:[#allocation2 + $0xd0] sm:$0xfc]  ;;  %v4802_v2 = vrot.slane %v4749_v37, 2  ;;  %v8426_v60 = vpack.c.bf16 %v6606_v56, %v6603_v25  ;;  %v4761_v17 = vld [vmem:[#allocation2 + $0x118] sm:$0x3] }
 0x2b1   : > { %8455 = vmatpush3.bf16.msra.mxu1 %v8454_v28  ;;  %v4797_v28 = vsel %vm1449_vm4, %v4795_v12, %v4796_v16  ;;  %v4809_v36 = vsel %vm1449_vm4, %v4807_v50, %v4808_v61  ;;  %v8472_v12 = vpack.c.bf16 %v6608_v26, %v6605_v24  ;;  %v4792_v16 = vrot.slane %v4740_v62, 2 }
 0x2b2   : > { %8407 = vmatpush1.bf16.msra.mxu0 %v8406_v4  ;;  %8457 = vmatprep.subr.bf16.mxu1 %v8456_v21  ;;  %v6602_v4 = vld [vmem:[%s9214_s26 + $0x2188] sm:$0xff]  ;;  %v4756_v21 = vld [vmem:[#allocation2 + $0xf0] sm:$0xfc] }
 0x2b3   : > { %8409 = vmatprep.subr.bf16.mxu0 %v8408_v14  ;;  %v8420_v14 = vpack.c.bf16 %v6601_v9, %v6598_v15  ;;  %v8468_v54 = vpack.c.bf16 %v6602_v4, %v6599_v58  ;;  %v4813_v63 = vrot.slane %v4756_v21, 2  ;;  %v4819_v15 = vrot.slane %v4758_v23, 2 }
 0x2b5   : > { %8459 = vmatpush3.bf16.msra.mxu1 %v8458_v13  ;;  %v6604_v13 = vld [vmem:[%s9214_s26 + $0x2198] sm:$0xff] }
 0x2b6   : > { %8411 = vmatpush1.bf16.msra.mxu0 %v8410_v22  ;;  %8461 = vmatprep.subr.bf16.mxu1 %v8460_v10  ;;  %v4806_v22 = vsel %vm1449_vm4, %v4804_v33, %v4805_v39  ;;  %v8424_v8 = vpack.c.bf16 %v6607_v49, %v6604_v13 }
 0x2b7   : > { %8413 = vmatprep.subr.bf16.mxu0 %v8412_v1  ;;  %v4743_v1 = vld [vmem:[#allocation2 + $0x88] sm:$0x3] }
 0x2b8   : > { %5202 = vmatmul.mubr.f32.vlgmr.msra.gmra.mrb[76].mxu1 %v4788_v41  ;;  %v4793_v42 = vrot.slane %v4743_v1, 2 }
 0x2b9   : > { %5024 = vmatmul.mubr.f32.vlgmr.msra.gmra.mrb[0].mxu0 %v4788_v41  ;;  %8463 = vmatpush3.bf16.msra.mxu1 %v8460_v10  ;;  %v4814_v10 = vrot.slane %v4759_v59, 2  ;;  %v4755_v41 = vld [vmem:[#allocation2 + $0xe8] sm:$0x3] }
 0x2ba   : > { %8415 = vmatpush1.bf16.msra.mxu0 %v8414_v57  ;;  %5029 = vmatprep.mubr.f32.mxu0 %v4800_v51  ;;  %v4801_v57 = vrot.slane %v4746_v19, 2  ;;  %v4794_v50 = vsel %vm1449_vm4, %v4792_v16, %v4793_v42 }
 0x2bb   : > { %5206 = vmatprep.mubr.f32.mxu1 %v4800_v51  ;;  %8417 = vmatprep.subr.bf16.mxu0 %v8416_v18  ;;  %v4815_v52 = vsel %vm1449_vm4, %v4813_v63, %v4814_v10  ;;  %v4810_v51 = vrot.slane %v4752_v53, 2  ;;  %v4811_v18 = vrot.slane %v4755_v41, 2 }
 0x2bc   : > { %5207 = vmatmul.mubr.f32.gmra.mrb[78].mxu1 %v4797_v28  ;;  %8465 = vmatprep.subr.bf16.mxu1 %v8464_v3  ;;  %v4803_v61 = vsel %vm1449_vm4, %v4801_v57, %v4802_v2 }
 0x2bd   : > { %5030 = vmatmul.mubr.f32.gmra.mrb[2].mxu0 %v4797_v28  ;;  %8467 = vmatpush3.bf16.msra.mxu1 %v8464_v3  ;;  %v4820_v3 = vrot.slane %v4761_v17, 2  ;;  %v4812_v9 = vsel %vm1449_vm4, %v4810_v51, %v4811_v18 }
 0x2be   : > { %8419 = vmatpush1.bf16.msra.mxu0 %v8418_v40  ;;  %5035 = vmatprep.mubr.f32.mxu0 %v4809_v36 }
 0x2bf   : > { %5211 = vmatprep.mubr.f32.mxu1 %v4809_v36  ;;  %8421 = vmatprep.subr.bf16.mxu0 %v8420_v14  ;;  %v4821_v30 = vsel %vm1449_vm4, %v4819_v15, %v4820_v3 }
 0x2c0   : > { %5212 = vmatmul.mubr.f32.gmra.mrb[80].mxu1 %v4806_v22  ;;  %8469 = vmatprep.subr.bf16.mxu1 %v8468_v54 }
 0x2c1   : > { %5036 = vmatmul.mubr.f32.gmra.mrb[4].mxu0 %v4806_v22  ;;  %8471 = vmatpush3.bf16.msra.mxu1 %v8468_v54 }
 0x2c2   : > { %8423 = vmatpush1.bf16.msra.mxu0 %v8422_v45  ;;  %5041 = vmatprep.mubr.f32.mxu0 %v4818_v5 }
 0x2c3   : > { %5216 = vmatprep.mubr.f32.mxu1 %v4818_v5  ;;  %8425 = vmatprep.subr.bf16.mxu0 %v8424_v8 }
 0x2c4   : > { %5217 = vmatmul.mubr.f32.gmra.mrb[82].mxu1 %v4815_v52  ;;  %8473 = vmatprep.subr.bf16.mxu1 %v8472_v12 }
 0x2c5   : > { %5042 = vmatmul.mubr.f32.gmra.mrb[6].mxu0 %v4815_v52  ;;  %8475 = vmatpush3.bf16.msra.mxu1 %v8472_v12 }
 0x2c6   : > { %8427 = vmatpush1.bf16.msra.mxu0 %v8426_v60  ;;  %5112 = vmatprep.mubr.f32.mxu0 %v9009_v43 }
 0x2c7   : > { %7318 = vmatprep.mubr.msk.f32.mxu1 %vm684_vm2, %v4794_v50 }
 0x2c8   : > { %7319 = vmatmul.mubr.msk.f32.vlgmr.msra.gmra.mrb[16].mxu1 %vm684_vm2, %v4803_v61 }
 0x2c9   : > { %6609 = vmatmul.mubr.msk.f32.vlgmr.msra.gmra.mrb[0].mxu0 %vm684_vm2, %v4794_v50  ;;  %7321 = vmatprep.mubr.msk.f32.mxu1 %vm684_vm2, %v4812_v9 }
 0x2ca   : > { %5118 = vmatprep.mubr.f32.mxu0 %v9009_v43 }
 0x2cb   : > { %v6878_v31 = vpop.f32.mrb[44].mxu1 }
 0x2cc   : > { %v6879_v28 = vpop.f32.mrb[45].mxu1  ;;  %7322 = vmatmul.mubr.msk.f32.gmra.mrb[18].mxu1 %vm684_vm2, %v4821_v30 }
 0x2cd   : > { %v6880_v33 = vadd.f32 %v6879_v28, %v6878_v31  ;;  %6610 = vmatmul.mubr.msk.f32.gmra.mrb[2].mxu0 %vm684_vm2, %v4803_v61 }
 0x2ce   : > { %5124 = vmatprep.mubr.f32.mxu0 %v9009_v43 }
 0x2cf   : > { %v8496_v39 = vadd.f32 %v10862_v35, %v6880_v33  ;;  %v6881_v58 = vpop.f32.mrb[46].mxu1 }
 0x2d0   : > { %v6882_v4 = vpop.f32.mrb[47].mxu1 }
 0x2d1   : > { %v6883_v21 = vadd.f32 %v6882_v4, %v6881_v58  ;;  %6611 = vmatmul.mubr.msk.f32.gmra.mrb[4].mxu0 %vm684_vm2, %v4812_v9 }
 0x2d2   : > { %5130 = vmatprep.mubr.f32.mxu0 %v9009_v43 }
 0x2d3   : > { %v8487_v40 = vadd.f32 %v10873_v27, %v6883_v21  ;;  %v6884_v59 = vpop.f32.mrb[48].mxu1 }
 0x2d4   : > { %v6885_v36 = vpop.f32.mrb[49].mxu1 }
 0x2d5   : > { %v6886_v14 = vadd.f32 %v6885_v36, %v6884_v59  ;;  %6612 = vmatmul.mubr.msk.f32.gmra.mrb[6].mxu0 %vm684_vm2, %v4821_v30 }
 0x2d7   : > { %v8514_v55 = vadd.f32 %v10884_v34, %v6886_v14  ;;  %v6887_v48 = vpop.f32.mrb[50].mxu1 }
 0x2d8   : > { %v6888_v46 = vpop.f32.mrb[51].mxu1 }
 0x2d9   : > { %v6889_v29 = vadd.f32 %v6888_v46, %v6887_v48 }
 0x2db   : > { %v8505_v35 = vadd.f32 %v10895_v32, %v6889_v29 }
 0x2fb   : > { %v6934_v54 = vpop.f32.mrb[52].mxu1 }
 0x2fc   : > { %v6935_v63 = vpop.f32.mrb[53].mxu1 }
 0x2fd   : > { %v6936_v13 = vadd.f32 %v6935_v63, %v6934_v54 }
 0x2ff   : > { %v8497_v49 = vadd.f32 %v8496_v39, %v6936_v13  ;;  %v6937_v24 = vpop.f32.mrb[54].mxu1 }
 0x300   : > { %v6938_v43 = vpop.f32.mrb[55].mxu1 }
 0x301   : > { %v6939_v22 = vadd.f32 %v6938_v43, %v6937_v24 }
 0x303   : > { %v8488_v27 = vadd.f32 %v8487_v40, %v6939_v22  ;;  %v6940_v10 = vpop.f32.mrb[56].mxu1 }
 0x304   : > { %v6941_v26 = vpop.f32.mrb[57].mxu1 }
 0x305   : > { %v6942_v62 = vadd.f32 %v6941_v26, %v6940_v10 }
 0x307   : > { %v8515_v1 = vadd.f32 %v8514_v55, %v6942_v62  ;;  %v6943_v45 = vpop.f32.mrb[58].mxu1  ;;  %v5321_v55 = vlaneseq }
 0x308   : > { %v6944_v25 = vpop.f32.mrb[59].mxu1 }
 0x309   : > { %v6945_v34 = vadd.f32 %v6944_v25, %v6943_v45  ;;  %v5322_v54 = vshrl.u32 %v5321_v55, 7 }
 0x30b   : > { %v8506_v19 = vadd.f32 %v8505_v35, %v6945_v34  ;;  %v5331_v43 = vsub.s32 2, %v5322_v54  ;;  %v5323_v10 = vsub.s32 0, %v5322_v54 }
 0x32b   : > { %v6990_v37 = vpop.f32.mrb[60].mxu1 }
 0x32c   : > { %v6991_v5 = vpop.f32.mrb[61].mxu1 }
 0x32d   : > { %v6992_v8 = vadd.f32 %v6991_v5, %v6990_v37 }
 0x32f   : > { %v8498_v32 = vadd.f32 %v8497_v49, %v6992_v8  ;;  %v6993_v56 = vpop.f32.mrb[62].mxu1 }
 0x330   : > { %v6994_v53 = vpop.f32.mrb[63].mxu1 }
 0x331   : > { %v6995_v41 = vadd.f32 %v6994_v53, %v6993_v56 }
 0x333   : > { %v8489_v12 = vadd.f32 %v8488_v27, %v6995_v41  ;;  %v6996_v16 = vpop.f32.mrb[64].mxu1  ;;  %v5319_v27 = vld [vmem:[%s9220_s5] sm:$0x7]  ;;  %v5349_v41 = vstv %s5348_s4 }
 0x334   : > { %v6997_v42 = vpop.f32.mrb[65].mxu1  ;;  %v5332_v25 = vrot.slane %v5319_v27, %v5331_v43  ;;  %v5324_v34 = vrot.slane %v5319_v27, %v5323_v10 }
 0x335   : > { %v6998_v52 = vadd.f32 %v6997_v42, %v6996_v16 }
 0x337   : > { %v8516_v57 = vadd.f32 %v8515_v1, %v6998_v52  ;;  %v6999_v2 = vpop.f32.mrb[66].mxu1  ;;  %v5327_v1 = vsub.s32 1, %v5322_v54 }
 0x338   : > { %v7000_v60 = vpop.f32.mrb[67].mxu1 }
 0x339   : > { %v7001_v51 = vadd.f32 %v7000_v60, %v6999_v2 }
 0x33b   : > { %v8507_v18 = vadd.f32 %v8506_v19, %v7001_v51 }
 0x35b   : > { %v7046_v23 = vpop.f32.mrb[68].mxu1 }
 0x35c   : > { %v7047_v17 = vpop.f32.mrb[69].mxu1 }
 0x35d   : > { %v7048_v50 = vadd.f32 %v7047_v17, %v7046_v23 }
 0x35f   : > { %v8499_v61 = vadd.f32 %v8498_v32, %v7048_v50  ;;  %v7049_v15 = vpop.f32.mrb[70].mxu1  ;;  %v5328_v32 = vrot.slane %v5319_v27, %v5327_v1 }
 0x360   : > { %v7050_v3 = vpop.f32.mrb[71].mxu1 }
 0x361   : > { %v7051_v9 = vadd.f32 %v7050_v3, %v7049_v15 }
 0x363   : > { %v8490_v30 = vadd.f32 %v8489_v12, %v7051_v9  ;;  %v7052_v31 = vpop.f32.mrb[72].mxu1 }
 0x364   : > { %v7053_v28 = vpop.f32.mrb[73].mxu1 }
 0x365   : > { %v7054_v33 = vadd.f32 %v7053_v28, %v7052_v31 }
 0x367   : > { %v8517_v39 = vadd.f32 %v8516_v57, %v7054_v33  ;;  %v7055_v58 = vpop.f32.mrb[74].mxu1 }
 0x368   : > { %v7056_v4 = vpop.f32.mrb[75].mxu1 }
 0x369   : > { %v7057_v21 = vadd.f32 %v7056_v4, %v7055_v58 }
 0x36b   : > { %v8508_v40 = vadd.f32 %v8507_v18, %v7057_v21 }
 0x38b   : > { %v7102_v59 = vpop.f32.mrb[76].mxu1 }
 0x38c   : > { %v7103_v36 = vpop.f32.mrb[77].mxu1 }
 0x38d   : > { %v7104_v14 = vadd.f32 %v7103_v36, %v7102_v59 }
 0x38f   : > { %v7105_v48 = vpop.f32.mrb[78].mxu1  ;;  %v8500_v46 = vadd.f32 %v8499_v61, %v7104_v14 }
 0x390   : > { %v7106_v29 = vpop.f32.mrb[79].mxu1 }
 0x391   : > { %v7107_v35 = vadd.f32 %v7106_v29, %v7105_v48 }
 0x393   : > { %v7108_v63 = vpop.f32.mrb[80].mxu1  ;;  %v8491_v13 = vadd.f32 %v8490_v30, %v7107_v35 }
 0x394   : > { %v7109_v49 = vpop.f32.mrb[81].mxu1 }
 0x395   : > { %v7110_v24 = vadd.f32 %v7109_v49, %v7108_v63 }
 0x397   : > { %v7111_v22 = vpop.f32.mrb[82].mxu1  ;;  %v8518_v26 = vadd.f32 %v8517_v39, %v7110_v24 }
 0x398   : > { %v7112_v62 = vpop.f32.mrb[83].mxu1 }
 0x399   : > { %v7113_v45 = vadd.f32 %v7112_v62, %v7111_v22 }
 0x39b   : > { %v7320_v19 = vpop.f32.mrb[16].mxu1  ;;  %v8509_v37 = vadd.f32 %v8508_v40, %v7113_v45 }
 0x39c   : > { %v5114_v5 = vpop.f32.mrb[0].mxu0  ;;  %v8492_v8 = vadd.f32 %v8491_v13, %v7320_v19  ;;  %v5288_v56 = vpop.f32.mrb[17].mxu1 }
 0x39d   : > { %v8476_v53 = vadd.f32 %v5114_v5, %v10439_v44  ;;  %v5116_v12 = vpop.f32.mrb[1].mxu0  ;;  %v8501_v16 = vadd.f32 %v8500_v46, %v5288_v56 }
 0x39e   : > { %v5341_v42 = vadd.f32 %v8492_v8, %v5332_v25  ;;  %v8477_v52 = vadd.f32 %v5116_v12, %v10445_v11 }
 0x39f   : > { %v5336_v57 = vadd.f32 %v8476_v53, %v5324_v34  ;;  %v5338_v2 = vadd.f32 %v8501_v16, %v5332_v25  ;;  %v7323_v60 = vpop.f32.mrb[18].mxu1 }
 0x3a0   : > { %v10962_v51 = vmax.f32 %v5341_v42, %v5349_v41  ;;  %v5337_v18 = vadd.f32 %v8477_v52, %v5328_v32  ;;  %v5120_v23 = vpop.f32.mrb[2].mxu0  ;;  %v8510_v17 = vadd.f32 %v8509_v37, %v7323_v60  ;;  %v5298_v50 = vpop.f32.mrb[19].mxu1 }
 0x3a1   : > { %v10964_v61 = vmax.f32 %v5336_v57, %v5349_v41  ;;  %v10966_v15 = vmax.f32 %v5338_v2, %v5349_v41  ;;  %v8478_v44 = vadd.f32 %v5120_v23, %v10457_v0  ;;  %v5122_v3 = vpop.f32.mrb[3].mxu0  ;;  %v8519_v9 = vadd.f32 %v8518_v26, %v5298_v50 }
 0x3a2   : > { %v10969_v30 = vmax.f32 %v5337_v18, %v5349_v41  ;;  %v5347_v11 = vadd.f32 %v8510_v17, %v5332_v25  ;;  %v8479_v31 = vadd.f32 %v5122_v3, %v10463_v7 }
 0x3a3   : > { %v5339_v28 = vadd.f32 %v8478_v44, %v5324_v34  ;;  %v5344_v33 = vadd.f32 %v8519_v9, %v5332_v25  ;;  %v5380_v22 = vrot.slane (!%p6617_p9), %v10966_v15, 7 }
 0x3a4   : > { %v10972_v39 = vmax.f32 %v5347_v11, %v5349_v41  ;;  %v5340_v58 = vadd.f32 %v8479_v31, %v5328_v32  ;;  %v5126_v4 = vpop.f32.mrb[4].mxu0 }
 0x3a5   : > { %v10974_v21 = vmax.f32 %v5339_v28, %v5349_v41  ;;  %v10976_v40 = vmax.f32 %v5344_v33, %v5349_v41  ;;  %v8480_v59 = vadd.f32 %v5126_v4, %v10472_v20  ;;  %v5128_v0 = vpop.f32.mrb[5].mxu0  ;;  %v5378_v20 = vrot.slane (!%p6617_p9), %v10964_v61, 7  ;;  %5405 = vst.msk [vmem:[#allocation2 + $0x40] sm:$0xfe] (!%p6617_p9), %vm5404_vm5, %v5380_v22 }
 0x3a6   : > { %v5354_v36 = vmax.f32 %v5340_v58, %v5349_v41  ;;  %v8481_v14 = vadd.f32 %v5128_v0, %v10478_v47  ;;  %v5379_v47 = vrot.slane (!%p6617_p9), %v10969_v30, 7  ;;  %5409 = vst.msk [vmem:[#allocation2 + $0x58] sm:$0x1] (!%p6617_p9), %vm5408_vm6, %v5380_v22  ;;  %v5389_v25 = vrot.slane (!%p6617_p9), %v10972_v39, 7 }
 0x3a7   : > { %v5342_v55 = vadd.f32 %v8480_v59, %v5324_v34  ;;  %5402 = vst [vmem:[#allocation2 + $0x30] sm:$0xfe] (!%p6617_p9), %v5378_v20  ;;  %5406 = vst [vmem:[#allocation2 + $0x48] sm:$0x1] (!%p6617_p9), %v5378_v20  ;;  %v5386_v62 = vrot.slane (!%p6617_p9), %v10976_v40, 7 }
 0x3a8   : > { %v5343_v48 = vadd.f32 %v8481_v14, %v5328_v32  ;;  %v5132_v46 = vpop.f32.mrb[6].mxu0  ;;  %5365 = sbr.rel (%p6617_p9) target bundleno = 947 (0x3b3), region = 48  ;;  %v5382_v27 = vrot.slane (!%p6617_p9), %v5354_v36, 7  ;;  %5403 = vst [vmem:[#allocation2 + $0x38] sm:$0xfe] (!%p6617_p9), %v5379_v47 }
 0x3a9   : > { %v5356_v7 = vmax.f32 %v5342_v55, %v5349_v41  ;;  %v8482_v29 = vadd.f32 %v5132_v46, %v10487_v38  ;;  %v5134_v35 = vpop.f32.mrb[7].mxu0  ;;  %v5381_v38 = vrot.slane (!%p6617_p9), %v10974_v21, 7  ;;  %5407 = vst [vmem:[#allocation2 + $0x50] sm:$0x1] (!%p6617_p9), %v5379_v47  ;;  %5418 = vst.msk [vmem:[#allocation2 + $0xa0] sm:$0xfe] (!%p6617_p9), %vm5404_vm5, %v5386_v62 }
 0x3aa   : > { %v5357_v54 = vmax.f32 %v5343_v48, %v5349_v41  ;;  %v8483_v63 = vadd.f32 %v5134_v35, %v10493_v6  ;;  %v5383_v6 = vrot.slane (!%p6617_p9), %v10962_v51, 7  ;;  %5411 = vst [vmem:[#allocation2 + $0x68] sm:$0xfe] (!%p6617_p9), %v5382_v27  ;;  %5414 = vst [vmem:[#allocation2 + $0x80] sm:$0x1] (!%p6617_p9), %v5382_v27 }
 0x3ab   : > { %v5345_v13 = vadd.f32 %v8482_v29, %v5324_v34  ;;  %v5384_v10 = vrot.slane (!%p6617_p9), %v5356_v7, 7  ;;  %5410 = vst [vmem:[#allocation2 + $0x60] sm:$0xfe] (!%p6617_p9), %v5381_v38  ;;  %5413 = vst [vmem:[#allocation2 + $0x78] sm:$0x1] (!%p6617_p9), %v5381_v38 }
 0x3ac   : > { %v5346_v49 = vadd.f32 %v8483_v63, %v5328_v32  ;;  %v5385_v26 = vrot.slane (!%p6617_p9), %v5357_v54, 7  ;;  %5412 = vst.msk [vmem:[#allocation2 + $0x70] sm:$0xfe] (!%p6617_p9), %vm5404_vm5, %v5383_v6  ;;  %5424 = vst.msk [vmem:[#allocation2 + $0xd0] sm:$0xfe] (!%p6617_p9), %vm5404_vm5, %v5389_v25 }
 0x3ad   : > { %v5359_v24 = vmax.f32 %v5345_v13, %v5349_v41  ;;  %5415 = vst.msk [vmem:[#allocation2 + $0x88] sm:$0x1] (!%p6617_p9), %vm5408_vm6, %v5383_v6  ;;  %5416 = vst [vmem:[#allocation2 + $0x90] sm:$0xfe] (!%p6617_p9), %v5384_v10 }
 0x3ae   : > { %v5360_v43 = vmax.f32 %v5346_v49, %v5349_v41  ;;  %5419 = vst [vmem:[#allocation2 + $0xa8] sm:$0x1] (!%p6617_p9), %v5384_v10  ;;  %5417 = vst [vmem:[#allocation2 + $0x98] sm:$0xfe] (!%p6617_p9), %v5385_v26 }
 0x3af   : > { %v5387_v1 = vrot.slane %v5359_v24, 7  ;;  %5420 = vst [vmem:[#allocation2 + $0xb0] sm:$0x1] %v5385_v26  ;;  %5421 = vst.msk [vmem:[#allocation2 + $0xb8] sm:$0x1] %vm5408_vm6, %v5386_v62 }
 0x3b0   : > { %v5388_v45 = vrot.slane %v5360_v43, 7  ;;  %5427 = vst.msk [vmem:[#allocation2 + $0xe8] sm:$0x1] %vm5408_vm6, %v5389_v25 }
 0x3b1   : > { %5422 = vst [vmem:[#allocation2 + $0xc0] sm:$0xfe] %v5387_v1  ;;  %5425 = vst [vmem:[#allocation2 + $0xd8] sm:$0x1] %v5387_v1 }
 0x3b2   : > { %5423 = vst [vmem:[#allocation2 + $0xc8] sm:$0xfe] %v5388_v45  ;;  %5426 = vst [vmem:[#allocation2 + $0xe0] sm:$0x1] %v5388_v45 }
 0x3b3 PF: > { %p6618_p10 = scmp.ne.s32.totalorder %s8987_s18, 3 }
 0x3b4   : > { %5431 = vst [vmem:[%s9237_s27] sm:$0xff] (!%p6618_p10), %v10964_v61  ;;  %5432 = vst [vmem:[%s9237_s27 + $0x8] sm:$0xff] (!%p6618_p10), %v10969_v30 }
 0x3b5   : > { %5430 = sbr.rel (%p6618_p10) target bundleno = 956 (0x3bc), region = 52  ;;  %5433 = vst.msk [vmem:[%s9237_s27 + $0x10] sm:$0xff] (!%p6618_p10), %vm684_vm2, %v10966_v15  ;;  %5434 = vst [vmem:[%s9237_s27 + $0x18] sm:$0xff] (!%p6618_p10), %v10974_v21 }
 0x3b6   : > { %5435 = vst [vmem:[%s9237_s27 + $0x20] sm:$0xff] (!%p6618_p10), %v5354_v36  ;;  %5436 = vst.msk [vmem:[%s9237_s27 + $0x28] sm:$0xff] (!%p6618_p10), %vm684_vm2, %v10962_v51 }
 0x3b7   : > { %5437 = vst [vmem:[%s9237_s27 + $0x30] sm:$0xff] (!%p6618_p10), %v5356_v7  ;;  %5438 = vst [vmem:[%s9237_s27 + $0x38] sm:$0xff] (!%p6618_p10), %v5357_v54 }
 0x3b8   : > { %5439 = vst.msk [vmem:[%s9237_s27 + $0x40] sm:$0xff] (!%p6618_p10), %vm684_vm2, %v10976_v40  ;;  %5440 = vst [vmem:[%s9237_s27 + $0x48] sm:$0xff] (!%p6618_p10), %v5359_v24 }
 0x3b9   : > { %5441 = vst [vmem:[%s9237_s27 + $0x50] sm:$0xff] (!%p6618_p10), %v5360_v43  ;;  %5442 = vst.msk [vmem:[%s9237_s27 + $0x58] sm:$0xff] (!%p6618_p10), %vm684_vm2, %v10972_v39 }
 0x3bc PF: > { %s8688_s18 = smul.u32 1536, %s8991_s19  ;;  %s5457_s6 = sshll.u32 %s9237_s27, 4  ;;  %s11029_s6 = int_to_ptr.vmem [resolvable:$true] %s5457_s6 }
 0x3bd   : > { %s11033_s11 = scalar_lea.sflag [#allocation5], %s251_s30  ;;  %s8877_s15 = scalar_lea.vmem %s11029_s6, 1536 }
 0x3be   : > { %s11027_s26 = scalar_lea.hbm %s11097_s3, %s8688_s18  ;;  %p8878_p11 = scmp.ne.s32.totalorder %s11029_s6, %s8877_s15 }
 0x3bf   : > { %p11117_p7 = scmp.ne.s32.totalorder %s11110_s8, 0  ;;  %s9010_s19 = smov [#allocation8]  }
 0x3c0   : > { %s8881_s5 = sshll.u32 %s9010_s19, 4  ;;  %s8882_s5 = int_to_ptr.vmem [resolvable:$false] %s8881_s5 }
 0x3c1   : > { %p8879_p13 = pnand %p8878_p11, %p11117_p7  ;;  %s8883_s24 = scalar_lea.vmem %s8882_s5, 3072 }
 0x3c2   : > { %p8884_p0 = scmp.lt.s32.totalorder %s11029_s6, %s8882_s5  ;;  %p8885_p3 = scmp.lt.s32.totalorder %s8883_s24, %s8877_s15 }
 0x3c3   : > { %p8880_p2 = pneg %p8879_p13 }
 0x3c4   : > { %p8886_p6 = por %p8885_p3, %p8884_p0 }
 0x3c6   : > { %p8887_p1 = pnand %p8886_p6, %p8880_p2 }
 0x3c8   : > { %8890 = shalt.err (!%p8887_p1)
}
 0x3c9   : > { %s8891_s30 = scalar_lea.hbm %s11027_s26, 1536  ;;  %s8895_s1 = scalar_lea.hbm %s11097_s3, 3072 }
 0x3ca   : > { %p8892_p5 = scmp.ne.s32.totalorder %s11027_s26, %s8891_s30  ;;  %p8896_p12 = scmp.lt.u32.totalorder %s11027_s26, %s11097_s3 }
 0x3cb   : > { %p8897_p9 = scmp.lt.u32.totalorder %s8895_s1, %s8891_s30  ;;  %p8899_p11 = scmp.lt.u32.totalorder %s8891_s30, %s11027_s26 }
 0x3cc   : > { %p8893_p8 = pnand %p8892_p5, %p11117_p7 }
 0x3cd   : > { %p8898_p10 = por %p8897_p9, %p8896_p12 }
 0x3ce   : > { %p8894_p4 = pneg %p8893_p8 }
 0x3cf   : > { %p8900_p13 = por %p8899_p11, %p8898_p10 }
 0x3d1   : > { %p8901_p2 = pnand %p8900_p13, %p8894_p4 }
 0x3d3   : > { %8904 = shalt.err (!%p8901_p2)
}
 0x3d4   : > { %s9011_s27 = smov 384   ;;  %s9012_s4 = smov 24  }
 0x3d5   : > { %8693 = dma.vmem_to_hbm [thread:$0]  (%p11117_p7), %s11029_s6, 1536, %s11027_s26, %s11033_s11, %s9011_s27, %s9011_s27, %s9012_s4  }
 0x3d6 PF: > { %p8707_p0 = scmp.ge.s32.totalorder %s9003_s22, 2  ;;  %s5472_s18 = sand.u32 1, %s8963_s12  }
 0x3d7   : > { %p11118_p3 = scmp.ne.s32.totalorder %s11111_s10, 0  ;;  %s5473_s29 = scalar_lea.sflag [#allocation5], %s5472_s18 }
 0x3d9   : > { %p8703_p6 = pnand %p8707_p0, %p11118_p3 }
 0x3db   : > { %8958 = dma.done.wait (!%p8703_p6), %s5473_s29, 1536  }
 0x3dc   : > { %8960 = vsyncadd (!%p8703_p6), %s5473_s29, 4294965760  ;;  %s22_s22 = sadd.s32 1, %s9003_s22   ;;  %s11119_s8 = sld [smem:[#allocation15_spill]] }
 0x3dd   : > { %p19_p1 = scmp.ge.s32.totalorder %s22_s22, 10   ;;  %s11120_s19 = sld [smem:[#allocation12_spill]] }
 0x3de   : > { %s11121_s6 = sld [smem:[#allocation13_spill]]  ;;  %s11122_s21 = sld [smem:[#allocation14_spill]] }
 0x3df   : > { %s11123_s12 = smov %s8967_s13  ;;  %s11124_s13 = smov %s8971_s14 }
 0x3e0   : > { %s11125_s14 = smov %s9119_s7  ;;  %s11126_s15 = smov %s8979_s16 }
 0x3e1   : > { %s11127_s16 = smov %s8983_s17  ;;  %s11129_s18 = smov %s8995_s20 }
 0x3e2   : > { %s11128_s17 = smov %s11119_s8  ;;  %21 = sbr.rel (!%p19_p1) target bundleno = 13 (0xd), region = 115 }
 0x3e4   : > { %s11130_s20 = smov %s11121_s6 }
 0x3e9   :  { %5478 = vsyncpa [#allocation4], 1 }
 0x3ea   :  { %5480 = vsyncpa [#allocation4 + $0x1], 1 }
 0x3eb   :  { %5481 = vsyncpa [#allocation7], 1 }
 0x3ec   :  { %5483 = vsyncpa [#allocation7 + $0x1], 1 }
 0x3ed   :  { %5484 = vsyncpa [#allocation5], 1 }
 0x3ee   :  { %5486 = vsyncpa [#allocation5 + $0x1], 1 }

</bundles_post_ra>
